<compile_context>
chip_gen: v6e
topology: v6e:2x2x1
jax: 0.10.0
libtpu: 0.0.40
codegen_flags: <defaults>
</compile_context>

<pallas_src>
import jax
import jax.numpy as jnp
from jax.experimental import pallas as pl
from jax.experimental.pallas import tpu as pltpu

EPS = 1e-5                      # PyTorch BatchNorm default eps
C_IN = 643                      # 640 + 3, fixed by the module definition
C_IN_PAD = 768                  # contracted channel axis padded to a multiple of 128
MLP = (256, 512, 1024)
VMEM_LIMIT_BYTES = 48 * 1024 * 1024   # generous headroom; per-tile working set is a few MiB


# ---------------------------------------------------------------------------
# Kernels
# ---------------------------------------------------------------------------
def _sa_layer1_kernel(x_ref, w_ref, y_ref, stats_ref):
    """y = x^T @ w, contracting the channel axis of the [C, TN] tile (transposed LHS).

    Emits bf16 pre-BN activations and per-tile (sum, sum-of-squares) for BN stats.
    """
    x = x_ref[0]                                           # [C_IN_PAD, TN]  bf16
    y = jax.lax.dot_general(
        x, w_ref[...],
        dimension_numbers=(((0,), (0,)), ((), ())),        # contract channels
        preferred_element_type=jnp.float32)                # [TN, C_out] f32
    y_ref[...] = y.astype(jnp.bfloat16)
    ssum = jnp.sum(y, axis=0, keepdims=True)               # [1, C_out]
    ssq = jnp.sum(y * y, axis=0, keepdims=True)            # [1, C_out]
    stats_ref[...] = jnp.concatenate([ssum, ssq], axis=0)[None]   # [1, 2, C_out]


def _sa_mid_kernel(y_in_ref, scale_ref, shift_ref, w_ref, y_ref, stats_ref):
    """Fused BN(previous layer)+ReLU -> bf16 matmul -> per-tile (sum, sumsq)."""
    h = jnp.maximum(
        y_in_ref[...].astype(jnp.float32) * scale_ref[...] + shift_ref[...], 0.0)
    y = jnp.dot(h.astype(jnp.bfloat16), w_ref[...],
                preferred_element_type=jnp.float32)        # [TN, C_out] f32
    y_ref[...] = y.astype(jnp.bfloat16)
    ssum = jnp.sum(y, axis=0, keepdims=True)
    ssq = jnp.sum(y * y, axis=0, keepdims=True)
    stats_ref[...] = jnp.concatenate([ssum, ssq], axis=0)[None]


def _head_kernel(y_ref, scale_ref, shift_ref, g_ref, b_ref, out_ref, pooled_ref):
    """BN(layer3)+ReLU, per-batch max over the N points, then BatchNorm1d over B."""
    b = pl.program_id(0)

    @pl.when(b == 0)
    def _():
        out_ref[...] = jnp.zeros_like(out_ref)

    h = jnp.maximum(
        y_ref[...].astype(jnp.float32) * scale_ref[...] + shift_ref[...], 0.0)  # [N, C]
    pooled_ref[pl.ds(b, 1), :] = jnp.max(h, axis=0, keepdims=True)

    @pl.when(b == pl.num_programs(0) - 1)
    def _():
        p = pooled_ref[...]                                          # [B, C]
        mean = jnp.mean(p, axis=0, keepdims=True)
        var = jnp.mean((p - mean) ** 2, axis=0, keepdims=True)       # biased (train mode)
        out_ref[...] = (p - mean) * jax.lax.rsqrt(var + EPS) * g_ref[...] + b_ref[...]


# ---------------------------------------------------------------------------
# Wrapper
# ---------------------------------------------------------------------------
def _row_tile(n):
    """Points per grid tile: a multiple of 128 when possible, otherwise the full N."""
    for t in (512, 256, 128):
        if n % t == 0:
            return t
    return n


def _scale_shift(stats, gamma, beta, count):
    """Fold training-mode BN statistics into a per-channel (scale, shift) affine pair."""
    ssum = jnp.sum(stats[:, 0, :], axis=0, keepdims=True)            # [1, C]
    ssq = jnp.sum(stats[:, 1, :], axis=0, keepdims=True)             # [1, C]
    mean = ssum / count
    var = ssq / count - mean * mean                                  # one-pass, biased
    scale = gamma * jax.lax.rsqrt(var + EPS)
    shift = beta - mean * scale
    return scale, shift


def pointnet2_forward(xyz, params):
    """xyz: [B, 643, N] f32 -> (bn1 output [B, 1024] f32, pooled feature [B, 1024] f32)."""
    B, C_total, N = xyz.shape
    assert C_total == C_IN
    # TODO(synk): pad the point axis when N is not a multiple of 8 (layout requirement).
    assert N % 8 == 0

    TN = _row_tile(N)
    n_nt = N // TN
    T = B * n_nt
    count = jnp.float32(B * N)
    C1, C2, C3 = MLP

    # bf16 MXU inputs; zero-pad the contracted 643-channel axis to 768 (result unchanged).
    x = jnp.pad(xyz.astype(jnp.bfloat16), ((0, 0), (0, C_IN_PAD - C_total), (0, 0)))
    w1 = jnp.pad(params["w1"], ((0, C_IN_PAD - C_total), (0, 0))).astype(jnp.bfloat16)
    w2 = params["w2"].astype(jnp.bfloat16)
    w3 = params["w3"].astype(jnp.bfloat16)

    # ---- layer 1: contract over the channel axis of the [B, C, N] input -------------
    y1, st1 = pl.pallas_call(
        _sa_layer1_kernel,
        grid=(B, n_nt),
        in_specs=[
            pl.BlockSpec((1, C_IN_PAD, TN), lambda b, t: (b, 0, t)),
            pl.BlockSpec((C_IN_PAD, C1), lambda b, t: (0, 0)),
        ],
        out_specs=(
            pl.BlockSpec((TN, C1), lambda b, t: (b * n_nt + t, 0)),
            pl.BlockSpec((1, 2, C1), lambda b, t: (b * n_nt + t, 0, 0)),
        ),
        out_shape=(
            jax.ShapeDtypeStruct((B * N, C1), jnp.bfloat16),
            jax.ShapeDtypeStruct((T, 2, C1), jnp.float32),
        ),
        compiler_params=pltpu.CompilerParams(
            dimension_semantics=("parallel", "parallel"),
            vmem_limit_bytes=VMEM_LIMIT_BYTES),
    )(x, w1)
    sc1, sh1 = _scale_shift(st1, params["g1"], params["be1"], count)

    # ---- layers 2 and 3: fused BN(prev)+ReLU -> matmul -> partial stats --------------
    def mid_layer(y_in, scale, shift, w):
        rows, c_in = y_in.shape
        c_out = w.shape[1]
        t_rows = rows // TN
        return pl.pallas_call(
            _sa_mid_kernel,
            grid=(t_rows,),
            in_specs=[
                pl.BlockSpec((TN, c_in), lambda t: (t, 0)),
                pl.BlockSpec((1, c_in), lambda t: (0, 0)),
                pl.BlockSpec((1, c_in), lambda t: (0, 0)),
                pl.BlockSpec((c_in, c_out), lambda t: (0, 0)),
            ],
            out_specs=(
                pl.BlockSpec((TN, c_out), lambda t: (t, 0)),
                pl.BlockSpec((1, 2, c_out), lambda t: (t, 0, 0)),
            ),
            out_shape=(
                jax.ShapeDtypeStruct((rows, c_out), jnp.bfloat16),
                jax.ShapeDtypeStruct((t_rows, 2, c_out), jnp.float32),
            ),
            compiler_params=pltpu.CompilerParams(
                dimension_semantics=("parallel",),
                vmem_limit_bytes=VMEM_LIMIT_BYTES),
        )(y_in, scale, shift, w)

    y2, st2 = mid_layer(y1, sc1, sh1, w2)
    sc2, sh2 = _scale_shift(st2, params["g2"], params["be2"], count)

    y3, st3 = mid_layer(y2, sc2, sh2, w3)
    sc3, sh3 = _scale_shift(st3, params["g3"], params["be3"], count)

    # ---- per-batch max pool + BatchNorm1d head ---------------------------------------
    out, pooled = pl.pallas_call(
        _head_kernel,
        grid=(B,),
        in_specs=[
            pl.BlockSpec((N, C3), lambda b: (b, 0)),
            pl.BlockSpec((1, C3), lambda b: (0, 0)),
            pl.BlockSpec((1, C3), lambda b: (0, 0)),
            pl.BlockSpec((1, C3), lambda b: (0, 0)),
            pl.BlockSpec((1, C3), lambda b: (0, 0)),
        ],
        out_specs=(
            pl.BlockSpec((B, C3), lambda b: (0, 0)),
            pl.BlockSpec((B, C3), lambda b: (0, 0)),
        ),
        out_shape=(
            jax.ShapeDtypeStruct((B, C3), jnp.float32),
            jax.ShapeDtypeStruct((B, C3), jnp.float32),
        ),
        compiler_params=pltpu.CompilerParams(
            dimension_semantics=("arbitrary",),
            vmem_limit_bytes=VMEM_LIMIT_BYTES),
    )(y3, sc3, sh3, params["g4"], params["be4"])
    return out, pooled


# ---------------------------------------------------------------------------
# Parameters + pure-JAX reference (faithful f32 PyTorch semantics, bias included)
# ---------------------------------------------------------------------------
def init_params(key):
    """Deterministic synthetic parameters with the module's shapes (f32)."""
    dims = (C_IN,) + MLP
    ks = iter(jax.random.split(key, 16))
    p = {}
    for i in range(3):
        cin, cout = dims[i], dims[i + 1]
        p[f"w{i+1}"] = (jax.random.normal(next(ks), (cin, cout), jnp.float32)
                        / jnp.sqrt(jnp.float32(cin)))
        p[f"b{i+1}"] = 0.01 * jax.random.normal(next(ks), (1, cout), jnp.float32)
        p[f"g{i+1}"] = 1.0 + 0.1 * jax.random.normal(next(ks), (1, cout), jnp.float32)
        p[f"be{i+1}"] = 0.1 * jax.random.normal(next(ks), (1, cout), jnp.float32)
    p["g4"] = 1.0 + 0.1 * jax.random.normal(next(ks), (1, MLP[-1]), jnp.float32)
    p["be4"] = 0.1 * jax.random.normal(next(ks), (1, MLP[-1]), jnp.float32)
    return p


def _bn_train(y, gamma, beta):
    """Training-mode batch norm over axis 0 (biased variance), per channel."""
    mean = jnp.mean(y, axis=0, keepdims=True)
    var = jnp.mean((y - mean) ** 2, axis=0, keepdims=True)
    return (y - mean) * jax.lax.rsqrt(var + EPS) * gamma + beta


def reference(xyz, params):
    """Pure-JAX f32 reference mirroring the PyTorch forward (conv bias included)."""
    B, C_total, N = xyz.shape
    h = jnp.transpose(xyz, (0, 2, 1)).reshape(B * N, C_total)
    for i in range(3):
        y = h @ params[f"w{i+1}"] + params[f"b{i+1}"]
        h = jnp.maximum(_bn_train(y, params[f"g{i+1}"], params[f"be{i+1}"]), 0.0)
    pooled = jnp.max(h.reshape(B, N, MLP[-1]), axis=1)
    return _bn_train(pooled, params["g4"], params["be4"]), pooled


if __name__ == "__main__":
    B, N = 2, 32   # channel counts are fixed by the module: 643 -> 256 -> 512 -> 1024
    key = jax.random.PRNGKey(0)
    k_in, k_par = jax.random.split(key)
    xyz = jax.random.normal(k_in, (B, C_IN, N), jnp.float32)
    params = init_params(k_par)

    fwd = jax.jit(pointnet2_forward)
    out, pooled = jax.block_until_ready(fwd(xyz, params))
    ref_out, ref_pooled = reference(xyz, params)

    assert out.shape == (B, MLP[-1])
    assert bool(jnp.all(jnp.isfinite(out)))

    # Full-coverage check of everything up to the final BatchNorm1d (global pooled feature).
    assert bool(jnp.allclose(pooled, ref_pooled, rtol=6e-2, atol=8e-2))

    # BatchNorm1d over a batch of 2 is ~a sign function of the gap between the two pooled
    # maxima; channels where that gap sits at the bf16 noise floor are ill-conditioned, so
    # the final output is compared only where the gap is resolvable (those channels are
    # already covered by the `pooled` check above).
    gap = jnp.abs(ref_pooled[0] - ref_pooled[1])
    ok_ch = gap > 0.15
    assert float(jnp.mean(ok_ch.astype(jnp.float32))) > 0.5
    err_ok = jnp.abs(out - ref_out) <= (5e-2 + 5e-2 * jnp.abs(ref_out))
    assert bool(jnp.all(jnp.where(ok_ch[None, :], err_ok, True)))

    print("KERNEL_OK")
</pallas_src>

<mosaic_0001>
module attributes {stable_mosaic.version = 11 : i64} {
  func.func @_sa_layer1_kernel(%arg0: i32, %arg1: i32, %arg2: memref<1x768x32xbf16, #tpu.memory_space<vmem>>, %arg3: memref<768x256xbf16, #tpu.memory_space<vmem>>, %arg4: memref<32x256xbf16, #tpu.memory_space<vmem>>, %arg5: memref<1x2x256xf32, #tpu.memory_space<vmem>>) attributes {dimension_semantics = [#tpu.dimension_semantics<parallel>, #tpu.dimension_semantics<parallel>], iteration_bounds = array<i64: 2, 1>, scalar_prefetch = 0 : i64, scratch_operands = 0 : i64, tpu.core_type = #tpu.core_type<tc>, window_params = [{transform_indices = @transform_0, window_bounds = array<i64: 1, 768, 32>}, {pipeline_mode = #tpu.pipeline_mode<synchronous>, transform_indices = @transform_1, window_bounds = array<i64: 768, 256>}, {transform_indices = @transform_2, window_bounds = array<i64: 32, 256>}, {transform_indices = @transform_3, window_bounds = array<i64: 1, 2, 256>}]} {
    %c0 = arith.constant 0 : index
    %c0_0 = arith.constant 0 : index
    %c0_1 = arith.constant 0 : index
    %0 = vector.load %arg2[%c0, %c0_0, %c0_1] : memref<1x768x32xbf16, #tpu.memory_space<vmem>>, vector<1x768x32xbf16>
    %1 = vector.shape_cast %0 : vector<1x768x32xbf16> to vector<768x32xbf16>
    %c0_2 = arith.constant 0 : index
    %c0_3 = arith.constant 0 : index
    %2 = vector.load %arg3[%c0_2, %c0_3] : memref<768x256xbf16, #tpu.memory_space<vmem>>, vector<768x256xbf16>
    %cst = arith.constant dense<0.000000e+00> : vector<32x256xf32>
    %3 = tpu.matmul %1, %2, %cst {dimension_numbers = #tpu.dot_dimension_numbers<[0], [0], [1], [1], [0, 1, 1, 1], [], []>} : vector<768x32xbf16>, vector<768x256xbf16>, vector<32x256xf32> -> vector<32x256xf32>
    %4 = arith.truncf %3 : vector<32x256xf32> to vector<32x256xbf16>
    %c0_4 = arith.constant 0 : index
    %c0_5 = arith.constant 0 : index
    %5 = vector.load %arg4[%c0_4, %c0_5] : memref<32x256xbf16, #tpu.memory_space<vmem>>, vector<32x256xbf16>
    tpu.vector_store %arg4[%c0_4, %c0_5], %4 {strides = array<i32>} : memref<32x256xbf16, #tpu.memory_space<vmem>>, vector<32x256xbf16>,
    %cst_6 = arith.constant dense<0.000000e+00> : vector<256xf32>
    %6 = vector.multi_reduction <add>, %3, %cst_6 [0] : vector<32x256xf32> to vector<256xf32>
    %7 = vector.shape_cast %6 : vector<256xf32> to vector<1x256xf32>
    %8 = arith.mulf %3, %3 : vector<32x256xf32>
    %cst_7 = arith.constant dense<0.000000e+00> : vector<256xf32>
    %9 = vector.multi_reduction <add>, %8, %cst_7 [0] : vector<32x256xf32> to vector<256xf32>
    %10 = vector.shape_cast %9 : vector<256xf32> to vector<1x256xf32>
    %11 = tpu.concatenate %7, %10 in 0 : vector<1x256xf32>, vector<1x256xf32> -> vector<2x256xf32>
    %12 = vector.shape_cast %11 : vector<2x256xf32> to vector<1x2x256xf32>
    %c0_8 = arith.constant 0 : index
    %c0_9 = arith.constant 0 : index
    %c0_10 = arith.constant 0 : index
    %13 = vector.load %arg5[%c0_8, %c0_9, %c0_10] : memref<1x2x256xf32, #tpu.memory_space<vmem>>, vector<1x2x256xf32>
    tpu.vector_store %arg5[%c0_8, %c0_9, %c0_10], %12 {strides = array<i32>} : memref<1x2x256xf32, #tpu.memory_space<vmem>>, vector<1x2x256xf32>,
    return
  }
  func.func @transform_0(%arg0: i32, %arg1: i32) -> (i32, i32, i32) {
    %c0_i32 = arith.constant 0 : i32
    %c0_i32_0 = arith.constant 0 : i32
    return %arg0, %c0_i32, %arg1 : i32, i32, i32
  }
  func.func @transform_1(%arg0: i32, %arg1: i32) -> (i32, i32) {
    %c0_i32 = arith.constant 0 : i32
    %c0_i32_0 = arith.constant 0 : i32
    %c0_i32_1 = arith.constant 0 : i32
    return %c0_i32, %c0_i32_0 : i32, i32
  }
  func.func @transform_2(%arg0: i32, %arg1: i32) -> (i32, i32) {
    %c1_i32 = arith.constant 1 : i32
    %0 = arith.muli %arg0, %c1_i32 : i32
    %1 = arith.addi %0, %arg1 : i32
    %c0_i32 = arith.constant 0 : i32
    %c0_i32_0 = arith.constant 0 : i32
    return %1, %c0_i32 : i32, i32
  }
  func.func @transform_3(%arg0: i32, %arg1: i32) -> (i32, i32, i32) {
    %c1_i32 = arith.constant 1 : i32
    %0 = arith.muli %arg0, %c1_i32 : i32
    %1 = arith.addi %0, %arg1 : i32
    %c0_i32 = arith.constant 0 : i32
    %c0_i32_0 = arith.constant 0 : i32
    %c0_i32_1 = arith.constant 0 : i32
    return %1, %c0_i32, %c0_i32_0 : i32, i32, i32
  }
}

module attributes {stable_mosaic.version = 11 : i64} {
  func.func @_sa_mid_kernel(%arg0: i32, %arg1: memref<32x256xbf16, #tpu.memory_space<vmem>>, %arg2: memref<1x256xf32, #tpu.memory_space<vmem>>, %arg3: memref<1x256xf32, #tpu.memory_space<vmem>>, %arg4: memref<256x512xbf16, #tpu.memory_space<vmem>>, %arg5: memref<32x512xbf16, #tpu.memory_space<vmem>>, %arg6: memref<1x2x512xf32, #tpu.memory_space<vmem>>) attributes {dimension_semantics = [#tpu.dimension_semantics<parallel>], iteration_bounds = array<i64: 2>, scalar_prefetch = 0 : i64, scratch_operands = 0 : i64, tpu.core_type = #tpu.core_type<tc>, window_params = [{transform_indices = @transform_0, window_bounds = array<i64: 32, 256>}, {pipeline_mode = #tpu.pipeline_mode<synchronous>, transform_indices = @transform_1, window_bounds = array<i64: 1, 256>}, {pipeline_mode = #tpu.pipeline_mode<synchronous>, transform_indices = @transform_2, window_bounds = array<i64: 1, 256>}, {pipeline_mode = #tpu.pipeline_mode<synchronous>, transform_indices = @transform_3, window_bounds = array<i64: 256, 512>}, {transform_indices = @transform_4, window_bounds = array<i64: 32, 512>}, {transform_indices = @transform_5, window_bounds = array<i64: 1, 2, 512>}]} {
    %c0 = arith.constant 0 : index
    %c0_0 = arith.constant 0 : index
    %0 = vector.load %arg1[%c0, %c0_0] : memref<32x256xbf16, #tpu.memory_space<vmem>>, vector<32x256xbf16>
    %1 = arith.extf %0 : vector<32x256xbf16> to vector<32x256xf32>
    %c0_1 = arith.constant 0 : index
    %c0_2 = arith.constant 0 : index
    %2 = vector.load %arg2[%c0_1, %c0_2] : memref<1x256xf32, #tpu.memory_space<vmem>>, vector<1x256xf32>
    %3 = vector.broadcast %2 : vector<1x256xf32> to vector<32x256xf32>
    %4 = arith.mulf %1, %3 : vector<32x256xf32>
    %c0_3 = arith.constant 0 : index
    %c0_4 = arith.constant 0 : index
    %5 = vector.load %arg3[%c0_3, %c0_4] : memref<1x256xf32, #tpu.memory_space<vmem>>, vector<1x256xf32>
    %6 = vector.broadcast %5 : vector<1x256xf32> to vector<32x256xf32>
    %7 = arith.addf %4, %6 : vector<32x256xf32>
    %cst = arith.constant 0.000000e+00 : f32
    %8 = vector.broadcast %cst : f32 to vector<32x256xf32>
    %9 = arith.maximumf %7, %8 : vector<32x256xf32>
    %10 = arith.truncf %9 : vector<32x256xf32> to vector<32x256xbf16>
    %c0_5 = arith.constant 0 : index
    %c0_6 = arith.constant 0 : index
    %11 = vector.load %arg4[%c0_5, %c0_6] : memref<256x512xbf16, #tpu.memory_space<vmem>>, vector<256x512xbf16>
    %cst_7 = arith.constant dense<0.000000e+00> : vector<32x512xf32>
    %12 = tpu.matmul %10, %11, %cst_7 {dimension_numbers = #tpu.dot_dimension_numbers<[1], [0], [0], [1], [0, 0, 1, 1], [], []>} : vector<32x256xbf16>, vector<256x512xbf16>, vector<32x512xf32> -> vector<32x512xf32>
    %13 = arith.truncf %12 : vector<32x512xf32> to vector<32x512xbf16>
    %c0_8 = arith.constant 0 : index
    %c0_9 = arith.constant 0 : index
    %14 = vector.load %arg5[%c0_8, %c0_9] : memref<32x512xbf16, #tpu.memory_space<vmem>>, vector<32x512xbf16>
    tpu.vector_store %arg5[%c0_8, %c0_9], %13 {strides = array<i32>} : memref<32x512xbf16, #tpu.memory_space<vmem>>, vector<32x512xbf16>,
    %cst_10 = arith.constant dense<0.000000e+00> : vector<512xf32>
    %15 = vector.multi_reduction <add>, %12, %cst_10 [0] : vector<32x512xf32> to vector<512xf32>
    %16 = vector.shape_cast %15 : vector<512xf32> to vector<1x512xf32>
    %17 = arith.mulf %12, %12 : vector<32x512xf32>
    %cst_11 = arith.constant dense<0.000000e+00> : vector<512xf32>
    %18 = vector.multi_reduction <add>, %17, %cst_11 [0] : vector<32x512xf32> to vector<512xf32>
    %19 = vector.shape_cast %18 : vector<512xf32> to vector<1x512xf32>
    %20 = tpu.concatenate %16, %19 in 0 : vector<1x512xf32>, vector<1x512xf32> -> vector<2x512xf32>
    %21 = vector.shape_cast %20 : vector<2x512xf32> to vector<1x2x512xf32>
    %c0_12 = arith.constant 0 : index
    %c0_13 = arith.constant 0 : index
    %c0_14 = arith.constant 0 : index
    %22 = vector.load %arg6[%c0_12, %c0_13, %c0_14] : memref<1x2x512xf32, #tpu.memory_space<vmem>>, vector<1x2x512xf32>
    tpu.vector_store %arg6[%c0_12, %c0_13, %c0_14], %21 {strides = array<i32>} : memref<1x2x512xf32, #tpu.memory_space<vmem>>, vector<1x2x512xf32>,
    return
  }
  func.func @transform_0(%arg0: i32) -> (i32, i32) {
    %c0_i32 = arith.constant 0 : i32
    %c0_i32_0 = arith.constant 0 : i32
    return %arg0, %c0_i32 : i32, i32
  }
  func.func @transform_1(%arg0: i32) -> (i32, i32) {
    %c0_i32 = arith.constant 0 : i32
    %c0_i32_0 = arith.constant 0 : i32
    %c0_i32_1 = arith.constant 0 : i32
    return %c0_i32, %c0_i32_0 : i32, i32
  }
  func.func @transform_2(%arg0: i32) -> (i32, i32) {
    %c0_i32 = arith.constant 0 : i32
    %c0_i32_0 = arith.constant 0 : i32
    %c0_i32_1 = arith.constant 0 : i32
    return %c0_i32, %c0_i32_0 : i32, i32
  }
  func.func @transform_3(%arg0: i32) -> (i32, i32) {
    %c0_i32 = arith.constant 0 : i32
    %c0_i32_0 = arith.constant 0 : i32
    %c0_i32_1 = arith.constant 0 : i32
    return %c0_i32, %c0_i32_0 : i32, i32
  }
  func.func @transform_4(%arg0: i32) -> (i32, i32) {
    %c0_i32 = arith.constant 0 : i32
    %c0_i32_0 = arith.constant 0 : i32
    return %arg0, %c0_i32 : i32, i32
  }
  func.func @transform_5(%arg0: i32) -> (i32, i32, i32) {
    %c0_i32 = arith.constant 0 : i32
    %c0_i32_0 = arith.constant 0 : i32
    %c0_i32_1 = arith.constant 0 : i32
    return %arg0, %c0_i32, %c0_i32_0 : i32, i32, i32
  }
}

module attributes {stable_mosaic.version = 11 : i64} {
  func.func @_sa_mid_kernel(%arg0: i32, %arg1: memref<32x512xbf16, #tpu.memory_space<vmem>>, %arg2: memref<1x512xf32, #tpu.memory_space<vmem>>, %arg3: memref<1x512xf32, #tpu.memory_space<vmem>>, %arg4: memref<512x1024xbf16, #tpu.memory_space<vmem>>, %arg5: memref<32x1024xbf16, #tpu.memory_space<vmem>>, %arg6: memref<1x2x1024xf32, #tpu.memory_space<vmem>>) attributes {dimension_semantics = [#tpu.dimension_semantics<parallel>], iteration_bounds = array<i64: 2>, scalar_prefetch = 0 : i64, scratch_operands = 0 : i64, tpu.core_type = #tpu.core_type<tc>, window_params = [{transform_indices = @transform_0, window_bounds = array<i64: 32, 512>}, {pipeline_mode = #tpu.pipeline_mode<synchronous>, transform_indices = @transform_1, window_bounds = array<i64: 1, 512>}, {pipeline_mode = #tpu.pipeline_mode<synchronous>, transform_indices = @transform_2, window_bounds = array<i64: 1, 512>}, {pipeline_mode = #tpu.pipeline_mode<synchronous>, transform_indices = @transform_3, window_bounds = array<i64: 512, 1024>}, {transform_indices = @transform_4, window_bounds = array<i64: 32, 1024>}, {transform_indices = @transform_5, window_bounds = array<i64: 1, 2, 1024>}]} {
    %c0 = arith.constant 0 : index
    %c0_0 = arith.constant 0 : index
    %0 = vector.load %arg1[%c0, %c0_0] : memref<32x512xbf16, #tpu.memory_space<vmem>>, vector<32x512xbf16>
    %1 = arith.extf %0 : vector<32x512xbf16> to vector<32x512xf32>
    %c0_1 = arith.constant 0 : index
    %c0_2 = arith.constant 0 : index
    %2 = vector.load %arg2[%c0_1, %c0_2] : memref<1x512xf32, #tpu.memory_space<vmem>>, vector<1x512xf32>
    %3 = vector.broadcast %2 : vector<1x512xf32> to vector<32x512xf32>
    %4 = arith.mulf %1, %3 : vector<32x512xf32>
    %c0_3 = arith.constant 0 : index
    %c0_4 = arith.constant 0 : index
    %5 = vector.load %arg3[%c0_3, %c0_4] : memref<1x512xf32, #tpu.memory_space<vmem>>, vector<1x512xf32>
    %6 = vector.broadcast %5 : vector<1x512xf32> to vector<32x512xf32>
    %7 = arith.addf %4, %6 : vector<32x512xf32>
    %cst = arith.constant 0.000000e+00 : f32
    %8 = vector.broadcast %cst : f32 to vector<32x512xf32>
    %9 = arith.maximumf %7, %8 : vector<32x512xf32>
    %10 = arith.truncf %9 : vector<32x512xf32> to vector<32x512xbf16>
    %c0_5 = arith.constant 0 : index
    %c0_6 = arith.constant 0 : index
    %11 = vector.load %arg4[%c0_5, %c0_6] : memref<512x1024xbf16, #tpu.memory_space<vmem>>, vector<512x1024xbf16>
    %cst_7 = arith.constant dense<0.000000e+00> : vector<32x1024xf32>
    %12 = tpu.matmul %10, %11, %cst_7 {dimension_numbers = #tpu.dot_dimension_numbers<[1], [0], [0], [1], [0, 0, 1, 1], [], []>} : vector<32x512xbf16>, vector<512x1024xbf16>, vector<32x1024xf32> -> vector<32x1024xf32>
    %13 = arith.truncf %12 : vector<32x1024xf32> to vector<32x1024xbf16>
    %c0_8 = arith.constant 0 : index
    %c0_9 = arith.constant 0 : index
    %14 = vector.load %arg5[%c0_8, %c0_9] : memref<32x1024xbf16, #tpu.memory_space<vmem>>, vector<32x1024xbf16>
    tpu.vector_store %arg5[%c0_8, %c0_9], %13 {strides = array<i32>} : memref<32x1024xbf16, #tpu.memory_space<vmem>>, vector<32x1024xbf16>,
    %cst_10 = arith.constant dense<0.000000e+00> : vector<1024xf32>
    %15 = vector.multi_reduction <add>, %12, %cst_10 [0] : vector<32x1024xf32> to vector<1024xf32>
    %16 = vector.shape_cast %15 : vector<1024xf32> to vector<1x1024xf32>
    %17 = arith.mulf %12, %12 : vector<32x1024xf32>
    %cst_11 = arith.constant dense<0.000000e+00> : vector<1024xf32>
    %18 = vector.multi_reduction <add>, %17, %cst_11 [0] : vector<32x1024xf32> to vector<1024xf32>
    %19 = vector.shape_cast %18 : vector<1024xf32> to vector<1x1024xf32>
    %20 = tpu.concatenate %16, %19 in 0 : vector<1x1024xf32>, vector<1x1024xf32> -> vector<2x1024xf32>
    %21 = vector.shape_cast %20 : vector<2x1024xf32> to vector<1x2x1024xf32>
    %c0_12 = arith.constant 0 : index
    %c0_13 = arith.constant 0 : index
    %c0_14 = arith.constant 0 : index
    %22 = vector.load %arg6[%c0_12, %c0_13, %c0_14] : memref<1x2x1024xf32, #tpu.memory_space<vmem>>, vector<1x2x1024xf32>
    tpu.vector_store %arg6[%c0_12, %c0_13, %c0_14], %21 {strides = array<i32>} : memref<1x2x1024xf32, #tpu.memory_space<vmem>>, vector<1x2x1024xf32>,
    return
  }
  func.func @transform_0(%arg0: i32) -> (i32, i32) {
    %c0_i32 = arith.constant 0 : i32
    %c0_i32_0 = arith.constant 0 : i32
    return %arg0, %c0_i32 : i32, i32
  }
  func.func @transform_1(%arg0: i32) -> (i32, i32) {
    %c0_i32 = arith.constant 0 : i32
    %c0_i32_0 = arith.constant 0 : i32
    %c0_i32_1 = arith.constant 0 : i32
    return %c0_i32, %c0_i32_0 : i32, i32
  }
  func.func @transform_2(%arg0: i32) -> (i32, i32) {
    %c0_i32 = arith.constant 0 : i32
    %c0_i32_0 = arith.constant 0 : i32
    %c0_i32_1 = arith.constant 0 : i32
    return %c0_i32, %c0_i32_0 : i32, i32
  }
  func.func @transform_3(%arg0: i32) -> (i32, i32) {
    %c0_i32 = arith.constant 0 : i32
    %c0_i32_0 = arith.constant 0 : i32
    %c0_i32_1 = arith.constant 0 : i32
    return %c0_i32, %c0_i32_0 : i32, i32
  }
  func.func @transform_4(%arg0: i32) -> (i32, i32) {
    %c0_i32 = arith.constant 0 : i32
    %c0_i32_0 = arith.constant 0 : i32
    return %arg0, %c0_i32 : i32, i32
  }
  func.func @transform_5(%arg0: i32) -> (i32, i32, i32) {
    %c0_i32 = arith.constant 0 : i32
    %c0_i32_0 = arith.constant 0 : i32
    %c0_i32_1 = arith.constant 0 : i32
    return %arg0, %c0_i32, %c0_i32_0 : i32, i32, i32
  }
}

module attributes {stable_mosaic.version = 11 : i64} {
  func.func @_head_kernel(%arg0: i32, %arg1: memref<32x1024xbf16, #tpu.memory_space<vmem>>, %arg2: memref<1x1024xf32, #tpu.memory_space<vmem>>, %arg3: memref<1x1024xf32, #tpu.memory_space<vmem>>, %arg4: memref<1x1024xf32, #tpu.memory_space<vmem>>, %arg5: memref<1x1024xf32, #tpu.memory_space<vmem>>, %arg6: memref<2x1024xf32, #tpu.memory_space<vmem>>, %arg7: memref<2x1024xf32, #tpu.memory_space<vmem>>) attributes {dimension_semantics = [#tpu.dimension_semantics<arbitrary>], iteration_bounds = array<i64: 2>, scalar_prefetch = 0 : i64, scratch_operands = 0 : i64, tpu.core_type = #tpu.core_type<tc>, window_params = [{transform_indices = @transform_0, window_bounds = array<i64: 32, 1024>}, {pipeline_mode = #tpu.pipeline_mode<synchronous>, transform_indices = @transform_1, window_bounds = array<i64: 1, 1024>}, {pipeline_mode = #tpu.pipeline_mode<synchronous>, transform_indices = @transform_2, window_bounds = array<i64: 1, 1024>}, {pipeline_mode = #tpu.pipeline_mode<synchronous>, transform_indices = @transform_3, window_bounds = array<i64: 1, 1024>}, {pipeline_mode = #tpu.pipeline_mode<synchronous>, transform_indices = @transform_4, window_bounds = array<i64: 1, 1024>}, {pipeline_mode = #tpu.pipeline_mode<synchronous>, transform_indices = @transform_5, window_bounds = array<i64: 2, 1024>}, {pipeline_mode = #tpu.pipeline_mode<synchronous>, transform_indices = @transform_6, window_bounds = array<i64: 2, 1024>}]} {
    %c0_i32 = arith.constant 0 : i32
    %0 = arith.cmpi eq, %arg0, %c0_i32 : i32
    %1 = arith.extui %0 : i1 to i32
    %c0_i32_0 = arith.constant 0 : i32
    %2 = arith.cmpi ne, %1, %c0_i32_0 : i32
    scf.if %2 {
      %cst_9 = arith.constant 0.000000e+00 : f32
      %20 = vector.broadcast %cst_9 : f32 to vector<2x1024xf32>
      %c0_10 = arith.constant 0 : index
      %c0_11 = arith.constant 0 : index
      %21 = vector.load %arg6[%c0_10, %c0_11] : memref<2x1024xf32, #tpu.memory_space<vmem>>, vector<2x1024xf32>
      tpu.vector_store %arg6[%c0_10, %c0_11], %20 {strides = array<i32>} : memref<2x1024xf32, #tpu.memory_space<vmem>>, vector<2x1024xf32>,
    } else {
    }
    %c0 = arith.constant 0 : index
    %c0_1 = arith.constant 0 : index
    %3 = vector.load %arg1[%c0, %c0_1] : memref<32x1024xbf16, #tpu.memory_space<vmem>>, vector<32x1024xbf16>
    %4 = arith.extf %3 : vector<32x1024xbf16> to vector<32x1024xf32>
    %c0_2 = arith.constant 0 : index
    %c0_3 = arith.constant 0 : index
    %5 = vector.load %arg2[%c0_2, %c0_3] : memref<1x1024xf32, #tpu.memory_space<vmem>>, vector<1x1024xf32>
    %6 = vector.broadcast %5 : vector<1x1024xf32> to vector<32x1024xf32>
    %7 = arith.mulf %4, %6 : vector<32x1024xf32>
    %c0_4 = arith.constant 0 : index
    %c0_5 = arith.constant 0 : index
    %8 = vector.load %arg3[%c0_4, %c0_5] : memref<1x1024xf32, #tpu.memory_space<vmem>>, vector<1x1024xf32>
    %9 = vector.broadcast %8 : vector<1x1024xf32> to vector<32x1024xf32>
    %10 = arith.addf %7, %9 : vector<32x1024xf32>
    %cst = arith.constant 0.000000e+00 : f32
    %11 = vector.broadcast %cst : f32 to vector<32x1024xf32>
    %12 = arith.maximumf %10, %11 : vector<32x1024xf32>
    %cst_6 = arith.constant dense<0xFF800000> : vector<1024xf32>
    %13 = vector.multi_reduction <maximumf>, %12, %cst_6 [0] : vector<32x1024xf32> to vector<1024xf32>
    %14 = vector.shape_cast %13 : vector<1024xf32> to vector<1x1024xf32>
    %15 = arith.index_cast %arg0 : i32 to index
    %c0_7 = arith.constant 0 : index
    %16 = vector.load %arg7[%15, %c0_7] : memref<2x1024xf32, #tpu.memory_space<vmem>>, vector<1x1024xf32>
    tpu.vector_store %arg7[%15, %c0_7], %14 {strides = array<i32>} : memref<2x1024xf32, #tpu.memory_space<vmem>>, vector<1x1024xf32>,
    %c1_i32 = arith.constant 1 : i32
    %17 = arith.cmpi eq, %arg0, %c1_i32 : i32
    %18 = arith.extui %17 : i1 to i32
    %c0_i32_8 = arith.constant 0 : i32
    %19 = arith.cmpi ne, %18, %c0_i32_8 : i32
    scf.if %19 {
      %c0_9 = arith.constant 0 : index
      %c0_10 = arith.constant 0 : index
      %20 = vector.load %arg7[%c0_9, %c0_10] : memref<2x1024xf32, #tpu.memory_space<vmem>>, vector<2x1024xf32>
      %cst_11 = arith.constant dense<0.000000e+00> : vector<1024xf32>
      %21 = vector.multi_reduction <add>, %20, %cst_11 [0] : vector<2x1024xf32> to vector<1024xf32>
      %22 = vector.shape_cast %21 : vector<1024xf32> to vector<1x1024xf32>
      %cst_12 = arith.constant 2.000000e+00 : f32
      %23 = vector.broadcast %cst_12 : f32 to vector<1x1024xf32>
      %24 = arith.divf %22, %23 : vector<1x1024xf32>
      %25 = vector.broadcast %24 : vector<1x1024xf32> to vector<2x1024xf32>
      %26 = arith.subf %20, %25 : vector<2x1024xf32>
      %27 = arith.mulf %26, %26 : vector<2x1024xf32>
      %cst_13 = arith.constant dense<0.000000e+00> : vector<1024xf32>
      %28 = vector.multi_reduction <add>, %27, %cst_13 [0] : vector<2x1024xf32> to vector<1024xf32>
      %29 = vector.shape_cast %28 : vector<1024xf32> to vector<1x1024xf32>
      %cst_14 = arith.constant 2.000000e+00 : f32
      %30 = vector.broadcast %cst_14 : f32 to vector<1x1024xf32>
      %31 = arith.divf %29, %30 : vector<1x1024xf32>
      %32 = vector.broadcast %24 : vector<1x1024xf32> to vector<2x1024xf32>
      %33 = arith.subf %20, %32 : vector<2x1024xf32>
      %cst_15 = arith.constant 9.99999974E-6 : f32
      %34 = vector.broadcast %cst_15 : f32 to vector<1x1024xf32>
      %35 = arith.addf %31, %34 : vector<1x1024xf32>
      %36 = math.rsqrt %35 : vector<1x1024xf32>
      %37 = vector.broadcast %36 : vector<1x1024xf32> to vector<2x1024xf32>
      %38 = arith.mulf %33, %37 : vector<2x1024xf32>
      %c0_16 = arith.constant 0 : index
      %c0_17 = arith.constant 0 : index
      %39 = vector.load %arg4[%c0_16, %c0_17] : memref<1x1024xf32, #tpu.memory_space<vmem>>, vector<1x1024xf32>
      %40 = vector.broadcast %39 : vector<1x1024xf32> to vector<2x1024xf32>
      %41 = arith.mulf %38, %40 : vector<2x1024xf32>
      %c0_18 = arith.constant 0 : index
      %c0_19 = arith.constant 0 : index
      %42 = vector.load %arg5[%c0_18, %c0_19] : memref<1x1024xf32, #tpu.memory_space<vmem>>, vector<1x1024xf32>
      %43 = vector.broadcast %42 : vector<1x1024xf32> to vector<2x1024xf32>
      %44 = arith.addf %41, %43 : vector<2x1024xf32>
      %c0_20 = arith.constant 0 : index
      %c0_21 = arith.constant 0 : index
      %45 = vector.load %arg6[%c0_20, %c0_21] : memref<2x1024xf32, #tpu.memory_space<vmem>>, vector<2x1024xf32>
      tpu.vector_store %arg6[%c0_20, %c0_21], %44 {strides = array<i32>} : memref<2x1024xf32, #tpu.memory_space<vmem>>, vector<2x1024xf32>,
    } else {
    }
    return
  }
  func.func @transform_0(%arg0: i32) -> (i32, i32) {
    %c0_i32 = arith.constant 0 : i32
    %c0_i32_0 = arith.constant 0 : i32
    return %arg0, %c0_i32 : i32, i32
  }
  func.func @transform_1(%arg0: i32) -> (i32, i32) {
    %c0_i32 = arith.constant 0 : i32
    %c0_i32_0 = arith.constant 0 : i32
    %c0_i32_1 = arith.constant 0 : i32
    return %c0_i32, %c0_i32_0 : i32, i32
  }
  func.func @transform_2(%arg0: i32) -> (i32, i32) {
    %c0_i32 = arith.constant 0 : i32
    %c0_i32_0 = arith.constant 0 : i32
    %c0_i32_1 = arith.constant 0 : i32
    return %c0_i32, %c0_i32_0 : i32, i32
  }
  func.func @transform_3(%arg0: i32) -> (i32, i32) {
    %c0_i32 = arith.constant 0 : i32
    %c0_i32_0 = arith.constant 0 : i32
    %c0_i32_1 = arith.constant 0 : i32
    return %c0_i32, %c0_i32_0 : i32, i32
  }
  func.func @transform_4(%arg0: i32) -> (i32, i32) {
    %c0_i32 = arith.constant 0 : i32
    %c0_i32_0 = arith.constant 0 : i32
    %c0_i32_1 = arith.constant 0 : i32
    return %c0_i32, %c0_i32_0 : i32, i32
  }
  func.func @transform_5(%arg0: i32) -> (i32, i32) {
    %c0_i32 = arith.constant 0 : i32
    %c0_i32_0 = arith.constant 0 : i32
    %c0_i32_1 = arith.constant 0 : i32
    return %c0_i32, %c0_i32_0 : i32, i32
  }
  func.func @transform_6(%arg0: i32) -> (i32, i32) {
    %c0_i32 = arith.constant 0 : i32
    %c0_i32_0 = arith.constant 0 : i32
    %c0_i32_1 = arith.constant 0 : i32
    return %c0_i32, %c0_i32_0 : i32, i32
  }
}

</mosaic_0001>

<bundles_post_ra>
// kernel: pointnet2_forward.5
= control target key start
LH: loop header
LB: loop body
LE: loop exit
PB: predicated region body
PF: predicated region fallthrough
CT: control target
= control target key end

     0   :  { %s1305_s18 = smov 0   ;;  %s1547_s0 = inlined_call_operand.vmem [shape: bf16[64,256], index: 0, kind: input, shape index: {}]   ;;  %s1548_s1 = inlined_call_operand.vmem [shape: f32[1,256], index: 1, kind: input, shape index: {}]   ;;  %s1549_s2 = inlined_call_operand.vmem [shape: f32[1,256], index: 2, kind: input, shape index: {}]   ;;  %s1550_s3 = inlined_call_operand.vmem [shape: bf16[256,512], index: 3, kind: input, shape index: {}]   ;;  %s1551_s4 = inlined_call_operand.vmem [shape: bf16[64,512], index: 4, kind: output, shape index: {0}]   ;;  %s1552_s5 = inlined_call_operand.vmem [shape: f32[2,2,512], index: 5, kind: output, shape index: {1}]  }
   0x1 LB: > { %s1311_s19 = sadd.s32 4294967295, %s1272_s18   ;;  %p1067_p0 = scmp.ge.s32.totalorder %s1272_s18, 1  ;;  %s1272_s18 = sphi %s1305_s18, %s16_s18  }
   0x2   : > { %p192_p1 = scmp.lt.s32.totalorder %s1272_s18, 3 }
   0x4   : > { %p193_p2 = pnand %p1067_p0, %p192_p1 }
   0x5   : > { %s1068_s9 = sshll.u32 (!%p193_p2), %s1311_s19, 2  ;;  %p241_p4 = scmp.lt.s32.totalorder (!%p193_p2), %s1311_s19, 1 }
   0x6   : > { %196 = sbr.rel (%p193_p2) target bundleno = 310 (0x136), region = 36  ;;  %p228_p3 = scmp.lt.s32.totalorder (!%p193_p2), %s1068_s9, 7 }
   0xb   : > { %v1170_v0 = vld [vmem:[%s1550_s3 + $0xe4] ss:$16 sps:$4 sm:$0xff]   ;;  %v1172_v1 = vld [vmem:[%s1550_s3 + $0xec] ss:$16 sps:$4 sm:$0xff]   ;;  %v1174_v2 = vld [vmem:[%s1550_s3 + $0xe0] ss:$16 sps:$4 sm:$0xff]   ;;  %v260_v36 = vlaneseq }
   0xc   : > { %694 = vmatprep.subr.bf16.mxu0 %v1170_v0  ;;  %v1175_v3 = vld [vmem:[%s1550_s3 + $0xe8] ss:$16 sps:$4 sm:$0xff]   ;;  %747 = vmatprep.subr.bf16.mxu1 %v1172_v1  ;;  %v1176_v4 = vld [vmem:[%s1550_s3 + $0xc4] ss:$16 sps:$4 sm:$0xff]   ;;  %v1178_v5 = vld [vmem:[%s1550_s3 + $0xcc] ss:$16 sps:$4 sm:$0xff]  }
   0xd   : > { %695 = vmatpush1.bf16.msra.mxu0 %v1174_v2  ;;  %748 = vmatpush1.bf16.msra.mxu1 %v1175_v3  ;;  %v1180_v6 = vld [vmem:[%s1550_s3 + $0xc0] ss:$16 sps:$4 sm:$0xff]   ;;  %v1181_v7 = vld [vmem:[%s1550_s3 + $0xc8] ss:$16 sps:$4 sm:$0xff]   ;;  %v1182_v8 = vld [vmem:[%s1550_s3 + $0xa4] ss:$16 sps:$4 sm:$0xff]  }
   0xe   : > { %696 = vmatprep.subr.bf16.mxu0 %v1176_v4  ;;  %749 = vmatprep.subr.bf16.mxu1 %v1178_v5  ;;  %v1184_v9 = vld [vmem:[%s1550_s3 + $0xac] ss:$16 sps:$4 sm:$0xff]   ;;  %v1186_v10 = vld [vmem:[%s1550_s3 + $0xa0] ss:$16 sps:$4 sm:$0xff]   ;;  %v1187_v11 = vld [vmem:[%s1550_s3 + $0xa8] ss:$16 sps:$4 sm:$0xff]  }
   0xf   : > { %v1188_v12 = vld [vmem:[%s1550_s3 + $0x84] ss:$16 sps:$4 sm:$0xff]   ;;  %v1190_v13 = vld [vmem:[%s1550_s3 + $0x8c] ss:$16 sps:$4 sm:$0xff]   ;;  %v1192_v14 = vld [vmem:[%s1550_s3 + $0x80] ss:$16 sps:$4 sm:$0xff]  }
  0x10   : > { %v1193_v15 = vld [vmem:[%s1550_s3 + $0x88] ss:$16 sps:$4 sm:$0xff]   ;;  %v1194_v16 = vld [vmem:[%s1550_s3 + $0x64] ss:$16 sps:$4 sm:$0xff]   ;;  %v1196_v17 = vld [vmem:[%s1550_s3 + $0x6c] ss:$16 sps:$4 sm:$0xff]  }
  0x11   : > { %697 = vmatpush1.bf16.msra.mxu0 %v1180_v6  ;;  %750 = vmatpush1.bf16.msra.mxu1 %v1181_v7  ;;  %v1198_v18 = vld [vmem:[%s1550_s3 + $0x60] ss:$16 sps:$4 sm:$0xff]   ;;  %v1199_v19 = vld [vmem:[%s1550_s3 + $0x68] ss:$16 sps:$4 sm:$0xff]   ;;  %v1200_v20 = vld [vmem:[%s1550_s3 + $0x44] ss:$16 sps:$4 sm:$0xff]  }
  0x12   : > { %698 = vmatprep.subr.bf16.mxu0 %v1182_v8  ;;  %751 = vmatprep.subr.bf16.mxu1 %v1184_v9  ;;  %v1202_v21 = vld [vmem:[%s1550_s3 + $0x4c] ss:$16 sps:$4 sm:$0xff]   ;;  %v1204_v22 = vld [vmem:[%s1550_s3 + $0x40] ss:$16 sps:$4 sm:$0xff]   ;;  %v1205_v23 = vld [vmem:[%s1550_s3 + $0x48] ss:$16 sps:$4 sm:$0xff]  }
  0x13   : > { %v1206_v24 = vld [vmem:[%s1550_s3 + $0x24] ss:$16 sps:$4 sm:$0xff]   ;;  %v1208_v25 = vld [vmem:[%s1550_s3 + $0x2c] ss:$16 sps:$4 sm:$0xff]   ;;  %v1210_v26 = vld [vmem:[%s1550_s3 + $0x20] ss:$16 sps:$4 sm:$0xff]  }
  0x14   : > { %v1211_v27 = vld [vmem:[%s1550_s3 + $0x28] ss:$16 sps:$4 sm:$0xff]   ;;  %v1212_v28 = vld [vmem:[%s1550_s3 + $0x4] ss:$16 sps:$4 sm:$0xff]   ;;  %v1214_v29 = vld [vmem:[%s1550_s3 + $0xc] ss:$16 sps:$4 sm:$0xff]  }
  0x15   : > { %699 = vmatpush1.bf16.msra.mxu0 %v1186_v10  ;;  %752 = vmatpush1.bf16.msra.mxu1 %v1187_v11  ;;  %v1216_v30 = vld [vmem:[%s1550_s3] ss:$16 sps:$4 sm:$0xff]   ;;  %v1217_v31 = vld [vmem:[%s1550_s3 + $0x8] ss:$16 sps:$4 sm:$0xff]   ;;  %v1218_v32 = vld [vmem:[%s1550_s3 + $0x1e4] ss:$16 sps:$4 sm:$0xff]  }
  0x16   : > { %700 = vmatprep.subr.bf16.mxu0 %v1188_v12  ;;  %753 = vmatprep.subr.bf16.mxu1 %v1190_v13  ;;  %v1220_v33 = vld [vmem:[%s1550_s3 + $0x1ec] ss:$16 sps:$4 sm:$0xff]   ;;  %v1222_v34 = vld [vmem:[%s1550_s3 + $0x1e0] ss:$16 sps:$4 sm:$0xff]   ;;  %v1223_v35 = vld [vmem:[%s1550_s3 + $0x1e8] ss:$16 sps:$4 sm:$0xff]  }
  0x17   : > { %v1224_v37 = vld [vmem:[%s1550_s3 + $0x1c4] ss:$16 sps:$4 sm:$0xff]   ;;  %s1554_s9 = smov (!%p228_p3, %s1068_s9), 7  ;;  %v1226_v38 = vld [vmem:[%s1550_s3 + $0x1cc] ss:$16 sps:$4 sm:$0xff]   ;;  %v1435_v40 = vshrl.u32 %v260_v36, 7 }
  0x18   : > { %v1228_v39 = vld [vmem:[%s1550_s3 + $0x1c0] ss:$16 sps:$4 sm:$0xff]   ;;  %v1229_v41 = vld [vmem:[%s1550_s3 + $0x1c8] ss:$16 sps:$4 sm:$0xff]   ;;  %v1230_v42 = vld [vmem:[%s1550_s3 + $0x1a4] ss:$16 sps:$4 sm:$0xff]  }
  0x19   : > { %701 = vmatpush1.bf16.msra.mxu0 %v1192_v14  ;;  %754 = vmatpush1.bf16.msra.mxu1 %v1193_v15  ;;  %s1150_s10 = sshll.u32 %s1554_s9, 3  ;;  %v1232_v43 = vld [vmem:[%s1550_s3 + $0x1ac] ss:$16 sps:$4 sm:$0xff]   ;;  %v1234_v44 = vld [vmem:[%s1550_s3 + $0x1a0] ss:$16 sps:$4 sm:$0xff]   ;;  %v266_v47 = vsub.s32 1, %v1435_v40 }
  0x1a   : > { %702 = vmatprep.subr.bf16.mxu0 %v1194_v16  ;;  %755 = vmatprep.subr.bf16.mxu1 %v1196_v17  ;;  %v1235_v45 = vld [vmem:[%s1550_s3 + $0x1a8] ss:$16 sps:$4 sm:$0xff]   ;;  %s232_s21 = scalar_lea.vmem %s1547_s0, %s1150_s10  ;;  %v1236_v46 = vld [vmem:[%s1550_s3 + $0x184] ss:$16 sps:$4 sm:$0xff]   ;;  %v1238_v48 = vld [vmem:[%s1550_s3 + $0x18c] ss:$16 sps:$4 sm:$0xff]  }
  0x1b   : > { %v246_v49 = vld [vmem:[%s232_s21] sm:$0xff]  ;;  %v247_v50 = vld [vmem:[%s232_s21 + $0x8] sm:$0xff]  ;;  %v262_v53 = vsub.s32 0, %v1435_v40  ;;  %v248_v62 = vld [vmem:[%s232_s21 + $0x10] sm:$0xff]  ;;  %s1151_s22 = sshll.u32 %s1554_s9, 4  ;;  %vm944_vm0 = vcmask 1040384  }
  0x1c   : > { %v251_v51 = vunpack.c.h.bf16 %v246_v49  ;;  %v258_v52 = vld [vmem:[%s1548_s1] sm:$0x3]  ;;  %v1241_v56 = vld [vmem:[%s1550_s3 + $0x188] ss:$16 sps:$4 sm:$0xff]   ;;  %v1242_v57 = vld [vmem:[%s1550_s3 + $0x164] ss:$16 sps:$4 sm:$0xff]   ;;  %v253_v58 = vunpack.c.h.bf16 %v247_v50  ;;  %v250_v2 = vunpack.c.l.bf16 %v246_v49  ;;  %v252_v3 = vunpack.c.l.bf16 %v247_v50  ;;  %s1528_s25 = scalar_lea.vmem %s1551_s4, %s1151_s22 }
  0x1d   : > { %703 = vmatpush1.bf16.msra.mxu0 %v1198_v18  ;;  %756 = vmatpush1.bf16.msra.mxu1 %v1199_v19  ;;  %v278_v54 = vld [vmem:[%s1549_s2] sm:$0x3]  ;;  %v267_v59 = vrot.slane %v258_v52, %v266_v47  ;;  %v1244_v60 = vld [vmem:[%s1550_s3 + $0x16c] ss:$16 sps:$4 sm:$0xff]   ;;  %v263_v4 = vrot.slane %v258_v52, %v262_v53  ;;  %v1247_v6 = vld [vmem:[%s1550_s3 + $0x168] ss:$16 sps:$4 sm:$0xff]   ;;  %v255_v9 = vunpack.c.h.bf16 %v248_v62 }
  0x1e   : > { %704 = vmatprep.subr.bf16.mxu0 %v1200_v20  ;;  %757 = vmatprep.subr.bf16.mxu1 %v1202_v21  ;;  %v1240_v55 = vld [vmem:[%s1550_s3 + $0x180] ss:$16 sps:$4 sm:$0xff]   ;;  %v287_v61 = vrot.slane %v278_v54, %v266_v47  ;;  %v249_v63 = vld [vmem:[%s232_s21 + $0x18] sm:$0xff]  ;;  %v1248_v11 = vld [vmem:[%s1550_s3 + $0x144] ss:$16 sps:$4 sm:$0xff]   ;;  %v283_v15 = vrot.slane %v278_v54, %v262_v53  ;;  %s1556_s19 = smov (!%p241_p4, %s1311_s19), 1 }
  0x1f   : > { %v271_v0 = vmul.f32 %v267_v59, %v251_v51  ;;  %v273_v1 = vmul.f32 %v267_v59, %v253_v58  ;;  %v1246_v5 = vld [vmem:[%s1550_s3 + $0x160] ss:$16 sps:$4 sm:$0xff]   ;;  %v257_v10 = vunpack.c.h.bf16 %v249_v63  ;;  %v1250_v12 = vld [vmem:[%s1550_s3 + $0x14c] ss:$16 sps:$4 sm:$0xff]   ;;  %v270_v16 = vmul.f32 %v263_v4, %v250_v2  ;;  %v1253_v19 = vld [vmem:[%s1550_s3 + $0x148] ss:$16 sps:$4 sm:$0xff]  }
  0x20   : > { %v272_v17 = vmul.f32 %v263_v4, %v252_v3  ;;  %v1252_v18 = vld [vmem:[%s1550_s3 + $0x140] ss:$16 sps:$4 sm:$0xff]   ;;  %v275_v21 = vmul.f32 %v267_v59, %v255_v9  ;;  %s1152_s9 = sshll.u32 %s1556_s19, 3 }
  0x21   : > { %705 = vmatpush1.bf16.msra.mxu0 %v1204_v22  ;;  %758 = vmatpush1.bf16.msra.mxu1 %v1205_v23  ;;  %v291_v7 = vadd.f32 %v287_v61, %v271_v0  ;;  %v293_v8 = vadd.f32 %v287_v61, %v273_v1  ;;  %v277_v22 = vmul.f32 %v267_v59, %v257_v10  ;;  %v1254_v23 = vld [vmem:[%s1550_s3 + $0x124] ss:$16 sps:$4 sm:$0xff]   ;;  %s245_s28 = scalar_lea.vmem %s1552_s5, %s1152_s9 }
  0x22   : > { %706 = vmatprep.subr.bf16.mxu0 %v1206_v24  ;;  %759 = vmatprep.subr.bf16.mxu1 %v1208_v25  ;;  %v1256_v24 = vld [vmem:[%s1550_s3 + $0x12c] ss:$16 sps:$4 sm:$0xff]   ;;  %v290_v25 = vadd.f32 %v283_v15, %v270_v16 }
  0x23   : > { %v299_v13 = vmax.f32 %v291_v7, 0.0  ;;  %v301_v14 = vmax.f32 %v293_v8, 0.0 }
  0x25   : > { %707 = vmatpush1.bf16.msra.mxu0 %v1210_v26  ;;  %760 = vmatpush1.bf16.msra.mxu1 %v1211_v27  ;;  %v307_v20 = vpack.c.bf16 %v301_v14, %v299_v13  ;;  %v292_v26 = vadd.f32 %v283_v15, %v272_v17  ;;  %v254_v27 = vunpack.c.l.bf16 %v248_v62 }
  0x26   : > { %708 = vmatprep.subr.bf16.mxu0 %v1212_v28  ;;  %761 = vmatprep.subr.bf16.mxu1 %v1214_v29  ;;  %v256_v28 = vunpack.c.l.bf16 %v249_v63  ;;  %v1258_v29 = vld [vmem:[%s1550_s3 + $0x120] ss:$16 sps:$4 sm:$0xff]  }
  0x27   : > { %726 = vmatprep.mubr.bf16.mxu0 %v307_v20  ;;  %779 = vmatprep.mubr.bf16.mxu1 %v307_v20  ;;  %v300_v36 = vmax.f32 %v292_v26, 0.0 }
  0x29   : > { %709 = vmatpush1.bf16.msra.mxu0 %v1216_v30  ;;  %762 = vmatpush1.bf16.msra.mxu1 %v1217_v31  ;;  %v1259_v30 = vld [vmem:[%s1550_s3 + $0x128] ss:$16 sps:$4 sm:$0xff]   ;;  %v295_v31 = vadd.f32 %v287_v61, %v275_v21 }
  0x2a   : > { %710 = vmatprep.subr.bf16.mxu0 %v1218_v32  ;;  %763 = vmatprep.subr.bf16.mxu1 %v1220_v33  ;;  %v297_v32 = vadd.f32 %v287_v61, %v277_v22  ;;  %v1260_v33 = vld [vmem:[%s1550_s3 + $0x104] ss:$16 sps:$4 sm:$0xff]  }
  0x2d   : > { %711 = vmatpush2.bf16.msra.mxu0 %v1222_v34  ;;  %764 = vmatpush2.bf16.msra.mxu1 %v1223_v35  ;;  %v1262_v34 = vld [vmem:[%s1550_s3 + $0x10c] ss:$16 sps:$4 sm:$0xff]   ;;  %v298_v35 = vmax.f32 %v290_v25, 0.0 }
  0x2e   : > { %712 = vmatprep.subr.bf16.mxu0 %v1224_v37  ;;  %765 = vmatprep.subr.bf16.mxu1 %v1226_v38  ;;  %v274_v37 = vmul.f32 %v263_v4, %v254_v27  ;;  %v276_v38 = vmul.f32 %v263_v4, %v256_v28 }
  0x31   : > { %713 = vmatpush2.bf16.msra.mxu0 %v1228_v39  ;;  %766 = vmatpush2.bf16.msra.mxu1 %v1229_v41  ;;  %v1264_v39 = vld [vmem:[%s1550_s3 + $0x100] ss:$16 sps:$4 sm:$0xff]   ;;  %v1265_v41 = vld [vmem:[%s1550_s3 + $0x108] ss:$16 sps:$4 sm:$0xff]  }
  0x32   : > { %714 = vmatprep.subr.bf16.mxu0 %v1230_v42  ;;  %767 = vmatprep.subr.bf16.mxu1 %v1232_v43  ;;  %v303_v42 = vmax.f32 %v295_v31, 0.0  ;;  %v305_v43 = vmax.f32 %v297_v32, 0.0 }
  0x34   : > { %v309_v47 = vpack.c.bf16 %v305_v43, %v303_v42 }
  0x35   : > { %715 = vmatpush2.bf16.msra.mxu0 %v1234_v44  ;;  %768 = vmatpush2.bf16.msra.mxu1 %v1235_v45  ;;  %v306_v44 = vpack.c.bf16 %v300_v36, %v298_v35  ;;  %v294_v45 = vadd.f32 %v283_v15, %v274_v37 }
  0x36   : > { %716 = vmatprep.subr.bf16.mxu0 %v1236_v46  ;;  %769 = vmatprep.subr.bf16.mxu1 %v1238_v48  ;;  %v296_v46 = vadd.f32 %v283_v15, %v276_v38 }
  0x37   : > { %v302_v48 = vmax.f32 %v294_v45, 0.0 }
  0x38   : > { %v304_v49 = vmax.f32 %v296_v46, 0.0 }
  0x39   : > { %717 = vmatpush2.bf16.msra.mxu0 %v1240_v55  ;;  %770 = vmatpush2.bf16.msra.mxu1 %v1241_v56 }
  0x3a   : > { %718 = vmatprep.subr.bf16.mxu0 %v1242_v57  ;;  %771 = vmatprep.subr.bf16.mxu1 %v1244_v60  ;;  %v308_v50 = vpack.c.bf16 %v304_v49, %v302_v48 }
  0x3d   : > { %719 = vmatpush2.bf16.msra.mxu0 %v1246_v5  ;;  %772 = vmatpush2.bf16.msra.mxu1 %v1247_v6 }
  0x3e   : > { %720 = vmatprep.subr.bf16.mxu0 %v1248_v11  ;;  %773 = vmatprep.subr.bf16.mxu1 %v1250_v12 }
  0x41   : > { %721 = vmatpush2.bf16.msra.mxu0 %v1252_v18  ;;  %774 = vmatpush2.bf16.msra.mxu1 %v1253_v19 }
  0x42   : > { %722 = vmatprep.subr.bf16.mxu0 %v1254_v23  ;;  %775 = vmatprep.subr.bf16.mxu1 %v1256_v24 }
  0x45   : > { %723 = vmatpush2.bf16.msra.mxu0 %v1258_v29  ;;  %776 = vmatpush2.bf16.msra.mxu1 %v1259_v30 }
  0x46   : > { %724 = vmatprep.subr.bf16.mxu0 %v1260_v33  ;;  %777 = vmatprep.subr.bf16.mxu1 %v1262_v34 }
  0x49   : > { %725 = vmatpush2.bf16.msra.mxu0 %v1264_v39  ;;  %778 = vmatpush2.bf16.msra.mxu1 %v1265_v41 }
  0x4c   : > { %727 = vmatmul.mubr.bf16.vlgmr.msra.gmra.mxu0 %v306_v44  ;;  %780 = vmatmul.mubr.bf16.vlgmr.msra.gmra.mxu1 %v306_v44 }
  0x4d   : > { %736 = vmatprep.mubr.bf16.mxu0 %v309_v47  ;;  %789 = vmatprep.mubr.bf16.mxu1 %v309_v47 }
  0x54   : > { %737 = vmatmul.mubr.bf16.gmra.mxu0 %v308_v50  ;;  %790 = vmatmul.mubr.bf16.gmra.mxu1 %v308_v50 }
 0x10c   : > { %v728_v51 = vpop.f32.mrf.mxu0  ;;  %v781_v52 = vpop.f32.mrf.mxu1 }
 0x10d   : > { %v892_v61 = vmul.f32 %v728_v51, %v728_v51  ;;  %v894_v62 = vmul.f32 %v781_v52, %v781_v52 }
 0x10e   : > { %v730_v53 = vpop.f32.mrf.mxu0  ;;  %v783_v54 = vpop.f32.mrf.mxu1 }
 0x10f   : > { %v1153_v55 = vpack.c.bf16 %v730_v53, %v728_v51  ;;  %v1154_v56 = vpack.c.bf16 %v783_v54, %v781_v52  ;;  %v893_v1 = vmul.f32 %v730_v53, %v730_v53  ;;  %v895_v2 = vmul.f32 %v783_v54, %v783_v54 }
 0x110   : > { %v732_v57 = vpop.f32.mrf.mxu0  ;;  %v785_v58 = vpop.f32.mrf.mxu1 }
 0x111   : > { %848 = vst [vmem:[%s1528_s25] sm:$0xff] %v1153_v55  ;;  %849 = vst [vmem:[%s1528_s25 + $0x8] sm:$0xff] %v1154_v56  ;;  %v896_v59 = vmul.f32 %v732_v57, %v732_v57  ;;  %v898_v60 = vmul.f32 %v785_v58, %v785_v58  ;;  %v856_v3 = vadd.f32 %v732_v57, %v728_v51 }
 0x112   : > { %v734_v63 = vpop.f32.mrf.mxu0  ;;  %v787_v0 = vpop.f32.mrf.mxu1  ;;  %v874_v5 = vadd.f32 %v785_v58, %v781_v52 }
 0x113   : > { %v1155_v4 = vpack.c.bf16 %v734_v63, %v732_v57  ;;  %v897_v6 = vmul.f32 %v734_v63, %v734_v63  ;;  %v1156_v7 = vpack.c.bf16 %v787_v0, %v785_v58  ;;  %v899_v8 = vmul.f32 %v787_v0, %v787_v0 }
 0x114   : > { %v738_v9 = vpop.f32.mrf.mxu0  ;;  %v791_v10 = vpop.f32.mrf.mxu1  ;;  %v908_v11 = vadd.f32 %v896_v59, %v892_v61  ;;  %v926_v12 = vadd.f32 %v898_v60, %v894_v62  ;;  %v865_v15 = vadd.f32 %v734_v63, %v730_v53  ;;  %v883_v16 = vadd.f32 %v787_v0, %v783_v54 }
 0x115   : > { %850 = vst [vmem:[%s1528_s25 + $0x10] sm:$0xff] %v1155_v4  ;;  %v900_v13 = vmul.f32 %v738_v9, %v738_v9  ;;  %v902_v14 = vmul.f32 %v791_v10, %v791_v10  ;;  %851 = vst [vmem:[%s1528_s25 + $0x18] sm:$0xff] %v1156_v7  ;;  %v857_v17 = vadd.f32 %v856_v3, %v738_v9 }
 0x116   : > { %v875_v18 = vadd.f32 %v874_v5, %v791_v10  ;;  %v740_v19 = vpop.f32.mrf.mxu0  ;;  %v793_v20 = vpop.f32.mrf.mxu1  ;;  %v917_v21 = vadd.f32 %v897_v6, %v893_v1  ;;  %v935_v22 = vadd.f32 %v899_v8, %v895_v2 }
 0x117   : > { %v909_v23 = vadd.f32 %v908_v11, %v900_v13  ;;  %v1157_v24 = vpack.c.bf16 %v740_v19, %v738_v9  ;;  %v927_v25 = vadd.f32 %v926_v12, %v902_v14  ;;  %v901_v26 = vmul.f32 %v740_v19, %v740_v19 }
 0x118   : > { %v1158_v27 = vpack.c.bf16 %v793_v20, %v791_v10  ;;  %v903_v28 = vmul.f32 %v793_v20, %v793_v20  ;;  %v742_v29 = vpop.f32.mrf.mxu0  ;;  %v795_v30 = vpop.f32.mrf.mxu1  ;;  %v866_v35 = vadd.f32 %v865_v15, %v740_v19  ;;  %v884_v37 = vadd.f32 %v883_v16, %v793_v20 }
 0x119   : > { %852 = vst [vmem:[%s1528_s25 + $0x20] sm:$0xff] %v1157_v24  ;;  %v858_v31 = vadd.f32 %v857_v17, %v742_v29  ;;  %v904_v32 = vmul.f32 %v742_v29, %v742_v29  ;;  %v876_v33 = vadd.f32 %v875_v18, %v795_v30  ;;  %v906_v34 = vmul.f32 %v795_v30, %v795_v30 }
 0x11a   : > { %v918_v36 = vadd.f32 %v917_v21, %v901_v26  ;;  %853 = vst [vmem:[%s1528_s25 + $0x28] sm:$0xff] %v1158_v27  ;;  %v936_v38 = vadd.f32 %v935_v22, %v903_v28  ;;  %v744_v39 = vpop.f32.mrf.mxu0  ;;  %v797_v41 = vpop.f32.mrf.mxu1  ;;  %v1274_v12 = vmov 1983009808  }
 0x11b   : > { %v859_v42 = vrot.slane %v858_v31, 4  ;;  %v910_v43 = vadd.f32 %v909_v23, %v904_v32  ;;  %v877_v44 = vrot.slane %v876_v33, 4  ;;  %v928_v45 = vadd.f32 %v927_v25, %v906_v34 }
 0x11c   : > { %v1159_v46 = vpack.c.bf16 %v744_v39, %v742_v29  ;;  %v867_v47 = vadd.f32 %v866_v35, %v744_v39  ;;  %v905_v48 = vmul.f32 %v744_v39, %v744_v39  ;;  %v1160_v49 = vpack.c.bf16 %v797_v41, %v795_v30 }
 0x11d   : > { %v860_v50 = vadd.f32 %v859_v42, %v858_v31  ;;  %v911_v51 = vrot.slane %v910_v43, 4  ;;  %v878_v52 = vadd.f32 %v877_v44, %v876_v33  ;;  %v929_v53 = vrot.slane %v928_v45, 4 }
 0x11e   : > { %854 = vst [vmem:[%s1528_s25 + $0x30] sm:$0xff] %v1159_v46  ;;  %v868_v54 = vrot.slane %v867_v47, 4  ;;  %v919_v55 = vadd.f32 %v918_v36, %v905_v48  ;;  %855 = vst [vmem:[%s1528_s25 + $0x38] sm:$0xff] %v1160_v49  ;;  %v885_v56 = vadd.f32 %v884_v37, %v797_v41  ;;  %v907_v57 = vmul.f32 %v797_v41, %v797_v41 }
 0x11f   : > { %v861_v58 = vrot.slane %v860_v50, 2  ;;  %v912_v59 = vadd.f32 %v911_v51, %v910_v43  ;;  %v879_v60 = vrot.slane %v878_v52, 2  ;;  %v930_v61 = vadd.f32 %v929_v53, %v928_v45 }
 0x120   : > { %v869_v62 = vadd.f32 %v868_v54, %v867_v47  ;;  %v920_v63 = vrot.slane %v919_v55, 4  ;;  %v886_v0 = vrot.slane %v885_v56, 4  ;;  %v937_v1 = vadd.f32 %v936_v38, %v907_v57 }
 0x121   : > { %v862_v2 = vadd.f32 %v861_v58, %v860_v50  ;;  %v913_v3 = vrot.slane %v912_v59, 2  ;;  %v931_v4 = vrot.slane %v930_v61, 2  ;;  %v880_v10 = vadd.f32 %v879_v60, %v878_v52 }
 0x122   : > { %v870_v5 = vrot.slane %v869_v62, 2  ;;  %v921_v6 = vadd.f32 %v920_v63, %v919_v55  ;;  %v887_v7 = vadd.f32 %v886_v0, %v885_v56  ;;  %v938_v8 = vrot.slane %v937_v1, 4 }
 0x123   : > { %v914_v9 = vadd.f32 %v913_v3, %v912_v59  ;;  %v932_v11 = vadd.f32 %v931_v4, %v930_v61  ;;  %v956_v13 = vunpack.c.l.s4 %v1274_v12  ;;  %v863_v18 = vrot.slane %v862_v2, 1 }
 0x124   : > { %v871_v14 = vadd.f32 %v870_v5, %v869_v62  ;;  %v922_v15 = vrot.slane %v921_v6, 2  ;;  %v888_v16 = vrot.slane %v887_v7, 2  ;;  %v939_v17 = vadd.f32 %v938_v8, %v937_v1 }
 0x125   : > { %v915_v19 = vrot.slane %v914_v9, 1  ;;  %v933_v20 = vrot.slane %v932_v11, 1  ;;  %v881_v25 = vrot.slane %v880_v10, 1  ;;  %v957_v26 = vunpack.c.0.s8 %v956_v13 }
 0x126   : > { %v872_v21 = vrot.slane %v871_v14, 1  ;;  %v923_v22 = vadd.f32 %v922_v15, %v921_v6  ;;  %v889_v23 = vadd.f32 %v888_v16, %v887_v7  ;;  %v940_v24 = vrot.slane %v939_v17, 2 }
 0x127   : > { %v916_v27 = vadd.f32 %v915_v19, %v914_v9  ;;  %v864_v31 = vadd.f32 %v863_v18, %v862_v2  ;;  %v934_v32 = vadd.f32 %v933_v20, %v932_v11  ;;  %v882_v36 = vadd.f32 %v881_v25, %v880_v10 }
 0x128   : > { %v924_v28 = vrot.slane %v923_v22, 1  ;;  %v890_v29 = vrot.slane %v889_v23, 1  ;;  %v941_v30 = vadd.f32 %v940_v24, %v939_v17  ;;  %v873_v33 = vadd.f32 %v872_v21, %v871_v14 }
 0x129   : > { %v960_v37 = vsub.s32 %v957_v26, %v1435_v40  ;;  %v945_v38 = vsel %vm944_vm0, %v864_v31, %v916_v27  ;;  %v947_v44 = vsel %vm944_vm0, %v882_v36, %v934_v32 }
 0x12a   : > { %v925_v34 = vadd.f32 %v924_v28, %v923_v22  ;;  %v942_v35 = vrot.slane %v941_v30, 1  ;;  %v891_v41 = vadd.f32 %v890_v29, %v889_v23 }
 0x12c   : > { %v946_v39 = vsel %vm944_vm0, %v873_v33, %v925_v34  ;;  %v943_v42 = vadd.f32 %v942_v35, %v941_v30 }
 0x12d   : > { %v953_v43 = vcombine.low %v945_v38, %v946_v39 }
 0x12e   : > { %v948_v45 = vsel %vm944_vm0, %v891_v41, %v943_v42 }
 0x12f   : > { %v961_v46 = vrot.slane %v953_v43, %v960_v37  ;;  %v954_v47 = vcombine.low %v947_v44, %v948_v45 }
 0x131   : > { %v968_v48 = vrot.slane %v954_v47, %v960_v37 }
 0x133   : > { %v969_v49 = vcombine.low %v961_v46, %v968_v48 }
 0x135   : > { %971 = vst [vmem:[%s245_s28] sm:$0xff] %v969_v49 }
 0x136 PF: > { %s16_s18 = sadd.s32 1, %s1272_s18  }
 0x137   : > { %p13_p5 = scmp.ge.s32.totalorder %s16_s18, 4  }
 0x139   :  { %15 = sbr.rel (!%p13_p5) target bundleno = 1 (0x1), region = 78 }

// kernel: pointnet2_forward.4
= control target key start
LH: loop header
LB: loop body
LE: loop exit
PB: predicated region body
PF: predicated region fallthrough
CT: control target
= control target key end

     0   :  { %s2095_s12 = smov 0   ;;  %s2097_s13 = smov 0   ;;  %s2488_s0 = inlined_call_operand.vmem [shape: bf16[2,768,32], index: 0, kind: input, shape index: {}]   ;;  %s2489_s1 = inlined_call_operand.vmem [shape: bf16[768,256], index: 1, kind: input, shape index: {}]   ;;  %s2490_s2 = inlined_call_operand.vmem [shape: bf16[64,256], index: 2, kind: output, shape index: {0}]   ;;  %s2491_s3 = inlined_call_operand.vmem [shape: f32[2,2,256], index: 3, kind: output, shape index: {1}]  }
   0x1   :  { %s2099_s14 = smov 0  }
   0x2 LB: > { %s26_s15 = sadd.s32 1, %s2069_s13  ;;  %p1638_p0 = scmp.ge.s32.totalorder %s2073_s14, 1  ;;  %s2073_s14 = sphi %s2099_s14, %s14_s14   ;;  %s2069_s13 = sphi %s2097_s13, %s2493_s13   ;;  %s2065_s12 = sphi %s2095_s12, %s2492_s12  }
   0x3   : > { %p28_p1 = scmp.ge.s32.totalorder %s26_s15, 2  ;;  %p161_p2 = scmp.lt.s32.totalorder %s2073_s14, 3 }
   0x5   : > { %s2495_s15 = smov (%p28_p1, %s26_s15), 0  ;;  %p162_p3 = pnand %p1638_p0, %p161_p2 }
   0x6   : > { %p196_p4 = scmp.lt.s32.totalorder (!%p162_p3), %s2065_s12, 1  ;;  %s1640_s18 = sshll.u32 (!%p162_p3), %s2065_s12, 2 }
   0x7   : > { %165 = sbr.rel (%p162_p3) target bundleno = 435 (0x1b3), region = 28  ;;  %p206_p5 = scmp.lt.s32.totalorder (!%p162_p3), %s1640_s18, 7 }
   0xc   : > { %v1877_v0 = vld [vmem:[%s2489_s1 + $0x74] ss:$8 sps:$4 sm:$0xff]   ;;  %v1880_v1 = vld [vmem:[%s2489_s1 + $0x70] ss:$8 sps:$4 sm:$0xff]   ;;  %s2123_s20 = scalar_select %p196_p4, %s2065_s12, 1  ;;  %vm1507_vm0 = vcmask 1040384  }
   0xd   : > { %1276 = vmatprep.subr.bf16.mxu0 %v1877_v0  ;;  %v1882_v2 = vld [vmem:[%s2489_s1 + $0x64] ss:$8 sps:$4 sm:$0xff]   ;;  %v1885_v3 = vld [vmem:[%s2489_s1 + $0x60] ss:$8 sps:$4 sm:$0xff]   ;;  %v1887_v4 = vld [vmem:[%s2489_s1 + $0x54] ss:$8 sps:$4 sm:$0xff]  }
   0xe   : > { %1277 = vmatpush1.bf16.msra.mxu0 %v1880_v1  ;;  %s1834_s25 = smul.u32 384, %s2123_s20  ;;  %v1890_v5 = vld [vmem:[%s2489_s1 + $0x50] ss:$8 sps:$4 sm:$0xff]   ;;  %v1892_v6 = vld [vmem:[%s2489_s1 + $0x44] ss:$8 sps:$4 sm:$0xff]   ;;  %s2497_s18 = smov (!%p206_p5, %s1640_s18), 7 }
   0xf   : > { %1278 = vmatprep.subr.bf16.mxu0 %v1882_v2  ;;  %v1895_v11 = vld [vmem:[%s2489_s1 + $0x40] ss:$8 sps:$4 sm:$0xff]   ;;  %v1897_v12 = vld [vmem:[%s2489_s1 + $0x34] ss:$8 sps:$4 sm:$0xff]   ;;  %v1900_v15 = vld [vmem:[%s2489_s1 + $0x30] ss:$8 sps:$4 sm:$0xff]  }
  0x10   : > { %s2138_s30 = scalar_lea.vmem %s2488_s0, %s1834_s25  ;;  %v1902_v26 = vld [vmem:[%s2489_s1 + $0x24] ss:$8 sps:$4 sm:$0xff]   ;;  %v1905_v28 = vld [vmem:[%s2489_s1 + $0x20] ss:$8 sps:$4 sm:$0xff]   ;;  %v1907_v30 = vld [vmem:[%s2489_s1 + $0x14] ss:$8 sps:$4 sm:$0xff]  }
  0x11   : > { %v1859_v7 = vld [vmem:[%s2138_s30 + $0x40] sm:$0xff]   ;;  %v1861_v9 = vld [vmem:[%s2138_s30 + $0x48] sm:$0xff]   ;;  %v1863_v13 = vld [vmem:[%s2138_s30 + $0x50] sm:$0xff]   ;;  %s1796_s19 = sshll.u32 %s2497_s18, 3  ;;  %s1797_s12 = sshll.u32 %s2123_s20, 2 }
  0x12   : > { %1279 = vmatpush1.bf16.msra.mxu0 %v1885_v3  ;;  %v1860_v8 = vld [vmem:[%s2138_s30] sm:$0xff]   ;;  %716 = vxpose.xlu0.c.b16.start [1/8] (narrow) %v1859_v7, 32  ;;  %v1862_v10 = vld [vmem:[%s2138_s30 + $0x8] sm:$0xff]   ;;  %v1864_v14 = vld [vmem:[%s2138_s30 + $0x10] sm:$0xff]   ;;  %s2469_s23 = scalar_lea.vmem %s2490_s2, %s1796_s19  ;;  %s218_s26 = scalar_lea.vmem %s2491_s3, %s1797_s12 }
  0x13   : > { %1280 = vmatprep.subr.bf16.mxu0 %v1887_v4  ;;  %700 = vxpose.xlu1.c.b16.start [1/8] (narrow) %v1860_v8, 32  ;;  %v1865_v16 = vld [vmem:[%s2138_s30 + $0x58] sm:$0xff]   ;;  %v1867_v18 = vld [vmem:[%s2138_s30 + $0x60] sm:$0xff]   ;;  %v1869_v20 = vld [vmem:[%s2138_s30 + $0x68] sm:$0xff]  }
  0x14   : > { %v1866_v17 = vld [vmem:[%s2138_s30 + $0x18] sm:$0xff]   ;;  %v1868_v19 = vld [vmem:[%s2138_s30 + $0x20] sm:$0xff]   ;;  %v1870_v21 = vld [vmem:[%s2138_s30 + $0x28] sm:$0xff]  }
  0x15   : > { %v1871_v22 = vld [vmem:[%s2138_s30 + $0x70] sm:$0xff]   ;;  %v1873_v24 = vld [vmem:[%s2138_s30 + $0x78] sm:$0xff]   ;;  %v1875_v27 = vld [vmem:[%s2138_s30 + $0xc0] sm:$0xff]  }
  0x16   : > { %1281 = vmatpush1.bf16.msra.mxu0 %v1890_v5  ;;  %717 = vxpose.xlu0.c.b16.cont [2/8] (narrow) %v1861_v9, 32  ;;  %v1872_v23 = vld [vmem:[%s2138_s30 + $0x30] sm:$0xff]   ;;  %v1874_v25 = vld [vmem:[%s2138_s30 + $0x38] sm:$0xff]   ;;  %v1876_v29 = vld [vmem:[%s2138_s30 + $0x80] sm:$0xff]  }
  0x17   : > { %1282 = vmatprep.subr.bf16.mxu0 %v1892_v6  ;;  %701 = vxpose.xlu1.c.b16.cont [2/8] (narrow) %v1862_v10, 32  ;;  %v1910_v31 = vld [vmem:[%s2489_s1 + $0x10] ss:$8 sps:$4 sm:$0xff]   ;;  %v1879_v32 = vld [vmem:[%s2138_s30 + $0xc8] sm:$0xff]   ;;  %v1917_v38 = vld [vmem:[%s2489_s1 + $0x174] ss:$8 sps:$4 sm:$0xff]  }
  0x18   : > { %v1881_v33 = vld [vmem:[%s2138_s30 + $0x88] sm:$0xff]   ;;  %v1884_v35 = vld [vmem:[%s2138_s30 + $0xd0] sm:$0xff]   ;;  %v1889_v41 = vld [vmem:[%s2138_s30 + $0xd8] sm:$0xff]   ;;  %1329 = vmatprep.subr.bf16.mxu1 %v1917_v38 }
  0x19   : > { %v1912_v34 = vld [vmem:[%s2489_s1 + $0x4] ss:$8 sps:$4 sm:$0xff]   ;;  %v1915_v36 = vld [vmem:[%s2489_s1] ss:$8 sps:$4 sm:$0xff]   ;;  %v1886_v37 = vld [vmem:[%s2138_s30 + $0x90] sm:$0xff]  }
  0x1a   : > { %1283 = vmatpush1.bf16.msra.mxu0 %v1895_v11  ;;  %718 = vxpose.xlu0.c.b16.cont [3/8] (narrow) %v1863_v13, 32  ;;  %v1919_v39 = vld [vmem:[%s2489_s1 + $0xf4] ss:$8 sps:$4 sm:$0xff]   ;;  %v1921_v40 = vld [vmem:[%s2489_s1 + $0x170] ss:$8 sps:$4 sm:$0xff]   ;;  %v1894_v47 = vld [vmem:[%s2138_s30 + $0xe0] sm:$0xff]  }
  0x1b   : > { %1284 = vmatprep.subr.bf16.mxu0 %v1897_v12  ;;  %702 = vxpose.xlu1.c.b16.cont [3/8] (narrow) %v1864_v14, 32  ;;  %v1923_v42 = vld [vmem:[%s2489_s1 + $0xf0] ss:$8 sps:$4 sm:$0xff]   ;;  %v1925_v44 = vld [vmem:[%s2489_s1 + $0x164] ss:$8 sps:$4 sm:$0xff]  }
  0x1c   : > { %1330 = vmatpush1.bf16.msra.mxu1 %v1921_v40  ;;  %v1891_v43 = vld [vmem:[%s2138_s30 + $0x98] sm:$0xff]   ;;  %v1927_v45 = vld [vmem:[%s2489_s1 + $0xe4] ss:$8 sps:$4 sm:$0xff]   ;;  %v1929_v46 = vld [vmem:[%s2489_s1 + $0x160] ss:$8 sps:$4 sm:$0xff]  }
  0x1d   : > { %1331 = vmatprep.subr.bf16.mxu1 %v1925_v44  ;;  %v1931_v48 = vld [vmem:[%s2489_s1 + $0xe0] ss:$8 sps:$4 sm:$0xff]   ;;  %v1933_v50 = vld [vmem:[%s2489_s1 + $0x154] ss:$8 sps:$4 sm:$0xff]   ;;  %v1937_v52 = vld [vmem:[%s2489_s1 + $0x150] ss:$8 sps:$4 sm:$0xff]  }
  0x1e   : > { %1285 = vmatpush1.bf16.msra.mxu0 %v1900_v15  ;;  %719 = vxpose.xlu0.c.b16.cont [4/8] (narrow) %v1865_v16, 32  ;;  %v1896_v49 = vld [vmem:[%s2138_s30 + $0xa0] sm:$0xff]   ;;  %v1935_v51 = vld [vmem:[%s2489_s1 + $0xd4] ss:$8 sps:$4 sm:$0xff]   ;;  %v1899_v53 = vld [vmem:[%s2138_s30 + $0xe8] sm:$0xff]  }
  0x1f   : > { %703 = vxpose.xlu1.c.b16.cont [4/8] (narrow) %v1866_v17, 32  ;;  %1286 = vmatprep.subr.bf16.mxu0 %v1902_v26  ;;  %v1939_v54 = vld [vmem:[%s2489_s1 + $0xd0] ss:$8 sps:$4 sm:$0xff]   ;;  %v1901_v55 = vld [vmem:[%s2138_s30 + $0xa8] sm:$0xff]   ;;  %v1949_v62 = vld [vmem:[%s2489_s1 + $0x134] ss:$8 sps:$4 sm:$0xff]  }
  0x20   : > { %1332 = vmatpush1.bf16.msra.mxu1 %v1929_v46  ;;  %v1941_v56 = vld [vmem:[%s2489_s1 + $0x144] ss:$8 sps:$4 sm:$0xff]   ;;  %v1945_v58 = vld [vmem:[%s2489_s1 + $0x140] ss:$8 sps:$4 sm:$0xff]   ;;  %v1904_v59 = vld [vmem:[%s2138_s30 + $0xf0] sm:$0xff]  }
  0x21   : > { %1333 = vmatprep.subr.bf16.mxu1 %v1933_v50  ;;  %v1943_v57 = vld [vmem:[%s2489_s1 + $0xc4] ss:$8 sps:$4 sm:$0xff]   ;;  %v1906_v60 = vld [vmem:[%s2138_s30 + $0xb0] sm:$0xff]   ;;  %v1947_v61 = vld [vmem:[%s2489_s1 + $0xc0] ss:$8 sps:$4 sm:$0xff]  }
  0x22   : > { %720 = vxpose.xlu0.c.b16.cont [5/8] (narrow) %v1867_v18, 32  ;;  %1287 = vmatpush1.bf16.msra.mxu0 %v1905_v28  ;;  %v1909_v63 = vld [vmem:[%s2138_s30 + $0xf8] sm:$0xff]   ;;  %v1914_v3 = vld [vmem:[%s2138_s30 + $0x140] sm:$0xff]   ;;  %v1922_v9 = vld [vmem:[%s2138_s30 + $0x148] sm:$0xff]  }
  0x23   : > { %704 = vxpose.xlu1.c.b16.cont [5/8] (narrow) %v1868_v19, 32  ;;  %1288 = vmatprep.subr.bf16.mxu0 %v1907_v30  ;;  %v1951_v0 = vld [vmem:[%s2489_s1 + $0xb4] ss:$8 sps:$4 sm:$0xff]   ;;  %v1953_v1 = vld [vmem:[%s2489_s1 + $0x130] ss:$8 sps:$4 sm:$0xff]   ;;  %v1916_v7 = vld [vmem:[%s2138_s30 + $0x100] sm:$0xff]  }
  0x24   : > { %1334 = vmatpush1.bf16.msra.mxu1 %v1937_v52  ;;  %v1911_v2 = vld [vmem:[%s2138_s30 + $0xb8] sm:$0xff]   ;;  %v1957_v5 = vld [vmem:[%s2489_s1 + $0x124] ss:$8 sps:$4 sm:$0xff]   ;;  %v1961_v8 = vld [vmem:[%s2489_s1 + $0x120] ss:$8 sps:$4 sm:$0xff]  }
  0x25   : > { %1335 = vmatprep.subr.bf16.mxu1 %v1941_v56  ;;  %v1955_v4 = vld [vmem:[%s2489_s1 + $0xb0] ss:$8 sps:$4 sm:$0xff]   ;;  %v1959_v6 = vld [vmem:[%s2489_s1 + $0xa4] ss:$8 sps:$4 sm:$0xff]   ;;  %v1963_v10 = vld [vmem:[%s2489_s1 + $0xa0] ss:$8 sps:$4 sm:$0xff]  }
  0x26   : > { %721 = vxpose.xlu0.c.b16.cont [6/8] (narrow) %v1869_v20, 32  ;;  %1289 = vmatpush1.bf16.msra.mxu0 %v1910_v31  ;;  %v1924_v11 = vld [vmem:[%s2138_s30 + $0x108] sm:$0xff]   ;;  %v1965_v12 = vld [vmem:[%s2489_s1 + $0x114] ss:$8 sps:$4 sm:$0xff]   ;;  %v1969_v14 = vld [vmem:[%s2489_s1 + $0x110] ss:$8 sps:$4 sm:$0xff]  }
  0x27   : > { %705 = vxpose.xlu1.c.b16.cont [6/8] (narrow) %v1870_v21, 32  ;;  %1290 = vmatprep.subr.bf16.mxu0 %v1912_v34  ;;  %v1967_v13 = vld [vmem:[%s2489_s1 + $0x94] ss:$8 sps:$4 sm:$0xff]   ;;  %v1971_v16 = vld [vmem:[%s2489_s1 + $0x90] ss:$8 sps:$4 sm:$0xff]   ;;  %v1946_v28 = vld [vmem:[%s2138_s30 + $0x160] sm:$0xff]  }
  0x28   : > { %1336 = vmatpush1.bf16.msra.mxu1 %v1945_v58  ;;  %v1930_v15 = vld [vmem:[%s2138_s30 + $0x150] sm:$0xff]   ;;  %v1973_v18 = vld [vmem:[%s2489_s1 + $0x104] ss:$8 sps:$4 sm:$0xff]   ;;  %v1938_v19 = vld [vmem:[%s2138_s30 + $0x158] sm:$0xff]  }
  0x29   : > { %1337 = vmatprep.subr.bf16.mxu1 %v1949_v62  ;;  %v1932_v17 = vld [vmem:[%s2138_s30 + $0x110] sm:$0xff]   ;;  %v1975_v20 = vld [vmem:[%s2489_s1 + $0x84] ss:$8 sps:$4 sm:$0xff]   ;;  %v1977_v21 = vld [vmem:[%s2489_s1 + $0x100] ss:$8 sps:$4 sm:$0xff]  }
  0x2a   : > { %722 = vxpose.xlu0.c.b16.cont [7/8] (narrow) %v1871_v22, 32  ;;  %1291 = vmatpush1.bf16.msra.mxu0 %v1915_v36  ;;  %v1978_v22 = vld [vmem:[%s2489_s1 + $0x80] ss:$8 sps:$4 sm:$0xff]   ;;  %v2318_v26 = vld [vmem:[%s2489_s1 + $0x274] ss:$8 sps:$4 sm:$0xff]  }
  0x2b   : > { %706 = vxpose.xlu1.c.b16.cont [7/8] (narrow) %v1872_v23, 32  ;;  %1292 = vmatprep.subr.bf16.mxu0 %v1919_v39  ;;  %v1979_v23 = vld [vmem:[%s2489_s1 + $0x1f4] ss:$8 sps:$4 sm:$0xff]   ;;  %v1987_v30 = vld [vmem:[%s2489_s1 + $0x1e0] ss:$8 sps:$4 sm:$0xff]  }
  0x2c   : > { %1338 = vmatpush1.bf16.msra.mxu1 %v1953_v1  ;;  %v1991_v31 = vld [vmem:[%s2489_s1 + $0x1d4] ss:$8 sps:$4 sm:$0xff]   ;;  %v1993_v34 = vld [vmem:[%s2489_s1 + $0x1d0] ss:$8 sps:$4 sm:$0xff]   ;;  %v1999_v38 = vld [vmem:[%s2489_s1 + $0x1c0] ss:$8 sps:$4 sm:$0xff]  }
  0x2d   : > { %1339 = vmatprep.subr.bf16.mxu1 %v1957_v5  ;;  %v1962_v36 = vld [vmem:[%s2138_s30 + $0x170] sm:$0xff]   ;;  %v1970_v40 = vld [vmem:[%s2138_s30 + $0x178] sm:$0xff]   ;;  %v2011_v44 = vld [vmem:[%s2489_s1 + $0x1a0] ss:$8 sps:$4 sm:$0xff]  }
  0x2e   : > { %723 = vxpose.xlu0.c.b16.end [8/8] (narrow) %v1873_v24, 32  ;;  %1293 = vmatpush2.bf16.msra.mxu0 %v1923_v42  ;;  %v1940_v24 = vld [vmem:[%s2138_s30 + $0x118] sm:$0xff]   ;;  %v2021_v50 = vld [vmem:[%s2489_s1 + $0x184] ss:$8 sps:$4 sm:$0xff]   ;;  %v1988_v52 = vld [vmem:[%s2489_s1 + $0x260] ss:$8 sps:$4 sm:$0xff]  }
  0x2f   : > { %707 = vxpose.xlu1.c.b16.end [8/8] (narrow) %v1874_v25, 32  ;;  %1294 = vmatprep.subr.bf16.mxu0 %v1927_v45  ;;  %v1981_v25 = vld [vmem:[%s2489_s1 + $0x1f0] ss:$8 sps:$4 sm:$0xff]   ;;  %v2003_v39 = vld [vmem:[%s2489_s1 + $0x1b4] ss:$8 sps:$4 sm:$0xff]  }
  0x30   : > { %1340 = vmatpush1.bf16.msra.mxu1 %v1961_v8  ;;  %v2005_v42 = vld [vmem:[%s2489_s1 + $0x1b0] ss:$8 sps:$4 sm:$0xff]   ;;  %v2015_v45 = vld [vmem:[%s2489_s1 + $0x194] ss:$8 sps:$4 sm:$0xff]   ;;  %v2002_v58 = vld [vmem:[%s2489_s1 + $0x244] ss:$8 sps:$4 sm:$0xff]  }
  0x31   : > { %1341 = vmatprep.subr.bf16.mxu1 %v1965_v12  ;;  %v1982_v46 = vld [vmem:[%s2489_s1 + $0x270] ss:$8 sps:$4 sm:$0xff]   ;;  %v2014_v62 = vld [vmem:[%s2489_s1 + $0x224] ss:$8 sps:$4 sm:$0xff]  }
  0x32   : > { %748 = vxpose.xlu0.c.b16.start [1/8] (narrow) %v1875_v27, 32  ;;  %1295 = vmatpush2.bf16.msra.mxu0 %v1931_v48  ;;  %v1985_v27 = vld [vmem:[%s2489_s1 + $0x1e4] ss:$8 sps:$4 sm:$0xff]   ;;  %v1994_v56 = vld [vmem:[%s2489_s1 + $0x250] ss:$8 sps:$4 sm:$0xff]  }
  0x33   : > { %732 = vxpose.xlu1.c.b16.start [1/8] (narrow) %v1876_v29, 32  ;;  %1296 = vmatprep.subr.bf16.mxu0 %v1935_v51  ;;  %v1948_v29 = vld [vmem:[%s2138_s30 + $0x120] sm:$0xff]   ;;  %v2018_v1 = vld [vmem:[%s2489_s1 + $0x210] ss:$8 sps:$4 sm:$0xff]  }
  0x34   : > { %1342 = vmatpush1.bf16.msra.mxu1 %v1969_v14  ;;  %v2027_v5 = vld [vmem:[%s2489_s1 + $0x2f0] ss:$8 sps:$4 sm:$0xff]   ;;  %v2038_v14 = vld [vmem:[%s2489_s1 + $0x2c4] ss:$8 sps:$4 sm:$0xff]  }
  0x35   : > { %1343 = vmatprep.subr.bf16.mxu1 %v1973_v18  ;;  %v2044_v18 = vld [vmem:[%s2489_s1 + $0x2a4] ss:$8 sps:$4 sm:$0xff]  }
  0x36   : > { %749 = vxpose.xlu0.c.b16.cont [2/8] (narrow) %v1879_v32, 32  ;;  %1297 = vmatpush2.bf16.msra.mxu0 %v1939_v54  ;;  %v1954_v32 = vld [vmem:[%s2138_s30 + $0x168] sm:$0xff]   ;;  %v1996_v54 = vld [vmem:[%s2489_s1 + $0x254] ss:$8 sps:$4 sm:$0xff]  }
  0x37   : > { %733 = vxpose.xlu1.c.b16.cont [2/8] (narrow) %v1881_v33, 32  ;;  %1298 = vmatprep.subr.bf16.mxu0 %v1943_v57  ;;  %v1956_v33 = vld [vmem:[%s2138_s30 + $0x128] sm:$0xff]  }
  0x38   : > { %1344 = vmatpush1.bf16.msra.mxu1 %v1977_v21  ;;  %v2045_v21 = vld [vmem:[%s2489_s1 + $0x290] ss:$8 sps:$4 sm:$0xff]  }
  0x39   : > { %1345 = vmatprep.subr.bf16.mxu1 %v1979_v23  ;;  %v2048_v23 = vld [vmem:[%s2489_s1 + $0x280] ss:$8 sps:$4 sm:$0xff]  }
  0x3a   : > { %750 = vxpose.xlu0.c.b16.cont [3/8] (narrow) %v1884_v35, 32  ;;  %1299 = vmatpush2.bf16.msra.mxu0 %v1947_v61  ;;  %v1997_v35 = vld [vmem:[%s2489_s1 + $0x1c4] ss:$8 sps:$4 sm:$0xff]   ;;  %v2006_v61 = vld [vmem:[%s2489_s1 + $0x230] ss:$8 sps:$4 sm:$0xff]  }
  0x3b   : > { %734 = vxpose.xlu1.c.b16.cont [3/8] (narrow) %v1886_v37, 32  ;;  %1300 = vmatprep.subr.bf16.mxu0 %v1951_v0  ;;  %v1964_v37 = vld [vmem:[%s2138_s30 + $0x130] sm:$0xff]  }
  0x3c   : > { %1346 = vmatpush2.bf16.msra.mxu1 %v1981_v25  ;;  %v2020_v0 = vld [vmem:[%s2489_s1 + $0x214] ss:$8 sps:$4 sm:$0xff]  }
  0x3d   : > { %1347 = vmatprep.subr.bf16.mxu1 %v1985_v27 }
  0x3e   : > { %751 = vxpose.xlu0.c.b16.cont [4/8] (narrow) %v1889_v41, 32  ;;  %1301 = vmatpush2.bf16.msra.mxu0 %v1955_v4  ;;  %v1972_v41 = vld [vmem:[%s2138_s30 + $0x138] sm:$0xff]  }
  0x3f   : > { %735 = vxpose.xlu1.c.b16.cont [4/8] (narrow) %v1891_v43, 32  ;;  %1302 = vmatprep.subr.bf16.mxu0 %v1959_v6  ;;  %v2009_v43 = vld [vmem:[%s2489_s1 + $0x1a4] ss:$8 sps:$4 sm:$0xff]   ;;  %v2029_v4 = vld [vmem:[%s2489_s1 + $0x2f4] ss:$8 sps:$4 sm:$0xff]  }
  0x40   : > { %1348 = vmatpush2.bf16.msra.mxu1 %v1987_v30 }
  0x41   : > { %1349 = vmatprep.subr.bf16.mxu1 %v1991_v31 }
  0x42   : > { %752 = vxpose.xlu0.c.b16.cont [5/8] (narrow) %v1894_v47, 32  ;;  %1303 = vmatpush2.bf16.msra.mxu0 %v1963_v10  ;;  %v2017_v47 = vld [vmem:[%s2489_s1 + $0x190] ss:$8 sps:$4 sm:$0xff]  }
  0x43   : > { %736 = vxpose.xlu1.c.b16.cont [5/8] (narrow) %v1896_v49, 32  ;;  %1304 = vmatprep.subr.bf16.mxu0 %v1967_v13  ;;  %v1990_v49 = vld [vmem:[%s2489_s1 + $0x264] ss:$8 sps:$4 sm:$0xff]   ;;  %v2033_v13 = vld [vmem:[%s2489_s1 + $0x2d0] ss:$8 sps:$4 sm:$0xff]  }
  0x44   : > { %1350 = vmatpush2.bf16.msra.mxu1 %v1993_v34 }
  0x45   : > { %1351 = vmatprep.subr.bf16.mxu1 %v1997_v35 }
  0x46   : > { %753 = vxpose.xlu0.c.b16.cont [6/8] (narrow) %v1899_v53, 32  ;;  %1305 = vmatpush2.bf16.msra.mxu0 %v1971_v16  ;;  %v2023_v53 = vld [vmem:[%s2489_s1 + $0x180] ss:$8 sps:$4 sm:$0xff]   ;;  %v2041_v16 = vld [vmem:[%s2489_s1 + $0x2b4] ss:$8 sps:$4 sm:$0xff]  }
  0x47   : > { %737 = vxpose.xlu1.c.b16.cont [6/8] (narrow) %v1901_v55, 32  ;;  %1306 = vmatprep.subr.bf16.mxu0 %v1975_v20  ;;  %v2047_v20 = vld [vmem:[%s2489_s1 + $0x294] ss:$8 sps:$4 sm:$0xff]  }
  0x48   : > { %1352 = vmatpush2.bf16.msra.mxu1 %v1999_v38 }
  0x49   : > { %1353 = vmatprep.subr.bf16.mxu1 %v2003_v39 }
  0x4a   : > { %754 = vxpose.xlu0.c.b16.cont [7/8] (narrow) %v1904_v59, 32  ;;  %1307 = vmatpush2.bf16.msra.mxu0 %v1978_v22  ;;  %v2000_v59 = vld [vmem:[%s2489_s1 + $0x240] ss:$8 sps:$4 sm:$0xff]   ;;  %v2050_v22 = vld [vmem:[%s2489_s1 + $0x284] ss:$8 sps:$4 sm:$0xff]  }
  0x4b   : > { %738 = vxpose.xlu1.c.b16.cont [7/8] (narrow) %v1906_v60, 32  ;;  %1382 = vmatprep.subr.bf16.mxu0 %v2318_v26  ;;  %v2008_v60 = vld [vmem:[%s2489_s1 + $0x234] ss:$8 sps:$4 sm:$0xff]  }
  0x4c   : > { %1354 = vmatpush2.bf16.msra.mxu1 %v2005_v42 }
  0x4d   : > { %1355 = vmatprep.subr.bf16.mxu1 %v2009_v43 }
  0x4e   : > { %755 = vxpose.xlu0.c.b16.end [8/8] (narrow) %v1909_v63, 32  ;;  %v2012_v63 = vld [vmem:[%s2489_s1 + $0x220] ss:$8 sps:$4 sm:$0xff]  }
  0x4f   : > { %739 = vxpose.xlu1.c.b16.end [8/8] (narrow) %v1911_v2, 32  ;;  %v2026_v2 = vld [vmem:[%s2489_s1 + $0x204] ss:$8 sps:$4 sm:$0xff]  }
  0x50   : > { %1356 = vmatpush2.bf16.msra.mxu1 %v2011_v44 }
  0x51   : > { %1357 = vmatprep.subr.bf16.mxu1 %v2015_v45 }
  0x52   : > { %780 = vxpose.xlu0.c.b16.start [1/8] (narrow) %v1914_v3, 32  ;;  %v2024_v3 = vld [vmem:[%s2489_s1 + $0x200] ss:$8 sps:$4 sm:$0xff]  }
  0x53   : > { %764 = vxpose.xlu1.c.b16.start [1/8] (narrow) %v1916_v7, 32  ;;  %v2032_v7 = vld [vmem:[%s2489_s1 + $0x2e4] ss:$8 sps:$4 sm:$0xff]  }
  0x54   : > { %1358 = vmatpush2.bf16.msra.mxu1 %v2017_v47 }
  0x55   : > { %1359 = vmatprep.subr.bf16.mxu1 %v2021_v50 }
  0x56   : > { %781 = vxpose.xlu0.c.b16.cont [2/8] (narrow) %v1922_v9, 32  ;;  %v2030_v9 = vld [vmem:[%s2489_s1 + $0x2e0] ss:$8 sps:$4 sm:$0xff]  }
  0x57   : > { %765 = vxpose.xlu1.c.b16.cont [2/8] (narrow) %v1924_v11, 32  ;;  %v2035_v11 = vld [vmem:[%s2489_s1 + $0x2d4] ss:$8 sps:$4 sm:$0xff]  }
  0x58   : > { %1360 = vmatpush2.bf16.msra.mxu1 %v2023_v53 }
  0x59   : > { %1802 = vmatprep.subr.bf16.mxu1 %v2318_v26 }
  0x5a   : > { %782 = vxpose.xlu0.c.b16.cont [3/8] (narrow) %v1930_v15, 32  ;;  %v2036_v15 = vld [vmem:[%s2489_s1 + $0x2c0] ss:$8 sps:$4 sm:$0xff]  }
  0x5b   : > { %766 = vxpose.xlu1.c.b16.cont [3/8] (narrow) %v1932_v17, 32  ;;  %v2039_v17 = vld [vmem:[%s2489_s1 + $0x2b0] ss:$8 sps:$4 sm:$0xff]  }
  0x5e   : > { %783 = vxpose.xlu0.c.b16.cont [4/8] (narrow) %v1938_v19, 32  ;;  %v2042_v19 = vld [vmem:[%s2489_s1 + $0x2a0] ss:$8 sps:$4 sm:$0xff]  }
  0x5f   : > { %767 = vxpose.xlu1.c.b16.cont [4/8] (narrow) %v1940_v24, 32 }
  0x62   : > { %784 = vxpose.xlu0.c.b16.cont [5/8] (narrow) %v1946_v28, 32 }
  0x63   : > { %768 = vxpose.xlu1.c.b16.cont [5/8] (narrow) %v1948_v29, 32 }
  0x66   : > { %785 = vxpose.xlu0.c.b16.cont [6/8] (narrow) %v1954_v32, 32 }
  0x67   : > { %769 = vxpose.xlu1.c.b16.cont [6/8] (narrow) %v1956_v33, 32 }
  0x6a   : > { %786 = vxpose.xlu0.c.b16.cont [7/8] (narrow) %v1962_v36, 32 }
  0x6b   : > { %770 = vxpose.xlu1.c.b16.cont [7/8] (narrow) %v1964_v37, 32 }
  0x6e   : > { %787 = vxpose.xlu0.c.b16.end [8/8] (narrow) %v1970_v40, 32 }
  0x6f   : > { %771 = vxpose.xlu1.c.b16.end [8/8] (narrow) %v1972_v41, 32 }
  0x74   : > { %v724_v48 = vpop.trf.xlu0 }
  0x75   : > { %1308 = vmatprep.mubr.bf16.mxu0 %v724_v48  ;;  %v708_v51 = vpop.trf.xlu1 }
  0x76   : > { %1309 = vmatmul.mubr.bf16.vlgmr.msra.gmra.mxu0 %v708_v51 }
  0x77   : > { %1383 = vmatpush1.bf16.msra.mxu0 %v1982_v46 }
  0x78   : > { %1384 = vmatprep.subr.bf16.mxu0 %v1990_v49  ;;  %v725_v55 = vpop.trf.xlu0 }
  0x79   : > { %1318 = vmatprep.mubr.bf16.mxu0 %v725_v55  ;;  %v709_v57 = vpop.trf.xlu1 }
  0x7b   : > { %1385 = vmatpush1.bf16.msra.mxu0 %v1988_v52 }
  0x7c   : > { %1386 = vmatprep.subr.bf16.mxu0 %v1996_v54 }
  0x7e   : > { %1319 = vmatmul.mubr.bf16.gmra.mxu0 %v709_v57 }
  0x7f   : > { %1387 = vmatpush1.bf16.msra.mxu0 %v1994_v56 }
  0x80   : > { %1388 = vmatprep.subr.bf16.mxu0 %v2002_v58 }
  0x83   : > { %1389 = vmatpush1.bf16.msra.mxu0 %v2000_v59 }
  0x84   : > { %1390 = vmatprep.subr.bf16.mxu0 %v2008_v60 }
  0x87   : > { %1391 = vmatpush1.bf16.msra.mxu0 %v2006_v61 }
  0x88   : > { %1392 = vmatprep.subr.bf16.mxu0 %v2014_v62 }
  0x8b   : > { %1393 = vmatpush1.bf16.msra.mxu0 %v2012_v63 }
  0x8c   : > { %1394 = vmatprep.subr.bf16.mxu0 %v2020_v0 }
  0x8f   : > { %1395 = vmatpush1.bf16.msra.mxu0 %v2018_v1 }
  0x90   : > { %1396 = vmatprep.subr.bf16.mxu0 %v2026_v2 }
  0x93   : > { %1397 = vmatpush1.bf16.msra.mxu0 %v2024_v3 }
  0x94   : > { %v756_v6 = vpop.trf.xlu0  ;;  %1398 = vmatprep.subr.bf16.mxu0 %v2029_v4 }
  0x95   : > { %1361 = vmatprep.mubr.bf16.mxu1 %v756_v6  ;;  %v740_v8 = vpop.trf.xlu1 }
  0x96   : > { %1362 = vmatmul.mubr.bf16.vlgmr.msra.gmra.mxu1 %v740_v8 }
  0x97   : > { %1818 = vmatpush1.bf16.msra.mxu1 %v1982_v46  ;;  %1399 = vmatpush2.bf16.msra.mxu0 %v2027_v5 }
  0x98   : > { %1803 = vmatprep.subr.bf16.mxu1 %v1990_v49  ;;  %1400 = vmatprep.subr.bf16.mxu0 %v2032_v7  ;;  %v757_v10 = vpop.trf.xlu0 }
  0x99   : > { %1371 = vmatprep.mubr.bf16.mxu1 %v757_v10  ;;  %v741_v12 = vpop.trf.xlu1 }
  0x9b   : > { %1819 = vmatpush1.bf16.msra.mxu1 %v1988_v52  ;;  %1401 = vmatpush2.bf16.msra.mxu0 %v2030_v9 }
  0x9c   : > { %1804 = vmatprep.subr.bf16.mxu1 %v1996_v54  ;;  %1402 = vmatprep.subr.bf16.mxu0 %v2035_v11 }
  0x9e   : > { %1372 = vmatmul.mubr.bf16.gmra.mxu1 %v741_v12 }
  0x9f   : > { %1820 = vmatpush1.bf16.msra.mxu1 %v1994_v56  ;;  %1403 = vmatpush2.bf16.msra.mxu0 %v2033_v13 }
  0xa0   : > { %1805 = vmatprep.subr.bf16.mxu1 %v2002_v58  ;;  %1404 = vmatprep.subr.bf16.mxu0 %v2038_v14 }
  0xa3   : > { %1821 = vmatpush1.bf16.msra.mxu1 %v2000_v59  ;;  %1405 = vmatpush2.bf16.msra.mxu0 %v2036_v15 }
  0xa4   : > { %1806 = vmatprep.subr.bf16.mxu1 %v2008_v60  ;;  %1406 = vmatprep.subr.bf16.mxu0 %v2041_v16 }
  0xa7   : > { %1822 = vmatpush1.bf16.msra.mxu1 %v2006_v61  ;;  %1407 = vmatpush2.bf16.msra.mxu0 %v2039_v17 }
  0xa8   : > { %1807 = vmatprep.subr.bf16.mxu1 %v2014_v62  ;;  %1408 = vmatprep.subr.bf16.mxu0 %v2044_v18 }
  0xab   : > { %1823 = vmatpush1.bf16.msra.mxu1 %v2012_v63  ;;  %1409 = vmatpush2.bf16.msra.mxu0 %v2042_v19 }
  0xac   : > { %1808 = vmatprep.subr.bf16.mxu1 %v2020_v0  ;;  %1410 = vmatprep.subr.bf16.mxu0 %v2047_v20 }
  0xaf   : > { %1824 = vmatpush1.bf16.msra.mxu1 %v2018_v1  ;;  %1411 = vmatpush2.bf16.msra.mxu0 %v2045_v21 }
  0xb0   : > { %1809 = vmatprep.subr.bf16.mxu1 %v2026_v2  ;;  %1412 = vmatprep.subr.bf16.mxu0 %v2050_v22 }
  0xb3   : > { %1825 = vmatpush1.bf16.msra.mxu1 %v2024_v3  ;;  %1413 = vmatpush2.bf16.msra.mxu0 %v2048_v23 }
  0xb4   : > { %v788_v24 = vpop.trf.xlu0  ;;  %1810 = vmatprep.subr.bf16.mxu1 %v2029_v4 }
  0xb5   : > { %1414 = vmatprep.mubr.bf16.mxu0 %v788_v24  ;;  %v772_v25 = vpop.trf.xlu1 }
  0xb6   : > { %1415 = vmatmul.mubr.bf16.vlgmr.msra.gmra.mxu0 %v772_v25 }
  0xb7   : > { %1826 = vmatpush2.bf16.msra.mxu1 %v2027_v5 }
  0xb8   : > { %1811 = vmatprep.subr.bf16.mxu1 %v2032_v7  ;;  %v789_v26 = vpop.trf.xlu0 }
  0xb9   : > { %1424 = vmatprep.mubr.bf16.mxu1 %v789_v26  ;;  %v773_v27 = vpop.trf.xlu1 }
  0xbb   : > { %1827 = vmatpush2.bf16.msra.mxu1 %v2030_v9 }
  0xbc   : > { %1812 = vmatprep.subr.bf16.mxu1 %v2035_v11 }
  0xbf   : > { %1828 = vmatpush2.bf16.msra.mxu1 %v2033_v13 }
  0xc0   : > { %1813 = vmatprep.subr.bf16.mxu1 %v2038_v14 }
  0xc3   : > { %1829 = vmatpush2.bf16.msra.mxu1 %v2036_v15 }
  0xc4   : > { %1814 = vmatprep.subr.bf16.mxu1 %v2041_v16 }
  0xc7   : > { %1830 = vmatpush2.bf16.msra.mxu1 %v2039_v17 }
  0xc8   : > { %1815 = vmatprep.subr.bf16.mxu1 %v2044_v18 }
  0xcb   : > { %1831 = vmatpush2.bf16.msra.mxu1 %v2042_v19 }
  0xcc   : > { %1816 = vmatprep.subr.bf16.mxu1 %v2047_v20 }
  0xcf   : > { %1832 = vmatpush2.bf16.msra.mxu1 %v2045_v21 }
  0xd0   : > { %1817 = vmatprep.subr.bf16.mxu1 %v2050_v22 }
  0xd3   : > { %1833 = vmatpush2.bf16.msra.mxu1 %v2048_v23 }
  0xd6   : > { %1425 = vmatmul.mubr.bf16.vlgmr.msra.gmra.mxu1 %v773_v27 }
 0x136   : > { %v1310_v28 = vpop.f32.mrf.mxu0 }
 0x138   : > { %v1312_v29 = vpop.f32.mrf.mxu0 }
 0x13a   : > { %v1314_v30 = vpop.f32.mrf.mxu0 }
 0x13c   : > { %v1316_v31 = vpop.f32.mrf.mxu0 }
 0x13e   : > { %v1320_v32 = vpop.f32.mrf.mxu0 }
 0x140   : > { %v1322_v33 = vpop.f32.mrf.mxu0 }
 0x142   : > { %v1324_v35 = vpop.f32.mrf.mxu0 }
 0x144   : > { %v1326_v37 = vpop.f32.mrf.mxu0 }
 0x156   : > { %v1363_v34 = vpop.f32.mrf.mxu1 }
 0x157   : > { %v1364_v40 = vadd.f32 %v1363_v34, %v1310_v28 }
 0x158   : > { %v1365_v36 = vpop.f32.mrf.mxu1 }
 0x159   : > { %v1366_v41 = vadd.f32 %v1365_v36, %v1312_v29 }
 0x15a   : > { %v1367_v38 = vpop.f32.mrf.mxu1 }
 0x15b   : > { %v1368_v47 = vadd.f32 %v1367_v38, %v1314_v30 }
 0x15c   : > { %v1369_v42 = vpop.f32.mrf.mxu1 }
 0x15d   : > { %v1370_v48 = vadd.f32 %v1369_v42, %v1316_v31 }
 0x15e   : > { %v1373_v54 = vpop.f32.mrf.mxu1 }
 0x15f   : > { %v1374_v58 = vadd.f32 %v1373_v54, %v1320_v32 }
 0x160   : > { %v1375_v55 = vpop.f32.mrf.mxu1 }
 0x161   : > { %v1376_v60 = vadd.f32 %v1375_v55, %v1322_v33 }
 0x162   : > { %v1377_v56 = vpop.f32.mrf.mxu1 }
 0x163   : > { %v1378_v0 = vadd.f32 %v1377_v56, %v1324_v35 }
 0x164   : > { %v1379_v57 = vpop.f32.mrf.mxu1 }
 0x165   : > { %v1380_v3 = vadd.f32 %v1379_v57, %v1326_v37 }
 0x176   : > { %v1416_v39 = vpop.f32.mrf.mxu0 }
 0x177   : > { %v1417_v44 = vadd.f32 %v1416_v39, %v1364_v40 }
 0x178   : > { %v1418_v43 = vpop.f32.mrf.mxu0 }
 0x179   : > { %v1419_v45 = vadd.f32 %v1418_v43, %v1366_v41  ;;  %v1481_v4 = vmul.f32 %v1417_v44, %v1417_v44 }
 0x17a   : > { %v1420_v46 = vpop.f32.mrf.mxu0 }
 0x17b   : > { %v1798_v49 = vpack.c.bf16 %v1419_v45, %v1417_v44  ;;  %v1421_v51 = vadd.f32 %v1420_v46, %v1368_v47  ;;  %v1482_v8 = vmul.f32 %v1419_v45, %v1419_v45 }
 0x17c   : > { %v1422_v50 = vpop.f32.mrf.mxu0 }
 0x17d   : > { %1459 = vst [vmem:[%s2469_s23] sm:$0xff] %v1798_v49  ;;  %v1423_v52 = vadd.f32 %v1422_v50, %v1370_v48  ;;  %v1483_v62 = vmul.f32 %v1421_v51, %v1421_v51  ;;  %v1463_v5 = vadd.f32 %v1421_v51, %v1417_v44 }
 0x17f   : > { %v1799_v53 = vpack.c.bf16 %v1423_v52, %v1421_v51  ;;  %v1484_v1 = vmul.f32 %v1423_v52, %v1423_v52  ;;  %v1472_v9 = vadd.f32 %v1423_v52, %v1419_v45  ;;  %v1489_v12 = vadd.f32 %v1483_v62, %v1481_v4 }
 0x181   : > { %1460 = vst [vmem:[%s2469_s23 + $0x8] sm:$0xff] %v1799_v53  ;;  %v1498_v16 = vadd.f32 %v1484_v1, %v1482_v8 }
 0x196   : > { %v1426_v59 = vpop.f32.mrf.mxu1 }
 0x197   : > { %v1427_v61 = vadd.f32 %v1426_v59, %v1374_v58 }
 0x198   : > { %v1428_v63 = vpop.f32.mrf.mxu1 }
 0x199   : > { %v1429_v2 = vadd.f32 %v1428_v63, %v1376_v60  ;;  %v1485_v6 = vmul.f32 %v1427_v61, %v1427_v61  ;;  %v1464_v13 = vadd.f32 %v1463_v5, %v1427_v61 }
 0x19a   : > { %v1430_v7 = vpop.f32.mrf.mxu1 }
 0x19b   : > { %v1800_v10 = vpack.c.bf16 %v1429_v2, %v1427_v61  ;;  %v1486_v11 = vmul.f32 %v1429_v2, %v1429_v2  ;;  %v1431_v14 = vadd.f32 %v1430_v7, %v1378_v0  ;;  %v1473_v17 = vadd.f32 %v1472_v9, %v1429_v2 }
 0x19c   : > { %v1432_v15 = vpop.f32.mrf.mxu1  ;;  %v1490_v19 = vadd.f32 %v1489_v12, %v1485_v6 }
 0x19d   : > { %1461 = vst [vmem:[%s2469_s23 + $0x10] sm:$0xff] %v1800_v10  ;;  %v1433_v18 = vadd.f32 %v1432_v15, %v1380_v3  ;;  %v1465_v20 = vadd.f32 %v1464_v13, %v1431_v14  ;;  %v1487_v21 = vmul.f32 %v1431_v14, %v1431_v14  ;;  %v1499_v22 = vadd.f32 %v1498_v16, %v1486_v11 }
 0x19f   : > { %v1801_v23 = vpack.c.bf16 %v1433_v18, %v1431_v14  ;;  %v1474_v24 = vadd.f32 %v1473_v17, %v1433_v18  ;;  %v1488_v25 = vmul.f32 %v1433_v18, %v1433_v18  ;;  %v1466_v26 = vrot.slane %v1465_v20, 4 }
 0x1a0   : > { %v1491_v27 = vadd.f32 %v1490_v19, %v1487_v21 }
 0x1a1   : > { %1462 = vst [vmem:[%s2469_s23 + $0x18] sm:$0xff] %v1801_v23  ;;  %v1475_v28 = vrot.slane %v1474_v24, 4  ;;  %v1500_v29 = vadd.f32 %v1499_v22, %v1488_v25  ;;  %v1467_v30 = vadd.f32 %v1466_v26, %v1465_v20 }
 0x1a2   : > { %v1492_v31 = vrot.slane %v1491_v27, 4 }
 0x1a3   : > { %v1476_v32 = vadd.f32 %v1475_v28, %v1474_v24  ;;  %v1501_v33 = vrot.slane %v1500_v29, 4  ;;  %v1468_v34 = vrot.slane %v1467_v30, 2 }
 0x1a4   : > { %v1493_v35 = vadd.f32 %v1492_v31, %v1491_v27 }
 0x1a5   : > { %v1477_v36 = vrot.slane %v1476_v32, 2  ;;  %v1502_v37 = vadd.f32 %v1501_v33, %v1500_v29  ;;  %v1469_v38 = vadd.f32 %v1468_v34, %v1467_v30 }
 0x1a6   : > { %v1494_v39 = vrot.slane %v1493_v35, 2 }
 0x1a7   : > { %v1478_v40 = vadd.f32 %v1477_v36, %v1476_v32  ;;  %v1503_v41 = vrot.slane %v1502_v37, 2  ;;  %v1470_v43 = vrot.slane %v1469_v38, 1 }
 0x1a8   : > { %v1495_v42 = vadd.f32 %v1494_v39, %v1493_v35 }
 0x1a9   : > { %v1479_v44 = vrot.slane %v1478_v40, 1  ;;  %v1504_v45 = vadd.f32 %v1503_v41, %v1502_v37  ;;  %v1471_v49 = vadd.f32 %v1470_v43, %v1469_v38 }
 0x1aa   : > { %v1496_v46 = vrot.slane %v1495_v42, 1 }
 0x1ab   : > { %v1505_v47 = vrot.slane %v1504_v45, 1  ;;  %v1480_v50 = vadd.f32 %v1479_v44, %v1478_v40 }
 0x1ac   : > { %v1497_v48 = vadd.f32 %v1496_v46, %v1495_v42 }
 0x1ad   : > { %v1506_v51 = vadd.f32 %v1505_v47, %v1504_v45 }
 0x1ae   : > { %v1508_v52 = vsel %vm1507_vm0, %v1471_v49, %v1497_v48 }
 0x1af   : > { %v1509_v53 = vsel %vm1507_vm0, %v1480_v50, %v1506_v51 }
 0x1b0   : > { %v1512_v54 = vcombine.low %v1508_v52, %v1509_v53 }
 0x1b2   : > { %1793 = vst.sshfl [vmem:[%s218_s26] sm:$0x33 pattern:$0x76325410] %v1512_v54 }
 0x1b3 PF: > { %s14_s14 = sadd.s32 1, %s2073_s14   ;;  %s2492_s12 = smov %s2069_s13 }
 0x1b4   : > { %p11_p6 = scmp.ge.s32.totalorder %s14_s14, 4   ;;  %s2493_s13 = smov %s2495_s15 }
 0x1b6   :  { %13 = sbr.rel (!%p11_p6) target bundleno = 2 (0x2), region = 70 }

// kernel: pointnet2_forward.6
= control target key start
LH: loop header
LB: loop body
LE: loop exit
PB: predicated region body
PF: predicated region fallthrough
CT: control target
= control target key end

     0   :  { %s3118_s18 = smov 0   ;;  %s4132_s0 = inlined_call_operand.vmem [shape: bf16[64,512], index: 0, kind: input, shape index: {}]   ;;  %s4133_s1 = inlined_call_operand.vmem [shape: f32[1,512], index: 1, kind: input, shape index: {}]   ;;  %s4134_s2 = inlined_call_operand.vmem [shape: f32[1,512], index: 2, kind: input, shape index: {}]   ;;  %s4135_s3 = inlined_call_operand.vmem [shape: bf16[512,1024], index: 3, kind: input, shape index: {}]   ;;  %s4136_s4 = inlined_call_operand.vmem [shape: bf16[64,1024], index: 4, kind: output, shape index: {0}]   ;;  %s4137_s5 = inlined_call_operand.vmem [shape: f32[2,2,1024], index: 5, kind: output, shape index: {1}]  }
   0x1 LB: > { %s3124_s19 = sadd.s32 4294967295, %s3085_s18   ;;  %p2768_p0 = scmp.ge.s32.totalorder %s3085_s18, 1  ;;  %s3085_s18 = sphi %s3118_s18, %s16_s18  }
   0x2   : > { %p192_p1 = scmp.lt.s32.totalorder %s3085_s18, 3 }
   0x4   : > { %p193_p2 = pnand %p2768_p0, %p192_p1 }
   0x5   : > { %s2769_s21 = sshll.u32 (!%p193_p2), %s3124_s19, 2  ;;  %p241_p4 = scmp.lt.s32.totalorder (!%p193_p2), %s3124_s19, 1 }
   0x6   : > { %196 = sbr.rel (%p193_p2) target bundleno = 511 (0x1ff), region = 36  ;;  %p228_p3 = scmp.lt.s32.totalorder (!%p193_p2), %s2769_s21, 7 }
   0xb   : > { %v426_v0 = vld [vmem:[%s4135_s3 + $0x1c0] sm:$0xff]  ;;  %s4139_s21 = smov (!%p228_p3, %s2769_s21), 7  ;;  %v272_v34 = vlaneseq  ;;  %vm2618_vm0 = vcmask 1040384   ;;  %s4141_s19 = smov (!%p241_p4, %s3124_s19), 1 }
   0xc   : > { %v430_v1 = vld [vmem:[%s4135_s3 + $0x1e0] sm:$0xff]  ;;  %s3051_s24 = sshll.u32 %s4139_s21, 4  ;;  %s3052_s12 = sshll.u32 %s4139_s21, 5 }
   0xd   : > { %v554_v2 = vld [vmem:[%s4135_s3 + $0x5c0] sm:$0xff]  ;;  %v2834_v3 = vcombine.high %v426_v0, %v430_v1  ;;  %v2833_v5 = vcombine.low %v426_v0, %v430_v1  ;;  %v3204_v43 = vshrl.u32 %v272_v34, 7  ;;  %s3215_s6 = scalar_lea.vmem %s4132_s0, %s3051_s24  ;;  %s4067_s14 = scalar_lea.vmem %s4136_s4, %s3052_s12 }
   0xe   : > { %v558_v4 = vld [vmem:[%s4135_s3 + $0x5e0] sm:$0xff]  ;;  %v3235_v60 = vld [vmem:[%s3215_s6 + $0x10] sm:$0xff]  ;;  %s3053_s21 = sshll.u32 %s4141_s19, 4 }
   0xf   : > { %v418_v6 = vld [vmem:[%s4135_s3 + $0x180] sm:$0xff]  ;;  %v2962_v8 = vcombine.high %v554_v2, %v558_v4  ;;  %v2961_v9 = vcombine.low %v554_v2, %v558_v4  ;;  %1906 = vmatprep.subr.bf16.mxu0 %v2834_v3  ;;  %v278_v52 = vsub.s32 1, %v3204_v43  ;;  %v286_v53 = vsub.s32 3, %v3204_v43  ;;  %v3250_v3 = vld [vmem:[%s3215_s6 + $0x8] sm:$0xff]  ;;  %s4102_s17 = scalar_lea.vmem %s4137_s5, %s3053_s21 }
  0x10   : > { %v422_v7 = vld [vmem:[%s4135_s3 + $0x1a0] sm:$0xff]  ;;  %1907 = vmatpush1.bf16.msra.mxu0 %v2833_v5  ;;  %v259_v0 = vunpack.c.h.bf16 %v3235_v60 }
  0x11   : > { %v2826_v10 = vcombine.high %v418_v6, %v422_v7  ;;  %v546_v11 = vld [vmem:[%s4135_s3 + $0x580] sm:$0xff]  ;;  %1959 = vmatprep.subr.bf16.mxu1 %v2962_v8  ;;  %v2825_v18 = vcombine.low %v418_v6, %v422_v7  ;;  %v3265_v8 = vld [vmem:[%s3215_s6 + $0x18] sm:$0xff] }
  0x12   : > { %v550_v12 = vld [vmem:[%s4135_s3 + $0x5a0] sm:$0xff]  ;;  %1960 = vmatpush1.bf16.msra.mxu1 %v2961_v9  ;;  %v257_v9 = vunpack.c.h.bf16 %v3250_v3 }
  0x13   : > { %v410_v13 = vld [vmem:[%s4135_s3 + $0x140] sm:$0xff]  ;;  %v2954_v14 = vcombine.high %v546_v11, %v550_v12  ;;  %1908 = vmatprep.subr.bf16.mxu0 %v2826_v10  ;;  %v2953_v19 = vcombine.low %v546_v11, %v550_v12 }
  0x14   : > { %v414_v15 = vld [vmem:[%s4135_s3 + $0x160] sm:$0xff]  ;;  %1909 = vmatpush1.bf16.msra.mxu0 %v2825_v18 }
  0x15   : > { %v538_v16 = vld [vmem:[%s4135_s3 + $0x540] sm:$0xff]  ;;  %v2818_v20 = vcombine.high %v410_v13, %v414_v15  ;;  %1961 = vmatprep.subr.bf16.mxu1 %v2954_v14  ;;  %v2817_v26 = vcombine.low %v410_v13, %v414_v15  ;;  %v261_v13 = vunpack.c.h.bf16 %v3265_v8 }
  0x16   : > { %v542_v17 = vld [vmem:[%s4135_s3 + $0x560] sm:$0xff]  ;;  %1962 = vmatpush1.bf16.msra.mxu1 %v2953_v19 }
  0x17   : > { %v2946_v21 = vcombine.high %v538_v16, %v542_v17  ;;  %v402_v22 = vld [vmem:[%s4135_s3 + $0x100] sm:$0xff]  ;;  %1910 = vmatprep.subr.bf16.mxu0 %v2818_v20  ;;  %v2945_v27 = vcombine.low %v538_v16, %v542_v17 }
  0x18   : > { %v406_v23 = vld [vmem:[%s4135_s3 + $0x120] sm:$0xff]  ;;  %1911 = vmatpush1.bf16.msra.mxu0 %v2817_v26 }
  0x19   : > { %v530_v24 = vld [vmem:[%s4135_s3 + $0x500] sm:$0xff]  ;;  %v2810_v28 = vcombine.high %v402_v22, %v406_v23  ;;  %1963 = vmatprep.subr.bf16.mxu1 %v2946_v21  ;;  %v2809_v35 = vcombine.low %v402_v22, %v406_v23 }
  0x1a   : > { %v534_v25 = vld [vmem:[%s4135_s3 + $0x520] sm:$0xff]  ;;  %1964 = vmatpush1.bf16.msra.mxu1 %v2945_v27 }
  0x1b   : > { %v2938_v29 = vcombine.high %v530_v24, %v534_v25  ;;  %v394_v30 = vld [vmem:[%s4135_s3 + $0xc0] sm:$0xff]  ;;  %1912 = vmatprep.subr.bf16.mxu0 %v2810_v28  ;;  %v2937_v36 = vcombine.low %v530_v24, %v534_v25 }
  0x1c   : > { %v398_v31 = vld [vmem:[%s4135_s3 + $0xe0] sm:$0xff]  ;;  %1913 = vmatpush1.bf16.msra.mxu0 %v2809_v35 }
  0x1d   : > { %v522_v32 = vld [vmem:[%s4135_s3 + $0x4c0] sm:$0xff]  ;;  %v2802_v37 = vcombine.high %v394_v30, %v398_v31  ;;  %1965 = vmatprep.subr.bf16.mxu1 %v2938_v29  ;;  %v2801_v44 = vcombine.low %v394_v30, %v398_v31 }
  0x1e   : > { %v526_v33 = vld [vmem:[%s4135_s3 + $0x4e0] sm:$0xff]  ;;  %1966 = vmatpush1.bf16.msra.mxu1 %v2937_v36 }
  0x1f   : > { %v2930_v38 = vcombine.high %v522_v32, %v526_v33  ;;  %v386_v39 = vld [vmem:[%s4135_s3 + $0x80] sm:$0xff]  ;;  %1914 = vmatprep.subr.bf16.mxu0 %v2802_v37  ;;  %v2929_v45 = vcombine.low %v522_v32, %v526_v33 }
  0x20   : > { %v390_v40 = vld [vmem:[%s4135_s3 + $0xa0] sm:$0xff]  ;;  %1915 = vmatpush1.bf16.msra.mxu0 %v2801_v44 }
  0x21   : > { %v514_v41 = vld [vmem:[%s4135_s3 + $0x480] sm:$0xff]  ;;  %v2794_v46 = vcombine.high %v386_v39, %v390_v40  ;;  %1967 = vmatprep.subr.bf16.mxu1 %v2930_v38  ;;  %v2793_v54 = vcombine.low %v386_v39, %v390_v40 }
  0x22   : > { %v518_v42 = vld [vmem:[%s4135_s3 + $0x4a0] sm:$0xff]  ;;  %1968 = vmatpush1.bf16.msra.mxu1 %v2929_v45 }
  0x23   : > { %v2922_v47 = vcombine.high %v514_v41, %v518_v42  ;;  %v378_v48 = vld [vmem:[%s4135_s3 + $0x40] sm:$0xff]  ;;  %1916 = vmatprep.subr.bf16.mxu0 %v2794_v46  ;;  %v2921_v56 = vcombine.low %v514_v41, %v518_v42 }
  0x24   : > { %v382_v49 = vld [vmem:[%s4135_s3 + $0x60] sm:$0xff]  ;;  %1917 = vmatpush1.bf16.msra.mxu0 %v2793_v54 }
  0x25   : > { %v506_v50 = vld [vmem:[%s4135_s3 + $0x440] sm:$0xff]  ;;  %v2786_v57 = vcombine.high %v378_v48, %v382_v49  ;;  %1969 = vmatprep.subr.bf16.mxu1 %v2922_v47  ;;  %v2785_v62 = vcombine.low %v378_v48, %v382_v49 }
  0x26   : > { %v510_v51 = vld [vmem:[%s4135_s3 + $0x460] sm:$0xff]  ;;  %1970 = vmatpush1.bf16.msra.mxu1 %v2921_v56 }
  0x27   : > { %v370_v55 = vld [vmem:[%s4135_s3] sm:$0xff]  ;;  %v2914_v61 = vcombine.high %v506_v50, %v510_v51  ;;  %v2913_v11 = vcombine.low %v506_v50, %v510_v51  ;;  %1918 = vmatprep.subr.bf16.mxu0 %v2786_v57 }
  0x28   : > { %v374_v58 = vld [vmem:[%s4135_s3 + $0x20] sm:$0xff]  ;;  %1919 = vmatpush1.bf16.msra.mxu0 %v2785_v62 }
  0x29   : > { %v3232_v59 = vld [vmem:[%s3215_s6] sm:$0xff]  ;;  %v2778_v12 = vcombine.high %v370_v55, %v374_v58  ;;  %1971 = vmatprep.subr.bf16.mxu1 %v2914_v61  ;;  %v2777_v27 = vcombine.low %v370_v55, %v374_v58 }
  0x2a   : > { %v255_v63 = vunpack.c.h.bf16 %v3232_v59  ;;  %v3242_v1 = vld [vmem:[%s4133_s1] sm:$0xf]  ;;  %1972 = vmatpush1.bf16.msra.mxu1 %v2913_v11 }
  0x2b   : > { %v3247_v2 = vld [vmem:[%s4134_s2] sm:$0xf]  ;;  %v3259_v6 = vrot.slane %v3242_v1, %v278_v52  ;;  %v3269_v10 = vrot.slane %v3242_v1, %v286_v53  ;;  %1920 = vmatprep.subr.bf16.mxu0 %v2778_v12 }
  0x2c   : > { %v498_v4 = vld [vmem:[%s4135_s3 + $0x400] sm:$0xff]  ;;  %v3262_v7 = vrot.slane %v3247_v2, %v278_v52  ;;  %v3273_v14 = vrot.slane %v3247_v2, %v286_v53  ;;  %1921 = vmatpush1.bf16.msra.mxu0 %v2777_v27 }
  0x2d   : > { %v502_v5 = vld [vmem:[%s4135_s3 + $0x420] sm:$0xff]  ;;  %v293_v15 = vmul.f32 %v3259_v6, %v255_v63  ;;  %v297_v16 = vmul.f32 %v3259_v6, %v259_v0  ;;  %v295_v17 = vmul.f32 %v3269_v10, %v257_v9  ;;  %v299_v21 = vmul.f32 %v3269_v10, %v261_v13 }
  0x2e   : > { %v2906_v18 = vcombine.high %v498_v4, %v502_v5  ;;  %v490_v19 = vld [vmem:[%s4135_s3 + $0x3c0] sm:$0xff]  ;;  %v2905_v28 = vcombine.low %v498_v4, %v502_v5  ;;  %v274_v9 = vsub.s32 0, %v3204_v43 }
  0x2f   : > { %v494_v20 = vld [vmem:[%s4135_s3 + $0x3e0] sm:$0xff]  ;;  %v331_v24 = vadd.f32 %v3262_v7, %v293_v15  ;;  %v335_v25 = vadd.f32 %v3262_v7, %v297_v16  ;;  %v333_v26 = vadd.f32 %v3273_v14, %v295_v17  ;;  %v337_v29 = vadd.f32 %v3273_v14, %v299_v21 }
  0x30   : > { %v618_v22 = vld [vmem:[%s4135_s3 + $0x7c0] sm:$0xff]  ;;  %v2898_v30 = vcombine.high %v490_v19, %v494_v20  ;;  %1973 = vmatprep.subr.bf16.mxu1 %v2906_v18  ;;  %v2897_v41 = vcombine.low %v490_v19, %v494_v20  ;;  %v282_v15 = vsub.s32 2, %v3204_v43 }
  0x31   : > { %v622_v23 = vld [vmem:[%s4135_s3 + $0x7e0] sm:$0xff]  ;;  %v347_v31 = vmax.f32 %v331_v24, 0.0  ;;  %v351_v32 = vmax.f32 %v335_v25, 0.0  ;;  %v349_v33 = vmax.f32 %v333_v26, 0.0  ;;  %v353_v37 = vmax.f32 %v337_v29, 0.0  ;;  %1974 = vmatpush1.bf16.msra.mxu1 %v2905_v28  ;;  %v3372_v28 = vld [vmem:[%s3215_s6 + $0x30] sm:$0xff] }
  0x32   : > { %v3026_v34 = vcombine.high %v618_v22, %v622_v23  ;;  %v482_v35 = vld [vmem:[%s4135_s3 + $0x380] sm:$0xff]  ;;  %1922 = vmatprep.subr.bf16.mxu0 %v2898_v30  ;;  %v3025_v44 = vcombine.low %v618_v22, %v622_v23  ;;  %v254_v23 = vunpack.c.l.bf16 %v3232_v59  ;;  %v258_v24 = vunpack.c.l.bf16 %v3235_v60  ;;  %v3380_v59 = vld [vmem:[%s3215_s6 + $0x28] sm:$0xff]  ;;  %v3383_v60 = vld [vmem:[%s3215_s6 + $0x38] sm:$0xff] }
  0x33   : > { %v486_v36 = vld [vmem:[%s4135_s3 + $0x3a0] sm:$0xff]  ;;  %v3307_v40 = vpack.c.bf16 %v351_v32, %v347_v31  ;;  %v3309_v42 = vpack.c.bf16 %v353_v37, %v349_v33  ;;  %1923 = vmatpush2.bf16.msra.mxu0 %v2897_v41  ;;  %v3366_v25 = vrot.slane %v3242_v1, %v274_v9  ;;  %v256_v30 = vunpack.c.l.bf16 %v3250_v3 }
  0x34   : > { %v610_v38 = vld [vmem:[%s4135_s3 + $0x780] sm:$0xff]  ;;  %v2890_v45 = vcombine.high %v482_v35, %v486_v36  ;;  %1975 = vmatprep.subr.bf16.mxu1 %v3026_v34  ;;  %v2889_v51 = vcombine.low %v482_v35, %v486_v36  ;;  %v260_v31 = vunpack.c.l.bf16 %v3265_v8  ;;  %v3377_v32 = vrot.slane %v3242_v1, %v282_v15 }
  0x35   : > { %v614_v39 = vld [vmem:[%s4135_s3 + $0x7a0] sm:$0xff]  ;;  %1938 = vmatprep.mubr.bf16.mxu0 %v3307_v40  ;;  %1991 = vmatprep.mubr.bf16.mxu1 %v3309_v42  ;;  %v3392_v8 = vrot.slane %v3247_v2, %v274_v9  ;;  %v292_v37 = vmul.f32 %v3366_v25, %v254_v23  ;;  %v267_v41 = vunpack.c.h.bf16 %v3372_v28  ;;  %v266_v9 = vunpack.c.l.bf16 %v3372_v28  ;;  %v555_v23 = vld [vmem:[%s4135_s3 + $0x5c8] sm:$0xff] }
  0x36   : > { %v3018_v46 = vcombine.high %v610_v38, %v614_v39  ;;  %v474_v47 = vld [vmem:[%s4135_s3 + $0x340] sm:$0xff]  ;;  %1976 = vmatpush2.bf16.msra.mxu1 %v3025_v44  ;;  %1924 = vmatprep.subr.bf16.mxu0 %v2890_v45  ;;  %v3017_v52 = vcombine.low %v610_v38, %v614_v39  ;;  %v296_v38 = vmul.f32 %v3366_v25, %v258_v24  ;;  %v559_v24 = vld [vmem:[%s4135_s3 + $0x5e8] sm:$0xff] }
  0x37   : > { %v478_v48 = vld [vmem:[%s4135_s3 + $0x360] sm:$0xff]  ;;  %1925 = vmatpush2.bf16.msra.mxu0 %v2889_v51  ;;  %v3409_v51 = vrot.slane %v3247_v2, %v282_v15  ;;  %v268_v15 = vunpack.c.l.bf16 %v3383_v60 }
  0x38   : > { %v602_v49 = vld [vmem:[%s4135_s3 + $0x740] sm:$0xff]  ;;  %v2882_v53 = vcombine.high %v474_v47, %v478_v48  ;;  %1977 = vmatprep.subr.bf16.mxu1 %v3018_v46  ;;  %v2881_v61 = vcombine.low %v474_v47, %v478_v48  ;;  %v265_v46 = vunpack.c.h.bf16 %v3380_v59  ;;  %v269_v47 = vunpack.c.h.bf16 %v3383_v60 }
  0x39   : > { %v606_v50 = vld [vmem:[%s4135_s3 + $0x760] sm:$0xff] }
  0x3a   : > { %v3010_v54 = vcombine.high %v602_v49, %v606_v50  ;;  %v466_v55 = vld [vmem:[%s4135_s3 + $0x300] sm:$0xff]  ;;  %1978 = vmatpush2.bf16.msra.mxu1 %v3017_v52  ;;  %1926 = vmatprep.subr.bf16.mxu0 %v2882_v53  ;;  %v3009_v62 = vcombine.low %v602_v49, %v606_v50  ;;  %v294_v49 = vmul.f32 %v3377_v32, %v256_v30 }
  0x3b   : > { %v470_v56 = vld [vmem:[%s4135_s3 + $0x320] sm:$0xff]  ;;  %1927 = vmatpush2.bf16.msra.mxu0 %v2881_v61  ;;  %v298_v50 = vmul.f32 %v3377_v32, %v260_v31  ;;  %v334_v61 = vadd.f32 %v3392_v8, %v296_v38 }
  0x3c   : > { %v594_v57 = vld [vmem:[%s4135_s3 + $0x700] sm:$0xff]  ;;  %v2874_v63 = vcombine.high %v466_v55, %v470_v56  ;;  %1979 = vmatprep.subr.bf16.mxu1 %v3010_v54  ;;  %v2873_v13 = vcombine.low %v466_v55, %v470_v56 }
  0x3d   : > { %v598_v58 = vld [vmem:[%s4135_s3 + $0x720] sm:$0xff] }
  0x3e   : > { %v3002_v0 = vcombine.high %v594_v57, %v598_v58  ;;  %v458_v4 = vld [vmem:[%s4135_s3 + $0x2c0] sm:$0xff]  ;;  %1980 = vmatpush2.bf16.msra.mxu1 %v3009_v62  ;;  %1928 = vmatprep.subr.bf16.mxu0 %v2874_v63  ;;  %v3001_v16 = vcombine.low %v594_v57, %v598_v58  ;;  %v330_v58 = vadd.f32 %v3392_v8, %v292_v37 }
  0x3f   : > { %v462_v5 = vld [vmem:[%s4135_s3 + $0x2e0] sm:$0xff]  ;;  %1929 = vmatpush2.bf16.msra.mxu0 %v2873_v13  ;;  %v305_v63 = vmul.f32 %v3259_v6, %v267_v41  ;;  %v264_v13 = vunpack.c.l.bf16 %v3380_v59  ;;  %v306_v59 = vmul.f32 %v3377_v32, %v268_v15 }
  0x40   : > { %v586_v11 = vld [vmem:[%s4135_s3 + $0x6c0] sm:$0xff]  ;;  %v2866_v17 = vcombine.high %v458_v4, %v462_v5  ;;  %1981 = vmatprep.subr.bf16.mxu1 %v3002_v0  ;;  %v2865_v26 = vcombine.low %v458_v4, %v462_v5  ;;  %v303_v0 = vmul.f32 %v3269_v10, %v265_v46  ;;  %v307_v4 = vmul.f32 %v3269_v10, %v269_v47 }
  0x41   : > { %v590_v12 = vld [vmem:[%s4135_s3 + $0x6e0] sm:$0xff]  ;;  %v346_v10 = vmax.f32 %v330_v58, 0.0  ;;  %v344_v47 = vadd.f32 %v3409_v51, %v306_v59 }
  0x42   : > { %v450_v18 = vld [vmem:[%s4135_s3 + $0x280] sm:$0xff]  ;;  %v2994_v19 = vcombine.high %v586_v11, %v590_v12  ;;  %v2993_v29 = vcombine.low %v586_v11, %v590_v12  ;;  %1982 = vmatpush2.bf16.msra.mxu1 %v3001_v16  ;;  %1930 = vmatprep.subr.bf16.mxu0 %v2866_v17  ;;  %v332_v11 = vadd.f32 %v3409_v51, %v294_v49 }
  0x43   : > { %v454_v20 = vld [vmem:[%s4135_s3 + $0x2a0] sm:$0xff]  ;;  %1931 = vmatpush2.bf16.msra.mxu0 %v2865_v26  ;;  %v336_v12 = vadd.f32 %v3409_v51, %v298_v50  ;;  %v341_v26 = vadd.f32 %v3273_v14, %v303_v0 }
  0x44   : > { %v578_v21 = vld [vmem:[%s4135_s3 + $0x680] sm:$0xff]  ;;  %v2858_v33 = vcombine.high %v450_v18, %v454_v20  ;;  %1983 = vmatprep.subr.bf16.mxu1 %v2994_v19  ;;  %v2857_v44 = vcombine.low %v450_v18, %v454_v20  ;;  %v350_v18 = vmax.f32 %v334_v61, 0.0  ;;  %v427_v19 = vld [vmem:[%s4135_s3 + $0x1c8] sm:$0xff]  ;;  %v348_v30 = vmax.f32 %v332_v11, 0.0 }
  0x45   : > { %v582_v22 = vld [vmem:[%s4135_s3 + $0x6a0] sm:$0xff]  ;;  %v431_v20 = vld [vmem:[%s4135_s3 + $0x1e8] sm:$0xff]  ;;  %v352_v31 = vmax.f32 %v336_v12, 0.0  ;;  %v357_v37 = vmax.f32 %v341_v26, 0.0  ;;  %v360_v61 = vmax.f32 %v344_v47, 0.0 }
  0x46   : > { %v3369_v27 = vld [vmem:[%s3215_s6 + $0x20] sm:$0xff]  ;;  %v2986_v34 = vcombine.high %v578_v21, %v582_v22  ;;  %v2985_v45 = vcombine.low %v578_v21, %v582_v22  ;;  %1984 = vmatpush2.bf16.msra.mxu1 %v2993_v29  ;;  %1932 = vmatprep.subr.bf16.mxu0 %v2858_v33  ;;  %v343_v22 = vadd.f32 %v3262_v7, %v305_v63  ;;  %v531_v11 = vld [vmem:[%s4135_s3 + $0x508] sm:$0xff] }
  0x47   : > { %v442_v35 = vld [vmem:[%s4135_s3 + $0x240] sm:$0xff]  ;;  %v263_v39 = vunpack.c.h.bf16 %v3369_v27  ;;  %v262_v5 = vunpack.c.l.bf16 %v3369_v27  ;;  %1933 = vmatpush2.bf16.msra.mxu0 %v2857_v44  ;;  %v345_v27 = vadd.f32 %v3273_v14, %v307_v4  ;;  %v304_v29 = vmul.f32 %v3366_v25, %v266_v9  ;;  %v419_v14 = vld [vmem:[%s4135_s3 + $0x188] sm:$0xff] }
  0x48   : > { %v446_v3 = vld [vmem:[%s4135_s3 + $0x260] sm:$0xff]  ;;  %1985 = vmatprep.subr.bf16.mxu1 %v2986_v34  ;;  %v2836_v33 = vcombine.high %v427_v19, %v431_v20  ;;  %v3455_v34 = vpack.c.bf16 %v350_v18, %v346_v10  ;;  %v3471_v44 = vpack.c.bf16 %v352_v31, %v348_v30  ;;  %v403_v4 = vld [vmem:[%s4135_s3 + $0x108] sm:$0xff] }
  0x49   : > { %v570_v1 = vld [vmem:[%s4135_s3 + $0x640] sm:$0xff]  ;;  %v2850_v48 = vcombine.high %v442_v35, %v446_v3  ;;  %v2849_v53 = vcombine.low %v442_v35, %v446_v3  ;;  %v301_v62 = vmul.f32 %v3259_v6, %v263_v39  ;;  %v300_v28 = vmul.f32 %v3366_v25, %v262_v5  ;;  %v423_v25 = vld [vmem:[%s4135_s3 + $0x1a8] sm:$0xff] }
  0x4a   : > { %v574_v36 = vld [vmem:[%s4135_s3 + $0x660] sm:$0xff]  ;;  %1986 = vmatpush2.bf16.msra.mxu1 %v2985_v45  ;;  %v2964_v35 = vcombine.high %v555_v23, %v559_v24  ;;  %v361_v38 = vmax.f32 %v345_v27, 0.0  ;;  %v342_v41 = vadd.f32 %v3392_v8, %v304_v29  ;;  %v2835_v45 = vcombine.low %v427_v19, %v431_v20  ;;  %v407_v5 = vld [vmem:[%s4135_s3 + $0x128] sm:$0xff] }
  0x4b   : > { %v2978_v52 = vcombine.high %v570_v1, %v574_v36  ;;  %v2977_v54 = vcombine.low %v570_v1, %v574_v36  ;;  %v434_v55 = vld [vmem:[%s4135_s3 + $0x200] sm:$0xff]  ;;  %1934 = vmatprep.subr.bf16.mxu0 %v2850_v48  ;;  %v339_v21 = vadd.f32 %v3262_v7, %v301_v62  ;;  %v302_v7 = vmul.f32 %v3377_v32, %v264_v13  ;;  %v547_v32 = vld [vmem:[%s4135_s3 + $0x588] sm:$0xff] }
  0x4c   : > { %v438_v56 = vld [vmem:[%s4135_s3 + $0x220] sm:$0xff]  ;;  %1935 = vmatpush2.bf16.msra.mxu0 %v2849_v53  ;;  %v359_v1 = vmax.f32 %v343_v22, 0.0  ;;  %v551_v36 = vld [vmem:[%s4135_s3 + $0x5a8] sm:$0xff]  ;;  %v338_v39 = vadd.f32 %v3392_v8, %v300_v28  ;;  %v2963_v48 = vcombine.low %v555_v23, %v559_v24  ;;  %v2828_v49 = vcombine.high %v419_v14, %v423_v25 }
  0x4d   : > { %v562_v57 = vld [vmem:[%s4135_s3 + $0x600] sm:$0xff]  ;;  %v2842_v6 = vcombine.high %v434_v55, %v438_v56  ;;  %v2841_v17 = vcombine.low %v434_v55, %v438_v56  ;;  %1987 = vmatprep.subr.bf16.mxu1 %v2978_v52  ;;  %v355_v3 = vmax.f32 %v339_v21, 0.0  ;;  %v340_v46 = vadd.f32 %v3409_v51, %v302_v7  ;;  %v411_v8 = vld [vmem:[%s4135_s3 + $0x148] sm:$0xff] }
  0x4e   : > { %v566_v2 = vld [vmem:[%s4135_s3 + $0x620] sm:$0xff]  ;;  %1988 = vmatpush2.bf16.msra.mxu1 %v2977_v54  ;;  %v2956_v50 = vcombine.high %v547_v32, %v551_v36  ;;  %v415_v53 = vld [vmem:[%s4135_s3 + $0x168] sm:$0xff]  ;;  %v3484_v54 = vpack.c.bf16 %v361_v38, %v357_v37  ;;  %v354_v51 = vmax.f32 %v338_v39, 0.0  ;;  %v358_v55 = vmax.f32 %v342_v41, 0.0 }
  0x4f   : > { %v2970_v16 = vcombine.high %v562_v57, %v566_v2  ;;  %1936 = vmatprep.subr.bf16.mxu0 %v2842_v6  ;;  %v2969_v60 = vcombine.low %v562_v57, %v566_v2  ;;  %v3475_v52 = vpack.c.bf16 %v359_v1, %v355_v3  ;;  %v539_v56 = vld [vmem:[%s4135_s3 + $0x548] sm:$0xff]  ;;  %v2827_v2 = vcombine.low %v419_v14, %v423_v25 }
  0x50   : > { %1937 = vmatpush2.bf16.msra.mxu0 %v2841_v17  ;;  %v543_v57 = vld [vmem:[%s4135_s3 + $0x568] sm:$0xff]  ;;  %v356_v58 = vmax.f32 %v340_v46, 0.0  ;;  %v2955_v62 = vcombine.low %v547_v32, %v551_v36  ;;  %v2820_v63 = vcombine.high %v411_v8, %v415_v53  ;;  %v3501_v9 = vpack.c.bf16 %v358_v55, %v354_v51 }
  0x51   : > { %1989 = vmatprep.subr.bf16.mxu1 %v2970_v16  ;;  %2012 = vmatprep.subr.bf16.mxu0 %v2836_v33  ;;  %v2948_v0 = vcombine.high %v539_v56, %v543_v57  ;;  %v535_v12 = vld [vmem:[%s4135_s3 + $0x528] sm:$0xff]  ;;  %v2819_v15 = vcombine.low %v411_v8, %v415_v53  ;;  %v2947_v6 = vcombine.low %v539_v56, %v543_v57 }
  0x52   : > { %1990 = vmatpush2.bf16.msra.mxu1 %v2969_v60  ;;  %v3509_v13 = vpack.c.bf16 %v360_v61, %v356_v58  ;;  %v2812_v16 = vcombine.high %v403_v4, %v407_v5  ;;  %v2940_v17 = vcombine.high %v531_v11, %v535_v12  ;;  %v395_v10 = vld [vmem:[%s4135_s3 + $0xc8] sm:$0xff]  ;;  %v2811_v21 = vcombine.low %v403_v4, %v407_v5 }
  0x53   : > { %2065 = vmatprep.subr.bf16.mxu1 %v2964_v35  ;;  %1939 = vmatmul.mubr.bf16.vlgmr.msra.gmra.mxu0 %v3455_v34  ;;  %v399_v18 = vld [vmem:[%s4135_s3 + $0xe8] sm:$0xff]  ;;  %v2939_v22 = vcombine.low %v531_v11, %v535_v12 }
  0x54   : > { %2013 = vmatpush1.bf16.msra.mxu0 %v2835_v45  ;;  %1948 = vmatprep.mubr.bf16.mxu0 %v3475_v52  ;;  %v523_v19 = vld [vmem:[%s4135_s3 + $0x4c8] sm:$0xff]  ;;  %v2804_v23 = vcombine.high %v395_v10, %v399_v18  ;;  %v2803_v30 = vcombine.low %v395_v10, %v399_v18 }
  0x55   : > { %1992 = vmatmul.mubr.bf16.vlgmr.msra.gmra.mxu1 %v3471_v44  ;;  %2014 = vmatprep.subr.bf16.mxu0 %v2828_v49  ;;  %v527_v20 = vld [vmem:[%s4135_s3 + $0x4e8] sm:$0xff] }
  0x56   : > { %2066 = vmatpush1.bf16.msra.mxu1 %v2963_v48  ;;  %2001 = vmatprep.mubr.bf16.mxu1 %v3484_v54  ;;  %v2932_v24 = vcombine.high %v523_v19, %v527_v20  ;;  %v387_v26 = vld [vmem:[%s4135_s3 + $0x88] sm:$0xff]  ;;  %v2931_v31 = vcombine.low %v523_v19, %v527_v20 }
  0x57   : > { %2067 = vmatprep.subr.bf16.mxu1 %v2956_v50  ;;  %v391_v27 = vld [vmem:[%s4135_s3 + $0xa8] sm:$0xff] }
  0x58   : > { %2015 = vmatpush1.bf16.msra.mxu0 %v2827_v2  ;;  %v515_v28 = vld [vmem:[%s4135_s3 + $0x488] sm:$0xff]  ;;  %v2796_v7 = vcombine.high %v387_v26, %v391_v27  ;;  %v2795_v25 = vcombine.low %v387_v26, %v391_v27 }
  0x59   : > { %2016 = vmatprep.subr.bf16.mxu0 %v2820_v63  ;;  %v519_v29 = vld [vmem:[%s4135_s3 + $0x4a8] sm:$0xff] }
  0x5a   : > { %2068 = vmatpush1.bf16.msra.mxu1 %v2955_v62  ;;  %v2924_v59 = vcombine.high %v515_v28, %v519_v29  ;;  %v379_v60 = vld [vmem:[%s4135_s3 + $0x48] sm:$0xff]  ;;  %v2923_v3 = vcombine.low %v515_v28, %v519_v29 }
  0x5b   : > { %2069 = vmatprep.subr.bf16.mxu1 %v2948_v0  ;;  %1949 = vmatmul.mubr.bf16.gmra.mxu0 %v3501_v9  ;;  %v383_v33 = vld [vmem:[%s4135_s3 + $0x68] sm:$0xff] }
  0x5c   : > { %2017 = vmatpush1.bf16.msra.mxu0 %v2819_v15  ;;  %2044 = vmatprep.mubr.bf16.mxu0 %v3307_v40  ;;  %v507_v35 = vld [vmem:[%s4135_s3 + $0x448] sm:$0xff]  ;;  %v2788_v1 = vcombine.high %v379_v60, %v383_v33  ;;  %v2787_v41 = vcombine.low %v379_v60, %v383_v33 }
  0x5d   : > { %2002 = vmatmul.mubr.bf16.gmra.mxu1 %v3509_v13  ;;  %2018 = vmatprep.subr.bf16.mxu0 %v2812_v16  ;;  %v511_v14 = vld [vmem:[%s4135_s3 + $0x468] sm:$0xff] }
  0x5e   : > { %2070 = vmatpush1.bf16.msra.mxu1 %v2947_v6  ;;  %2097 = vmatprep.mubr.bf16.mxu1 %v3309_v42  ;;  %v2916_v32 = vcombine.high %v507_v35, %v511_v14  ;;  %v371_v36 = vld [vmem:[%s4135_s3 + $0x8] sm:$0xff]  ;;  %v2915_v45 = vcombine.low %v507_v35, %v511_v14 }
  0x5f   : > { %2071 = vmatprep.subr.bf16.mxu1 %v2940_v17  ;;  %v375_v37 = vld [vmem:[%s4135_s3 + $0x28] sm:$0xff] }
  0x60   : > { %2019 = vmatpush1.bf16.msra.mxu0 %v2811_v21  ;;  %v499_v38 = vld [vmem:[%s4135_s3 + $0x408] sm:$0xff]  ;;  %v2780_v46 = vcombine.high %v371_v36, %v375_v37  ;;  %v2779_v53 = vcombine.low %v371_v36, %v375_v37 }
  0x61   : > { %2020 = vmatprep.subr.bf16.mxu0 %v2804_v23  ;;  %v503_v39 = vld [vmem:[%s4135_s3 + $0x428] sm:$0xff] }
  0x62   : > { %2072 = vmatpush1.bf16.msra.mxu1 %v2939_v22  ;;  %v2908_v47 = vcombine.high %v499_v38, %v503_v39  ;;  %v491_v48 = vld [vmem:[%s4135_s3 + $0x3c8] sm:$0xff]  ;;  %v2907_v51 = vcombine.low %v499_v38, %v503_v39 }
  0x63   : > { %2073 = vmatprep.subr.bf16.mxu1 %v2932_v24  ;;  %v495_v49 = vld [vmem:[%s4135_s3 + $0x3e8] sm:$0xff] }
  0x64   : > { %2021 = vmatpush1.bf16.msra.mxu0 %v2803_v30  ;;  %v619_v50 = vld [vmem:[%s4135_s3 + $0x7c8] sm:$0xff]  ;;  %v2900_v55 = vcombine.high %v491_v48, %v495_v49  ;;  %v2899_v62 = vcombine.low %v491_v48, %v495_v49 }
  0x65   : > { %2022 = vmatprep.subr.bf16.mxu0 %v2796_v7  ;;  %v623_v8 = vld [vmem:[%s4135_s3 + $0x7e8] sm:$0xff] }
  0x66   : > { %2074 = vmatpush1.bf16.msra.mxu1 %v2931_v31  ;;  %v3028_v56 = vcombine.high %v619_v50, %v623_v8  ;;  %v483_v57 = vld [vmem:[%s4135_s3 + $0x388] sm:$0xff]  ;;  %v3027_v63 = vcombine.low %v619_v50, %v623_v8 }
  0x67   : > { %2075 = vmatprep.subr.bf16.mxu1 %v2924_v59  ;;  %v487_v2 = vld [vmem:[%s4135_s3 + $0x3a8] sm:$0xff] }
  0x68   : > { %2023 = vmatpush1.bf16.msra.mxu0 %v2795_v25  ;;  %v611_v58 = vld [vmem:[%s4135_s3 + $0x788] sm:$0xff]  ;;  %v2892_v0 = vcombine.high %v483_v57, %v487_v2  ;;  %v2891_v6 = vcombine.low %v483_v57, %v487_v2  ;;  %v428_v2 = vld [vmem:[%s4135_s3 + $0x1d0] sm:$0xff] }
  0x69   : > { %2024 = vmatprep.subr.bf16.mxu0 %v2788_v1  ;;  %v615_v61 = vld [vmem:[%s4135_s3 + $0x7a8] sm:$0xff] }
  0x6a   : > { %2076 = vmatpush1.bf16.msra.mxu1 %v2923_v3  ;;  %v3020_v4 = vcombine.high %v611_v58, %v615_v61  ;;  %v475_v5 = vld [vmem:[%s4135_s3 + $0x348] sm:$0xff]  ;;  %v3019_v16 = vcombine.low %v611_v58, %v615_v61  ;;  %v432_v58 = vld [vmem:[%s4135_s3 + $0x1f0] sm:$0xff] }
  0x6b   : > { %2077 = vmatprep.subr.bf16.mxu1 %v2916_v32  ;;  %v479_v11 = vld [vmem:[%s4135_s3 + $0x368] sm:$0xff]  ;;  %v556_v61 = vld [vmem:[%s4135_s3 + $0x5d0] sm:$0xff] }
  0x6c   : > { %2025 = vmatpush1.bf16.msra.mxu0 %v2787_v41  ;;  %v603_v12 = vld [vmem:[%s4135_s3 + $0x748] sm:$0xff]  ;;  %v2884_v17 = vcombine.high %v475_v5, %v479_v11  ;;  %v2883_v22 = vcombine.low %v475_v5, %v479_v11  ;;  %v420_v11 = vld [vmem:[%s4135_s3 + $0x190] sm:$0xff] }
  0x6d   : > { %2026 = vmatprep.subr.bf16.mxu0 %v2780_v46  ;;  %v607_v15 = vld [vmem:[%s4135_s3 + $0x768] sm:$0xff] }
  0x6e   : > { %2078 = vmatpush1.bf16.msra.mxu1 %v2915_v45  ;;  %v3012_v10 = vcombine.high %v603_v12, %v607_v15  ;;  %v467_v18 = vld [vmem:[%s4135_s3 + $0x308] sm:$0xff]  ;;  %v3011_v23 = vcombine.low %v603_v12, %v607_v15  ;;  %v424_v12 = vld [vmem:[%s4135_s3 + $0x1b0] sm:$0xff] }
  0x6f   : > { %2079 = vmatprep.subr.bf16.mxu1 %v2908_v47  ;;  %v471_v19 = vld [vmem:[%s4135_s3 + $0x328] sm:$0xff]  ;;  %v548_v15 = vld [vmem:[%s4135_s3 + $0x590] sm:$0xff] }
  0x70   : > { %2027 = vmatpush1.bf16.msra.mxu0 %v2779_v53  ;;  %v595_v20 = vld [vmem:[%s4135_s3 + $0x708] sm:$0xff]  ;;  %v2876_v24 = vcombine.high %v467_v18, %v471_v19  ;;  %v2875_v31 = vcombine.low %v467_v18, %v471_v19  ;;  %v412_v19 = vld [vmem:[%s4135_s3 + $0x150] sm:$0xff] }
  0x71   : > { %2028 = vmatprep.subr.bf16.mxu0 %v2900_v55  ;;  %v599_v21 = vld [vmem:[%s4135_s3 + $0x728] sm:$0xff] }
  0x72   : > { %2080 = vmatpush1.bf16.msra.mxu1 %v2907_v51  ;;  %v3004_v26 = vcombine.high %v595_v20, %v599_v21  ;;  %v459_v27 = vld [vmem:[%s4135_s3 + $0x2c8] sm:$0xff]  ;;  %v3003_v7 = vcombine.low %v595_v20, %v599_v21  ;;  %v416_v20 = vld [vmem:[%s4135_s3 + $0x170] sm:$0xff] }
  0x73   : > { %2081 = vmatprep.subr.bf16.mxu1 %v3028_v56  ;;  %v463_v28 = vld [vmem:[%s4135_s3 + $0x2e8] sm:$0xff]  ;;  %v540_v21 = vld [vmem:[%s4135_s3 + $0x550] sm:$0xff] }
  0x74   : > { %2029 = vmatpush2.bf16.msra.mxu0 %v2899_v62  ;;  %v587_v29 = vld [vmem:[%s4135_s3 + $0x6c8] sm:$0xff]  ;;  %v2868_v59 = vcombine.high %v459_v27, %v463_v28  ;;  %v2867_v3 = vcombine.low %v459_v27, %v463_v28  ;;  %v560_v62 = vld [vmem:[%s4135_s3 + $0x5f0] sm:$0xff] }
  0x75   : > { %2030 = vmatprep.subr.bf16.mxu0 %v2892_v0  ;;  %v591_v30 = vld [vmem:[%s4135_s3 + $0x6e8] sm:$0xff]  ;;  %v2966_v5 = vcombine.high %v556_v61, %v560_v62  ;;  %v404_v28 = vld [vmem:[%s4135_s3 + $0x110] sm:$0xff] }
  0x76   : > { %2082 = vmatpush2.bf16.msra.mxu1 %v3027_v63  ;;  %v2996_v60 = vcombine.high %v587_v29, %v591_v30  ;;  %v451_v33 = vld [vmem:[%s4135_s3 + $0x288] sm:$0xff]  ;;  %v2995_v1 = vcombine.low %v587_v29, %v591_v30  ;;  %v408_v29 = vld [vmem:[%s4135_s3 + $0x130] sm:$0xff] }
  0x77   : > { %2083 = vmatprep.subr.bf16.mxu1 %v3020_v4  ;;  %v455_v35 = vld [vmem:[%s4135_s3 + $0x2a8] sm:$0xff]  ;;  %v2838_v4 = vcombine.high %v428_v2, %v432_v58  ;;  %v532_v30 = vld [vmem:[%s4135_s3 + $0x510] sm:$0xff] }
  0x78   : > { %2031 = vmatpush2.bf16.msra.mxu0 %v2891_v6  ;;  %v579_v14 = vld [vmem:[%s4135_s3 + $0x688] sm:$0xff]  ;;  %v2860_v32 = vcombine.high %v451_v33, %v455_v35  ;;  %v2859_v45 = vcombine.low %v451_v33, %v455_v35  ;;  %v552_v6 = vld [vmem:[%s4135_s3 + $0x5b0] sm:$0xff] }
  0x79   : > { %2032 = vmatprep.subr.bf16.mxu0 %v2884_v17  ;;  %v583_v25 = vld [vmem:[%s4135_s3 + $0x6a8] sm:$0xff]  ;;  %v2965_v17 = vcombine.low %v556_v61, %v560_v62  ;;  %v2958_v18 = vcombine.high %v548_v15, %v552_v6  ;;  %v396_v35 = vld [vmem:[%s4135_s3 + $0xd0] sm:$0xff] }
  0x7a   : > { %2084 = vmatpush2.bf16.msra.mxu1 %v3019_v16  ;;  %v2988_v36 = vcombine.high %v579_v14, %v583_v25  ;;  %v443_v37 = vld [vmem:[%s4135_s3 + $0x248] sm:$0xff]  ;;  %v2987_v46 = vcombine.low %v579_v14, %v583_v25  ;;  %v2837_v16 = vcombine.low %v428_v2, %v432_v58  ;;  %v400_v14 = vld [vmem:[%s4135_s3 + $0xf0] sm:$0xff] }
  0x7b   : > { %2085 = vmatprep.subr.bf16.mxu1 %v3012_v10  ;;  %v447_v38 = vld [vmem:[%s4135_s3 + $0x268] sm:$0xff]  ;;  %v2830_v10 = vcombine.high %v420_v11, %v424_v12  ;;  %v524_v25 = vld [vmem:[%s4135_s3 + $0x4d0] sm:$0xff] }
  0x7c   : > { %2033 = vmatpush2.bf16.msra.mxu0 %v2883_v22  ;;  %v571_v39 = vld [vmem:[%s4135_s3 + $0x648] sm:$0xff]  ;;  %v2852_v47 = vcombine.high %v443_v37, %v447_v38  ;;  %v2851_v51 = vcombine.low %v443_v37, %v447_v38  ;;  %v544_v22 = vld [vmem:[%s4135_s3 + $0x570] sm:$0xff] }
  0x7d   : > { %2034 = vmatprep.subr.bf16.mxu0 %v2876_v24  ;;  %v575_v41 = vld [vmem:[%s4135_s3 + $0x668] sm:$0xff]  ;;  %v2957_v24 = vcombine.low %v548_v15, %v552_v6  ;;  %v2950_v27 = vcombine.high %v540_v21, %v544_v22  ;;  %v388_v38 = vld [vmem:[%s4135_s3 + $0x90] sm:$0xff] }
  0x7e   : > { %2086 = vmatpush2.bf16.msra.mxu1 %v3011_v23  ;;  %v2980_v48 = vcombine.high %v571_v39, %v575_v41  ;;  %v435_v49 = vld [vmem:[%s4135_s3 + $0x208] sm:$0xff]  ;;  %v2979_v55 = vcombine.low %v571_v39, %v575_v41  ;;  %v2829_v23 = vcombine.low %v420_v11, %v424_v12  ;;  %v392_v39 = vld [vmem:[%s4135_s3 + $0xb0] sm:$0xff] }
  0x7f   : > { %2087 = vmatprep.subr.bf16.mxu1 %v3004_v26  ;;  %v439_v50 = vld [vmem:[%s4135_s3 + $0x228] sm:$0xff]  ;;  %v2822_v26 = vcombine.high %v412_v19, %v416_v20  ;;  %v516_v41 = vld [vmem:[%s4135_s3 + $0x490] sm:$0xff] }
  0x80   : > { %2035 = vmatpush2.bf16.msra.mxu0 %v2875_v31  ;;  %v563_v8 = vld [vmem:[%s4135_s3 + $0x608] sm:$0xff]  ;;  %v2844_v56 = vcombine.high %v435_v49, %v439_v50  ;;  %v2843_v63 = vcombine.low %v435_v49, %v439_v50  ;;  %v536_v31 = vld [vmem:[%s4135_s3 + $0x530] sm:$0xff] }
  0x81   : > { %2036 = vmatprep.subr.bf16.mxu0 %v2868_v59  ;;  %v567_v53 = vld [vmem:[%s4135_s3 + $0x628] sm:$0xff]  ;;  %v2949_v59 = vcombine.low %v540_v21, %v544_v22  ;;  %v2942_v33 = vcombine.high %v532_v30, %v536_v31  ;;  %v380_v50 = vld [vmem:[%s4135_s3 + $0x50] sm:$0xff] }
  0x82   : > { %2088 = vmatpush2.bf16.msra.mxu1 %v3003_v7  ;;  %v2972_v57 = vcombine.high %v563_v8, %v567_v53  ;;  %v2971_v0 = vcombine.low %v563_v8, %v567_v53  ;;  %v2821_v7 = vcombine.low %v412_v19, %v416_v20  ;;  %v384_v8 = vld [vmem:[%s4135_s3 + $0x70] sm:$0xff] }
  0x83   : > { %2089 = vmatprep.subr.bf16.mxu1 %v2996_v60  ;;  %v2814_v60 = vcombine.high %v404_v28, %v408_v29  ;;  %v508_v53 = vld [vmem:[%s4135_s3 + $0x450] sm:$0xff] }
  0x84   : > { %2037 = vmatpush2.bf16.msra.mxu0 %v2867_v3  ;;  %v528_v3 = vld [vmem:[%s4135_s3 + $0x4f0] sm:$0xff] }
  0x85   : > { %2038 = vmatprep.subr.bf16.mxu0 %v2860_v32  ;;  %v2941_v32 = vcombine.low %v532_v30, %v536_v31  ;;  %v2934_v37 = vcombine.high %v524_v25, %v528_v3  ;;  %v372_v58 = vld [vmem:[%s4135_s3 + $0x10] sm:$0xff] }
  0x86   : > { %2090 = vmatpush2.bf16.msra.mxu1 %v2995_v1  ;;  %v2813_v1 = vcombine.low %v404_v28, %v408_v29  ;;  %v376_v61 = vld [vmem:[%s4135_s3 + $0x30] sm:$0xff] }
  0x87   : > { %2091 = vmatprep.subr.bf16.mxu1 %v2988_v36  ;;  %v2806_v36 = vcombine.high %v396_v35, %v400_v14  ;;  %v500_v62 = vld [vmem:[%s4135_s3 + $0x410] sm:$0xff] }
  0x88   : > { %2039 = vmatpush2.bf16.msra.mxu0 %v2859_v45  ;;  %v520_v45 = vld [vmem:[%s4135_s3 + $0x4b0] sm:$0xff] }
  0x89   : > { %2040 = vmatprep.subr.bf16.mxu0 %v2852_v47  ;;  %v2933_v47 = vcombine.low %v524_v25, %v528_v3  ;;  %v2926_v49 = vcombine.high %v516_v41, %v520_v45  ;;  %v492_v12 = vld [vmem:[%s4135_s3 + $0x3d0] sm:$0xff] }
  0x8a   : > { %2092 = vmatpush2.bf16.msra.mxu1 %v2987_v46  ;;  %v2805_v46 = vcombine.low %v396_v35, %v400_v14  ;;  %v496_v15 = vld [vmem:[%s4135_s3 + $0x3f0] sm:$0xff] }
  0x8b   : > { %2093 = vmatprep.subr.bf16.mxu1 %v2980_v48  ;;  %v2798_v48 = vcombine.high %v388_v38, %v392_v39  ;;  %v620_v6 = vld [vmem:[%s4135_s3 + $0x7d0] sm:$0xff] }
  0x8c   : > { %2041 = vmatpush2.bf16.msra.mxu0 %v2851_v51  ;;  %v512_v51 = vld [vmem:[%s4135_s3 + $0x470] sm:$0xff] }
  0x8d   : > { %2042 = vmatprep.subr.bf16.mxu0 %v2844_v56  ;;  %v2925_v56 = vcombine.low %v516_v41, %v520_v45  ;;  %v2918_v2 = vcombine.high %v508_v53, %v512_v51  ;;  %v484_v20 = vld [vmem:[%s4135_s3 + $0x390] sm:$0xff] }
  0x8e   : > { %2094 = vmatpush2.bf16.msra.mxu1 %v2979_v55  ;;  %v2797_v55 = vcombine.low %v388_v38, %v392_v39  ;;  %v488_v21 = vld [vmem:[%s4135_s3 + $0x3b0] sm:$0xff] }
  0x8f   : > { %2095 = vmatprep.subr.bf16.mxu1 %v2972_v57  ;;  %v2790_v57 = vcombine.high %v380_v50, %v384_v8  ;;  %v612_v22 = vld [vmem:[%s4135_s3 + $0x790] sm:$0xff] }
  0x90   : > { %2043 = vmatpush2.bf16.msra.mxu0 %v2843_v63  ;;  %v504_v63 = vld [vmem:[%s4135_s3 + $0x430] sm:$0xff] }
  0x91   : > { %2118 = vmatprep.subr.bf16.mxu0 %v2838_v4  ;;  %v2917_v4 = vcombine.low %v508_v53, %v512_v51  ;;  %v2910_v11 = vcombine.high %v500_v62, %v504_v63  ;;  %v476_v29 = vld [vmem:[%s4135_s3 + $0x350] sm:$0xff] }
  0x92   : > { %2096 = vmatpush2.bf16.msra.mxu1 %v2971_v0  ;;  %v2789_v0 = vcombine.low %v380_v50, %v384_v8  ;;  %v480_v30 = vld [vmem:[%s4135_s3 + $0x370] sm:$0xff] }
  0x93   : > { %2171 = vmatprep.subr.bf16.mxu1 %v2966_v5  ;;  %2045 = vmatmul.mubr.bf16.vlgmr.msra.gmra.mxu0 %v3455_v34  ;;  %v2782_v5 = vcombine.high %v372_v58, %v376_v61  ;;  %v604_v31 = vld [vmem:[%s4135_s3 + $0x750] sm:$0xff] }
  0x94   : > { %2119 = vmatpush1.bf16.msra.mxu0 %v2837_v16  ;;  %2054 = vmatprep.mubr.bf16.mxu0 %v3475_v52  ;;  %v624_v16 = vld [vmem:[%s4135_s3 + $0x7f0] sm:$0xff] }
  0x95   : > { %2098 = vmatmul.mubr.bf16.vlgmr.msra.gmra.mxu1 %v3471_v44  ;;  %2120 = vmatprep.subr.bf16.mxu0 %v2830_v10  ;;  %v2909_v10 = vcombine.low %v500_v62, %v504_v63  ;;  %v3030_v19 = vcombine.high %v620_v6, %v624_v16  ;;  %v468_v14 = vld [vmem:[%s4135_s3 + $0x310] sm:$0xff] }
  0x96   : > { %2172 = vmatpush1.bf16.msra.mxu1 %v2965_v17  ;;  %2107 = vmatprep.mubr.bf16.mxu1 %v3484_v54  ;;  %v2781_v17 = vcombine.low %v372_v58, %v376_v61  ;;  %v472_v25 = vld [vmem:[%s4135_s3 + $0x330] sm:$0xff] }
  0x97   : > { %2173 = vmatprep.subr.bf16.mxu1 %v2958_v18  ;;  %v2902_v18 = vcombine.high %v492_v12, %v496_v15  ;;  %v596_v3 = vld [vmem:[%s4135_s3 + $0x710] sm:$0xff] }
  0x98   : > { %2121 = vmatpush1.bf16.msra.mxu0 %v2829_v23  ;;  %v616_v23 = vld [vmem:[%s4135_s3 + $0x7b0] sm:$0xff] }
  0x99   : > { %2122 = vmatprep.subr.bf16.mxu0 %v2822_v26  ;;  %v3029_v26 = vcombine.low %v620_v6, %v624_v16  ;;  %v3022_v28 = vcombine.high %v612_v22, %v616_v23  ;;  %v460_v39 = vld [vmem:[%s4135_s3 + $0x2d0] sm:$0xff] }
  0x9a   : > { %2174 = vmatpush1.bf16.msra.mxu1 %v2957_v24  ;;  %v2901_v24 = vcombine.low %v492_v12, %v496_v15  ;;  %v464_v41 = vld [vmem:[%s4135_s3 + $0x2f0] sm:$0xff] }
  0x9b   : > { %2175 = vmatprep.subr.bf16.mxu1 %v2950_v27  ;;  %2055 = vmatmul.mubr.bf16.gmra.mxu0 %v3501_v9  ;;  %v2894_v27 = vcombine.high %v484_v20, %v488_v21  ;;  %v588_v45 = vld [vmem:[%s4135_s3 + $0x6d0] sm:$0xff] }
  0x9c   : > { %2123 = vmatpush1.bf16.msra.mxu0 %v2821_v7  ;;  %2150 = vmatprep.mubr.bf16.mxu0 %v3307_v40  ;;  %v608_v7 = vld [vmem:[%s4135_s3 + $0x770] sm:$0xff] }
  0x9d   : > { %2108 = vmatmul.mubr.bf16.gmra.mxu1 %v3509_v13  ;;  %2124 = vmatprep.subr.bf16.mxu0 %v2814_v60  ;;  %v3021_v60 = vcombine.low %v612_v22, %v616_v23  ;;  %v3014_v35 = vcombine.high %v604_v31, %v608_v7  ;;  %v452_v8 = vld [vmem:[%s4135_s3 + $0x290] sm:$0xff]  ;;  %v433_v22 = vld [vmem:[%s4135_s3 + $0x1f8] sm:$0xff] }
  0x9e   : > { %2176 = vmatpush1.bf16.msra.mxu1 %v2949_v59  ;;  %2203 = vmatprep.mubr.bf16.mxu1 %v3309_v42  ;;  %v2893_v59 = vcombine.low %v484_v20, %v488_v21  ;;  %v456_v53 = vld [vmem:[%s4135_s3 + $0x2b0] sm:$0xff]  ;;  %v429_v21 = vld [vmem:[%s4135_s3 + $0x1d8] sm:$0xff] }
  0x9f   : > { %2177 = vmatprep.subr.bf16.mxu1 %v2942_v33  ;;  %v2886_v33 = vcombine.high %v476_v29, %v480_v30  ;;  %v580_v51 = vld [vmem:[%s4135_s3 + $0x690] sm:$0xff]  ;;  %v557_v23 = vld [vmem:[%s4135_s3 + $0x5d8] sm:$0xff] }
  0xa0   : > { %2125 = vmatpush1.bf16.msra.mxu0 %v2813_v1  ;;  %v600_v1 = vld [vmem:[%s4135_s3 + $0x730] sm:$0xff] }
  0xa1   : > { %2126 = vmatprep.subr.bf16.mxu0 %v2806_v36  ;;  %v3013_v36 = vcombine.low %v604_v31, %v608_v7  ;;  %v3006_v38 = vcombine.high %v596_v3, %v600_v1  ;;  %v444_v61 = vld [vmem:[%s4135_s3 + $0x250] sm:$0xff]  ;;  %v425_v31 = vld [vmem:[%s4135_s3 + $0x1b8] sm:$0xff] }
  0xa2   : > { %2178 = vmatpush1.bf16.msra.mxu1 %v2941_v32  ;;  %v2885_v32 = vcombine.low %v476_v29, %v480_v30  ;;  %v448_v62 = vld [vmem:[%s4135_s3 + $0x270] sm:$0xff]  ;;  %v421_v30 = vld [vmem:[%s4135_s3 + $0x198] sm:$0xff] }
  0xa3   : > { %2179 = vmatprep.subr.bf16.mxu1 %v2934_v37  ;;  %v2878_v37 = vcombine.high %v468_v14, %v472_v25  ;;  %v572_v63 = vld [vmem:[%s4135_s3 + $0x650] sm:$0xff]  ;;  %v549_v7 = vld [vmem:[%s4135_s3 + $0x598] sm:$0xff] }
  0xa4   : > { %2127 = vmatpush1.bf16.msra.mxu0 %v2805_v46  ;;  %v592_v46 = vld [vmem:[%s4135_s3 + $0x6f0] sm:$0xff] }
  0xa5   : > { %2128 = vmatprep.subr.bf16.mxu0 %v2798_v48  ;;  %v3005_v48 = vcombine.low %v596_v3, %v600_v1  ;;  %v2998_v50 = vcombine.high %v588_v45, %v592_v46  ;;  %v436_v15 = vld [vmem:[%s4135_s3 + $0x210] sm:$0xff]  ;;  %v417_v3 = vld [vmem:[%s4135_s3 + $0x178] sm:$0xff] }
  0xa6   : > { %2180 = vmatpush1.bf16.msra.mxu1 %v2933_v47  ;;  %v2877_v47 = vcombine.low %v468_v14, %v472_v25  ;;  %v440_v6 = vld [vmem:[%s4135_s3 + $0x230] sm:$0xff]  ;;  %v413_v25 = vld [vmem:[%s4135_s3 + $0x158] sm:$0xff] }
  0xa7   : > { %2181 = vmatprep.subr.bf16.mxu1 %v2926_v49  ;;  %v2870_v49 = vcombine.high %v460_v39, %v464_v41  ;;  %v564_v16 = vld [vmem:[%s4135_s3 + $0x610] sm:$0xff]  ;;  %v541_v1 = vld [vmem:[%s4135_s3 + $0x558] sm:$0xff] }
  0xa8   : > { %2129 = vmatpush1.bf16.msra.mxu0 %v2797_v55  ;;  %v584_v55 = vld [vmem:[%s4135_s3 + $0x6b0] sm:$0xff] }
  0xa9   : > { %2130 = vmatprep.subr.bf16.mxu0 %v2790_v57  ;;  %v2997_v57 = vcombine.low %v588_v45, %v592_v46  ;;  %v2990_v58 = vcombine.high %v580_v51, %v584_v55  ;;  %v409_v45 = vld [vmem:[%s4135_s3 + $0x138] sm:$0xff] }
  0xaa   : > { %2182 = vmatpush1.bf16.msra.mxu1 %v2925_v56  ;;  %v2869_v56 = vcombine.low %v460_v39, %v464_v41  ;;  %v405_v41 = vld [vmem:[%s4135_s3 + $0x118] sm:$0xff] }
  0xab   : > { %2183 = vmatprep.subr.bf16.mxu1 %v2918_v2  ;;  %v2862_v2 = vcombine.high %v452_v8, %v456_v53  ;;  %v533_v46 = vld [vmem:[%s4135_s3 + $0x518] sm:$0xff] }
  0xac   : > { %2131 = vmatpush1.bf16.msra.mxu0 %v2789_v0  ;;  %v576_v0 = vld [vmem:[%s4135_s3 + $0x670] sm:$0xff] }
  0xad   : > { %2132 = vmatprep.subr.bf16.mxu0 %v2782_v5  ;;  %v2989_v5 = vcombine.low %v580_v51, %v584_v55  ;;  %v2982_v12 = vcombine.high %v572_v63, %v576_v0  ;;  %v401_v51 = vld [vmem:[%s4135_s3 + $0xf8] sm:$0xff] }
  0xae   : > { %2184 = vmatpush1.bf16.msra.mxu1 %v2917_v4  ;;  %v2861_v4 = vcombine.low %v452_v8, %v456_v53  ;;  %v397_v53 = vld [vmem:[%s4135_s3 + $0xd8] sm:$0xff] }
  0xaf   : > { %2185 = vmatprep.subr.bf16.mxu1 %v2910_v11  ;;  %v2854_v11 = vcombine.high %v444_v61, %v448_v62  ;;  %v525_v55 = vld [vmem:[%s4135_s3 + $0x4d8] sm:$0xff] }
  0xb0   : > { %2133 = vmatpush1.bf16.msra.mxu0 %v2781_v17  ;;  %v568_v17 = vld [vmem:[%s4135_s3 + $0x630] sm:$0xff] }
  0xb1   : > { %2134 = vmatprep.subr.bf16.mxu0 %v2902_v18  ;;  %v2981_v18 = vcombine.low %v572_v63, %v576_v0  ;;  %v2974_v20 = vcombine.high %v564_v16, %v568_v17  ;;  %v393_v63 = vld [vmem:[%s4135_s3 + $0xb8] sm:$0xff] }
  0xb2   : > { %2186 = vmatpush1.bf16.msra.mxu1 %v2909_v10  ;;  %v2853_v10 = vcombine.low %v444_v61, %v448_v62  ;;  %v389_v62 = vld [vmem:[%s4135_s3 + $0x98] sm:$0xff] }
  0xb3   : > { %2187 = vmatprep.subr.bf16.mxu1 %v3030_v19  ;;  %v2846_v19 = vcombine.high %v436_v15, %v440_v6  ;;  %v517_v0 = vld [vmem:[%s4135_s3 + $0x498] sm:$0xff] }
  0xb4   : > { %2135 = vmatpush2.bf16.msra.mxu0 %v2901_v24  ;;  %v561_v24 = vld [vmem:[%s4135_s3 + $0x5f8] sm:$0xff] }
  0xb5   : > { %2136 = vmatprep.subr.bf16.mxu0 %v2894_v27  ;;  %v2973_v27 = vcombine.low %v564_v16, %v568_v17  ;;  %v2968_v29 = vcombine.high %v557_v23, %v561_v24  ;;  %v513_v16 = vld [vmem:[%s4135_s3 + $0x478] sm:$0xff]  ;;  %v2799_v17 = vcombine.low %v389_v62, %v393_v63 }
  0xb6   : > { %2188 = vmatpush2.bf16.msra.mxu1 %v3029_v26  ;;  %v2845_v26 = vcombine.low %v436_v15, %v440_v6  ;;  %v385_v6 = vld [vmem:[%s4135_s3 + $0x78] sm:$0xff] }
  0xb7   : > { %2189 = vmatprep.subr.bf16.mxu1 %v3022_v28  ;;  %v2840_v28 = vcombine.high %v429_v21, %v433_v22 }
  0xb8   : > { %2137 = vmatpush2.bf16.msra.mxu0 %v2893_v59  ;;  %v553_v59 = vld [vmem:[%s4135_s3 + $0x5b8] sm:$0xff] }
  0xb9   : > { %2138 = vmatprep.subr.bf16.mxu0 %v2886_v33  ;;  %v2967_v33 = vcombine.low %v557_v23, %v561_v24  ;;  %v2960_v14 = vcombine.high %v549_v7, %v553_v59  ;;  %v505_v23 = vld [vmem:[%s4135_s3 + $0x438] sm:$0xff] }
  0xba   : > { %2190 = vmatpush2.bf16.msra.mxu1 %v3021_v60  ;;  %v2839_v60 = vcombine.low %v429_v21, %v433_v22  ;;  %v377_v21 = vld [vmem:[%s4135_s3 + $0x38] sm:$0xff] }
  0xbb   : > { %2191 = vmatprep.subr.bf16.mxu1 %v3014_v35  ;;  %v2832_v35 = vcombine.high %v421_v30, %v425_v31  ;;  %v501_v22 = vld [vmem:[%s4135_s3 + $0x418] sm:$0xff] }
  0xbc   : > { %2139 = vmatpush2.bf16.msra.mxu0 %v2885_v32  ;;  %v545_v32 = vld [vmem:[%s4135_s3 + $0x578] sm:$0xff] }
  0xbd   : > { %2140 = vmatprep.subr.bf16.mxu0 %v2878_v37  ;;  %v2959_v37 = vcombine.low %v549_v7, %v553_v59  ;;  %v2952_v39 = vcombine.high %v541_v1, %v545_v32  ;;  %v625_v7 = vld [vmem:[%s4135_s3 + $0x7f8] sm:$0xff] }
  0xbe   : > { %2192 = vmatpush2.bf16.msra.mxu1 %v3013_v36  ;;  %v2831_v36 = vcombine.low %v421_v30, %v425_v31  ;;  %v497_v30 = vld [vmem:[%s4135_s3 + $0x3f8] sm:$0xff] }
  0xbf   : > { %2193 = vmatprep.subr.bf16.mxu1 %v3006_v38  ;;  %v2824_v38 = vcombine.high %v413_v25, %v417_v3  ;;  %v621_v31 = vld [vmem:[%s4135_s3 + $0x7d8] sm:$0xff] }
  0xc0   : > { %2141 = vmatpush2.bf16.msra.mxu0 %v2877_v47  ;;  %v537_v47 = vld [vmem:[%s4135_s3 + $0x538] sm:$0xff] }
  0xc1   : > { %2142 = vmatprep.subr.bf16.mxu0 %v2870_v49  ;;  %v2951_v49 = vcombine.low %v541_v1, %v545_v32  ;;  %v2944_v8 = vcombine.high %v533_v46, %v537_v47  ;;  %v617_v1 = vld [vmem:[%s4135_s3 + $0x7b8] sm:$0xff] }
  0xc2   : > { %2194 = vmatpush2.bf16.msra.mxu1 %v3005_v48  ;;  %v2823_v48 = vcombine.low %v413_v25, %v417_v3  ;;  %v489_v25 = vld [vmem:[%s4135_s3 + $0x3b8] sm:$0xff] }
  0xc3   : > { %2195 = vmatprep.subr.bf16.mxu1 %v2998_v50  ;;  %v2816_v50 = vcombine.high %v405_v41, %v409_v45  ;;  %v613_v3 = vld [vmem:[%s4135_s3 + $0x798] sm:$0xff] }
  0xc4   : > { %2143 = vmatpush2.bf16.msra.mxu0 %v2869_v56  ;;  %v529_v56 = vld [vmem:[%s4135_s3 + $0x4f8] sm:$0xff] }
  0xc5   : > { %2144 = vmatprep.subr.bf16.mxu0 %v2862_v2  ;;  %v2943_v2 = vcombine.low %v533_v46, %v537_v47  ;;  %v2936_v61 = vcombine.high %v525_v55, %v529_v56  ;;  %v609_v46 = vld [vmem:[%s4135_s3 + $0x778] sm:$0xff] }
  0xc6   : > { %2196 = vmatpush2.bf16.msra.mxu1 %v2997_v57  ;;  %v2815_v57 = vcombine.low %v405_v41, %v409_v45  ;;  %v481_v41 = vld [vmem:[%s4135_s3 + $0x378] sm:$0xff] }
  0xc7   : > { %2197 = vmatprep.subr.bf16.mxu1 %v2990_v58  ;;  %v2808_v58 = vcombine.high %v397_v53, %v401_v51  ;;  %v605_v45 = vld [vmem:[%s4135_s3 + $0x758] sm:$0xff] }
  0xc8   : > { %2145 = vmatpush2.bf16.msra.mxu0 %v2861_v4  ;;  %v521_v4 = vld [vmem:[%s4135_s3 + $0x4b8] sm:$0xff] }
  0xc9   : > { %2146 = vmatprep.subr.bf16.mxu0 %v2854_v11  ;;  %v2935_v11 = vcombine.low %v525_v55, %v529_v56  ;;  %v2928_v15 = vcombine.high %v517_v0, %v521_v4  ;;  %v601_v55 = vld [vmem:[%s4135_s3 + $0x738] sm:$0xff] }
  0xca   : > { %2198 = vmatpush2.bf16.msra.mxu1 %v2989_v5  ;;  %v2807_v5 = vcombine.low %v397_v53, %v401_v51  ;;  %v473_v53 = vld [vmem:[%s4135_s3 + $0x338] sm:$0xff] }
  0xcb   : > { %2199 = vmatprep.subr.bf16.mxu1 %v2982_v12  ;;  %v2800_v12 = vcombine.high %v389_v62, %v393_v63  ;;  %v597_v51 = vld [vmem:[%s4135_s3 + $0x718] sm:$0xff] }
  0xcc   : > { %2147 = vmatpush2.bf16.msra.mxu0 %v2853_v10  ;;  %v2927_v10 = vcombine.low %v517_v0, %v521_v4  ;;  %v465_v62 = vld [vmem:[%s4135_s3 + $0x2f8] sm:$0xff] }
  0xcd   : > { %2148 = vmatprep.subr.bf16.mxu0 %v2846_v19  ;;  %v589_v63 = vld [vmem:[%s4135_s3 + $0x6d8] sm:$0xff] }
  0xce   : > { %2200 = vmatpush2.bf16.msra.mxu1 %v2981_v18  ;;  %v593_v0 = vld [vmem:[%s4135_s3 + $0x6f8] sm:$0xff] }
  0xcf   : > { %2201 = vmatprep.subr.bf16.mxu1 %v2974_v20  ;;  %v373_v20 = vld [vmem:[%s4135_s3 + $0x18] sm:$0xff] }
  0xd0   : > { %2149 = vmatpush2.bf16.msra.mxu0 %v2845_v26  ;;  %v2783_v59 = vcombine.low %v373_v20, %v377_v21 }
  0xd1   : > { %2224 = vmatprep.subr.bf16.mxu0 %v2840_v28  ;;  %v2912_v28 = vcombine.high %v501_v22, %v505_v23 }
  0xd2   : > { %2202 = vmatpush2.bf16.msra.mxu1 %v2973_v27  ;;  %v2784_v27 = vcombine.high %v373_v20, %v377_v21  ;;  %v449_v20 = vld [vmem:[%s4135_s3 + $0x278] sm:$0xff] }
  0xd3   : > { %2277 = vmatprep.subr.bf16.mxu1 %v2968_v29  ;;  %2151 = vmatmul.mubr.bf16.vlgmr.msra.gmra.mxu0 %v3455_v34  ;;  %v493_v29 = vld [vmem:[%s4135_s3 + $0x3d8] sm:$0xff] }
  0xd4   : > { %2225 = vmatpush1.bf16.msra.mxu0 %v2839_v60  ;;  %2160 = vmatprep.mubr.bf16.mxu0 %v3475_v52  ;;  %v2911_v60 = vcombine.low %v501_v22, %v505_v23  ;;  %v2903_v32 = vcombine.low %v493_v29, %v497_v30  ;;  %v573_v21 = vld [vmem:[%s4135_s3 + $0x658] sm:$0xff] }
  0xd5   : > { %2204 = vmatmul.mubr.bf16.vlgmr.msra.gmra.mxu1 %v3471_v44  ;;  %2226 = vmatprep.subr.bf16.mxu0 %v2832_v35  ;;  %v3032_v35 = vcombine.high %v621_v31, %v625_v7  ;;  %v577_v22 = vld [vmem:[%s4135_s3 + $0x678] sm:$0xff] }
  0xd6   : > { %2278 = vmatpush1.bf16.msra.mxu1 %v2967_v33  ;;  %2213 = vmatprep.mubr.bf16.mxu1 %v3484_v54  ;;  %v2904_v33 = vcombine.high %v493_v29, %v497_v30  ;;  %v441_v29 = vld [vmem:[%s4135_s3 + $0x238] sm:$0xff] }
  0xd7   : > { %2279 = vmatprep.subr.bf16.mxu1 %v2960_v14  ;;  %v485_v14 = vld [vmem:[%s4135_s3 + $0x398] sm:$0xff] }
  0xd8   : > { %2227 = vmatpush1.bf16.msra.mxu0 %v2831_v36  ;;  %v3031_v36 = vcombine.low %v621_v31, %v625_v7  ;;  %v2895_v47 = vcombine.low %v485_v14, %v489_v25  ;;  %v565_v30 = vld [vmem:[%s4135_s3 + $0x618] sm:$0xff] }
  0xd9   : > { %2228 = vmatprep.subr.bf16.mxu0 %v2824_v38  ;;  %v3024_v38 = vcombine.high %v613_v3, %v617_v1  ;;  %v569_v31 = vld [vmem:[%s4135_s3 + $0x638] sm:$0xff] }
  0xda   : > { %2280 = vmatpush1.bf16.msra.mxu1 %v2959_v37  ;;  %v2896_v37 = vcombine.high %v485_v14, %v489_v25  ;;  %v2975_v14 = vcombine.low %v565_v30, %v569_v31 }
  0xdb   : > { %2281 = vmatprep.subr.bf16.mxu1 %v2952_v39  ;;  %2161 = vmatmul.mubr.bf16.gmra.mxu0 %v3501_v9  ;;  %v477_v39 = vld [vmem:[%s4135_s3 + $0x358] sm:$0xff] }
  0xdc   : > { %2229 = vmatpush1.bf16.msra.mxu0 %v2823_v48  ;;  %2256 = vmatprep.mubr.bf16.mxu0 %v3307_v40  ;;  %v381_v40 = vld [vmem:[%s4135_s3 + $0x58] sm:$0xff]  ;;  %v3023_v48 = vcombine.low %v613_v3, %v617_v1  ;;  %v2887_v56 = vcombine.low %v477_v39, %v481_v41 }
  0xdd   : > { %2214 = vmatmul.mubr.bf16.gmra.mxu1 %v3509_v13  ;;  %2230 = vmatprep.subr.bf16.mxu0 %v2816_v50  ;;  %v2792_v18 = vcombine.high %v381_v40, %v385_v6  ;;  %v2791_v24 = vcombine.low %v381_v40, %v385_v6  ;;  %v3016_v50 = vcombine.high %v605_v45, %v609_v46  ;;  %v457_v40 = vld [vmem:[%s4135_s3 + $0x2b8] sm:$0xff] }
  0xde   : > { %2282 = vmatpush1.bf16.msra.mxu1 %v2951_v49  ;;  %2309 = vmatprep.mubr.bf16.mxu1 %v3309_v42  ;;  %v509_v42 = vld [vmem:[%s4135_s3 + $0x458] sm:$0xff]  ;;  %v2888_v49 = vcombine.high %v477_v39, %v481_v41 }
  0xdf   : > { %2283 = vmatprep.subr.bf16.mxu1 %v2944_v8  ;;  %v2920_v19 = vcombine.high %v509_v42, %v513_v16  ;;  %v2919_v26 = vcombine.low %v509_v42, %v513_v16  ;;  %v469_v8 = vld [vmem:[%s4135_s3 + $0x318] sm:$0xff] }
  0xe0   : > { %2231 = vmatpush1.bf16.msra.mxu0 %v2815_v57  ;;  %v3015_v57 = vcombine.low %v605_v45, %v609_v46  ;;  %v2879_v4 = vcombine.low %v469_v8, %v473_v53  ;;  %v581_v6 = vld [vmem:[%s4135_s3 + $0x698] sm:$0xff] }
  0xe1   : > { %2232 = vmatprep.subr.bf16.mxu0 %v2808_v58  ;;  %v3008_v58 = vcombine.high %v597_v51, %v601_v55  ;;  %v585_v42 = vld [vmem:[%s4135_s3 + $0x6b8] sm:$0xff] }
  0xe2   : > { %2284 = vmatpush1.bf16.msra.mxu1 %v2943_v2  ;;  %v2880_v2 = vcombine.high %v469_v8, %v473_v53 }
  0xe3   : > { %2285 = vmatprep.subr.bf16.mxu1 %v2936_v61  ;;  %v461_v61 = vld [vmem:[%s4135_s3 + $0x2d8] sm:$0xff] }
  0xe4   : > { %2233 = vmatpush1.bf16.msra.mxu0 %v2807_v5  ;;  %v3007_v5 = vcombine.low %v597_v51, %v601_v55  ;;  %v2871_v16 = vcombine.low %v461_v61, %v465_v62 }
  0xe5   : > { %2234 = vmatprep.subr.bf16.mxu0 %v2800_v12  ;;  %v3000_v12 = vcombine.high %v589_v63, %v593_v0 }
  0xe6   : > { %2286 = vmatpush1.bf16.msra.mxu1 %v2935_v11  ;;  %v2872_v11 = vcombine.high %v461_v61, %v465_v62 }
  0xe7   : > { %2287 = vmatprep.subr.bf16.mxu1 %v2928_v15  ;;  %v453_v15 = vld [vmem:[%s4135_s3 + $0x298] sm:$0xff] }
  0xe8   : > { %2235 = vmatpush1.bf16.msra.mxu0 %v2799_v17  ;;  %v2999_v17 = vcombine.low %v589_v63, %v593_v0  ;;  %v2863_v23 = vcombine.low %v453_v15, %v457_v40 }
  0xe9   : > { %2236 = vmatprep.subr.bf16.mxu0 %v2792_v18  ;;  %v2992_v18 = vcombine.high %v581_v6, %v585_v42 }
  0xea   : > { %2288 = vmatpush1.bf16.msra.mxu1 %v2927_v10  ;;  %v2864_v10 = vcombine.high %v453_v15, %v457_v40 }
  0xeb   : > { %2289 = vmatprep.subr.bf16.mxu1 %v2920_v19  ;;  %v445_v19 = vld [vmem:[%s4135_s3 + $0x258] sm:$0xff] }
  0xec   : > { %2237 = vmatpush1.bf16.msra.mxu0 %v2791_v24  ;;  %v2991_v24 = vcombine.low %v581_v6, %v585_v42  ;;  %v2855_v7 = vcombine.low %v445_v19, %v449_v20 }
  0xed   : > { %2238 = vmatprep.subr.bf16.mxu0 %v2784_v27  ;;  %v2984_v27 = vcombine.high %v573_v21, %v577_v22 }
  0xee   : > { %2290 = vmatpush1.bf16.msra.mxu1 %v2919_v26  ;;  %v2856_v26 = vcombine.high %v445_v19, %v449_v20 }
  0xef   : > { %2291 = vmatprep.subr.bf16.mxu1 %v2912_v28  ;;  %v437_v28 = vld [vmem:[%s4135_s3 + $0x218] sm:$0xff] }
  0xf0   : > { %2239 = vmatpush1.bf16.msra.mxu0 %v2783_v59  ;;  %v2983_v59 = vcombine.low %v573_v21, %v577_v22 }
  0xf1   : > { %2240 = vmatprep.subr.bf16.mxu0 %v2904_v33  ;;  %v2976_v33 = vcombine.high %v565_v30, %v569_v31 }
  0xf2   : > { %2292 = vmatpush1.bf16.msra.mxu1 %v2911_v60  ;;  %v2848_v60 = vcombine.high %v437_v28, %v441_v29 }
  0xf3   : > { %2293 = vmatprep.subr.bf16.mxu1 %v3032_v35  ;;  %v2847_v35 = vcombine.low %v437_v28, %v441_v29 }
  0xf4   : > { %2241 = vmatpush2.bf16.msra.mxu0 %v2903_v32 }
  0xf5   : > { %2242 = vmatprep.subr.bf16.mxu0 %v2896_v37 }
  0xf6   : > { %2294 = vmatpush2.bf16.msra.mxu1 %v3031_v36 }
  0xf7   : > { %2295 = vmatprep.subr.bf16.mxu1 %v3024_v38 }
  0xf8   : > { %2243 = vmatpush2.bf16.msra.mxu0 %v2895_v47 }
  0xf9   : > { %2244 = vmatprep.subr.bf16.mxu0 %v2888_v49 }
  0xfa   : > { %2296 = vmatpush2.bf16.msra.mxu1 %v3023_v48 }
  0xfb   : > { %2297 = vmatprep.subr.bf16.mxu1 %v3016_v50 }
  0xfc   : > { %2245 = vmatpush2.bf16.msra.mxu0 %v2887_v56 }
  0xfd   : > { %2246 = vmatprep.subr.bf16.mxu0 %v2880_v2 }
  0xfe   : > { %2298 = vmatpush2.bf16.msra.mxu1 %v3015_v57 }
  0xff   : > { %2299 = vmatprep.subr.bf16.mxu1 %v3008_v58 }
 0x100   : > { %2247 = vmatpush2.bf16.msra.mxu0 %v2879_v4 }
 0x101   : > { %2248 = vmatprep.subr.bf16.mxu0 %v2872_v11 }
 0x102   : > { %2300 = vmatpush2.bf16.msra.mxu1 %v3007_v5 }
 0x103   : > { %2301 = vmatprep.subr.bf16.mxu1 %v3000_v12 }
 0x104   : > { %2249 = vmatpush2.bf16.msra.mxu0 %v2871_v16 }
 0x105   : > { %2250 = vmatprep.subr.bf16.mxu0 %v2864_v10 }
 0x106   : > { %2302 = vmatpush2.bf16.msra.mxu1 %v2999_v17 }
 0x107   : > { %2303 = vmatprep.subr.bf16.mxu1 %v2992_v18 }
 0x108   : > { %2251 = vmatpush2.bf16.msra.mxu0 %v2863_v23 }
 0x109   : > { %2252 = vmatprep.subr.bf16.mxu0 %v2856_v26 }
 0x10a   : > { %2304 = vmatpush2.bf16.msra.mxu1 %v2991_v24 }
 0x10b   : > { %2305 = vmatprep.subr.bf16.mxu1 %v2984_v27 }
 0x10c   : > { %2253 = vmatpush2.bf16.msra.mxu0 %v2855_v7 }
 0x10d   : > { %2254 = vmatprep.subr.bf16.mxu0 %v2848_v60 }
 0x10e   : > { %2306 = vmatpush2.bf16.msra.mxu1 %v2983_v59 }
 0x10f   : > { %2307 = vmatprep.subr.bf16.mxu1 %v2976_v33 }
 0x110   : > { %2255 = vmatpush2.bf16.msra.mxu0 %v2847_v35 }
 0x112   : > { %2308 = vmatpush2.bf16.msra.mxu1 %v2975_v14 }
 0x113   : > { %v1940_v25 = vpop.f32.mrf.mxu0  ;;  %2257 = vmatmul.mubr.bf16.vlgmr.msra.gmra.mxu0 %v3455_v34 }
 0x114   : > { %2266 = vmatprep.mubr.bf16.mxu0 %v3475_v52 }
 0x115   : > { %v1993_v3 = vpop.f32.mrf.mxu1  ;;  %2310 = vmatmul.mubr.bf16.vlgmr.msra.gmra.mxu1 %v3471_v44  ;;  %v1942_v32 = vpop.f32.mrf.mxu0 }
 0x116   : > { %v1994_v1 = vadd.f32 %v1993_v3, %v1940_v25  ;;  %2319 = vmatprep.mubr.bf16.mxu1 %v3484_v54 }
 0x117   : > { %v1995_v36 = vpop.f32.mrf.mxu1  ;;  %v1944_v38 = vpop.f32.mrf.mxu0 }
 0x118   : > { %v1996_v37 = vadd.f32 %v1995_v36, %v1942_v32  ;;  %v2514_v52 = vmul.f32 %v1994_v1, %v1994_v1 }
 0x119   : > { %v1997_v34 = vpop.f32.mrf.mxu1  ;;  %v1946_v44 = vpop.f32.mrf.mxu0 }
 0x11a   : > { %v3054_v39 = vpack.c.bf16 %v1996_v37, %v1994_v1  ;;  %v1998_v41 = vadd.f32 %v1997_v34, %v1944_v38  ;;  %v2515_v49 = vmul.f32 %v1996_v37, %v1996_v37 }
 0x11b   : > { %v1999_v45 = vpop.f32.mrf.mxu1  ;;  %v1950_v48 = vpop.f32.mrf.mxu0  ;;  %2267 = vmatmul.mubr.bf16.gmra.mxu0 %v3501_v9 }
 0x11c   : > { %2426 = vst [vmem:[%s4067_s14] sm:$0xff] %v3054_v39  ;;  %v2442_v46 = vadd.f32 %v1998_v41, %v1994_v1  ;;  %v2522_v47 = vmul.f32 %v1998_v41, %v1998_v41  ;;  %v2000_v54 = vadd.f32 %v1999_v45, %v1946_v44 }
 0x11d   : > { %v2003_v50 = vpop.f32.mrf.mxu1  ;;  %2320 = vmatmul.mubr.bf16.gmra.mxu1 %v3509_v13  ;;  %v1952_v56 = vpop.f32.mrf.mxu0 }
 0x11e   : > { %v2546_v8 = vadd.f32 %v2522_v47, %v2514_v52  ;;  %v3058_v53 = vpack.c.bf16 %v2000_v54, %v1998_v41  ;;  %v2451_v51 = vadd.f32 %v2000_v54, %v1996_v37  ;;  %v2523_v55 = vmul.f32 %v2000_v54, %v2000_v54 }
 0x11f   : > { %v2004_v57 = vadd.f32 %v2003_v50, %v1950_v48  ;;  %v2005_v2 = vpop.f32.mrf.mxu1  ;;  %v1954_v62 = vpop.f32.mrf.mxu0 }
 0x120   : > { %2430 = vst [vmem:[%s4067_s14 + $0x20] sm:$0xff] %v3058_v53  ;;  %v2555_v58 = vadd.f32 %v2523_v55, %v2515_v49  ;;  %v2006_v61 = vadd.f32 %v2005_v2, %v1952_v56 }
 0x121   : > { %v2443_v63 = vadd.f32 %v2442_v46, %v2004_v57  ;;  %v2530_v0 = vmul.f32 %v2004_v57, %v2004_v57  ;;  %v2007_v4 = vpop.f32.mrf.mxu1  ;;  %v1956_v13 = vpop.f32.mrf.mxu0 }
 0x122   : > { %v3062_v9 = vpack.c.bf16 %v2006_v61, %v2004_v57  ;;  %v2452_v5 = vadd.f32 %v2451_v51, %v2006_v61  ;;  %v2531_v11 = vmul.f32 %v2006_v61, %v2006_v61  ;;  %v2008_v12 = vadd.f32 %v2007_v4, %v1954_v62 }
 0x123   : > { %v2547_v15 = vadd.f32 %v2546_v8, %v2530_v0  ;;  %v2009_v40 = vpop.f32.mrf.mxu1 }
 0x124   : > { %2434 = vst [vmem:[%s4067_s14 + $0x40] sm:$0xff] %v3062_v9  ;;  %v2556_v6 = vadd.f32 %v2555_v58, %v2531_v11  ;;  %v2444_v42 = vadd.f32 %v2443_v63, %v2008_v12  ;;  %v2538_v16 = vmul.f32 %v2008_v12, %v2008_v12  ;;  %v2010_v17 = vadd.f32 %v2009_v40, %v1956_v13 }
 0x126   : > { %v2445_v10 = vrot.slane %v2444_v42, 4  ;;  %v2548_v18 = vadd.f32 %v2547_v15, %v2538_v16  ;;  %v3066_v19 = vpack.c.bf16 %v2010_v17, %v2008_v12  ;;  %v2453_v20 = vadd.f32 %v2452_v5, %v2010_v17 }
 0x127   : > { %v2539_v21 = vmul.f32 %v2010_v17, %v2010_v17 }
 0x128   : > { %v2446_v22 = vadd.f32 %v2445_v10, %v2444_v42  ;;  %v2549_v23 = vrot.slane %v2548_v18, 4  ;;  %2438 = vst [vmem:[%s4067_s14 + $0x60] sm:$0xff] %v3066_v19  ;;  %v2454_v24 = vrot.slane %v2453_v20, 4 }
 0x129   : > { %v2557_v26 = vadd.f32 %v2556_v6, %v2539_v21 }
 0x12a   : > { %v2447_v27 = vrot.slane %v2446_v22, 2  ;;  %v2550_v28 = vadd.f32 %v2549_v23, %v2548_v18  ;;  %v2455_v29 = vadd.f32 %v2454_v24, %v2453_v20 }
 0x12b   : > { %v2558_v30 = vrot.slane %v2557_v26, 4 }
 0x12c   : > { %v2448_v31 = vadd.f32 %v2447_v27, %v2446_v22  ;;  %v2551_v7 = vrot.slane %v2550_v28, 2  ;;  %v2456_v59 = vrot.slane %v2455_v29, 2 }
 0x12d   : > { %v2559_v60 = vadd.f32 %v2558_v30, %v2557_v26 }
 0x12e   : > { %v2449_v33 = vrot.slane %v2448_v31, 1  ;;  %v2552_v35 = vadd.f32 %v2551_v7, %v2550_v28  ;;  %v2457_v14 = vadd.f32 %v2456_v59, %v2455_v29 }
 0x12f   : > { %v2560_v25 = vrot.slane %v2559_v60, 2 }
 0x130   : > { %v2553_v3 = vrot.slane %v2552_v35, 1  ;;  %v2458_v1 = vrot.slane %v2457_v14, 1  ;;  %v2450_v36 = vadd.f32 %v2449_v33, %v2448_v31 }
 0x131   : > { %v2561_v32 = vadd.f32 %v2560_v25, %v2559_v60 }
 0x132   : > { %v2554_v37 = vadd.f32 %v2553_v3, %v2552_v35  ;;  %v2459_v39 = vadd.f32 %v2458_v1, %v2457_v14 }
 0x133   : > { %v2562_v38 = vrot.slane %v2561_v32, 1 }
 0x134   : > { %v4076_v34 = vsel %vm2618_vm0, %v2450_v36, %v2554_v37 }
 0x135   : > { %v2563_v41 = vadd.f32 %v2562_v38, %v2561_v32 }
 0x137   : > { %v4079_v44 = vsel %vm2618_vm0, %v2459_v39, %v2563_v41 }
 0x138   : > { %v2635_v45 = vcombine.low %v4076_v34, %v4079_v44 }
 0x153   : > { %v2046_v52 = vpop.f32.mrf.mxu0 }
 0x155   : > { %v2099_v46 = vpop.f32.mrf.mxu1  ;;  %v2048_v54 = vpop.f32.mrf.mxu0 }
 0x156   : > { %v2100_v47 = vadd.f32 %v2099_v46, %v2046_v52  ;;  %v3087_v52 = vmov 1983009808  }
 0x157   : > { %v2101_v48 = vpop.f32.mrf.mxu1  ;;  %v2050_v50 = vpop.f32.mrf.mxu0  ;;  %v2638_v46 = vunpack.c.l.s4 %v3087_v52 }
 0x158   : > { %v2102_v49 = vadd.f32 %v2101_v48, %v2048_v54  ;;  %v2516_v9 = vmul.f32 %v2100_v47, %v2100_v47 }
 0x159   : > { %v2103_v8 = vpop.f32.mrf.mxu1  ;;  %v2052_v55 = vpop.f32.mrf.mxu0 }
 0x15a   : > { %v3055_v53 = vpack.c.bf16 %v2102_v49, %v2100_v47  ;;  %v2104_v51 = vadd.f32 %v2103_v8, %v2050_v50  ;;  %v2517_v19 = vmul.f32 %v2102_v49, %v2102_v49 }
 0x15b   : > { %v2105_v56 = vpop.f32.mrf.mxu1  ;;  %v2056_v2 = vpop.f32.mrf.mxu0 }
 0x15c   : > { %2427 = vst [vmem:[%s4067_s14 + $0x8] sm:$0xff] %v3055_v53  ;;  %v2106_v57 = vadd.f32 %v2105_v56, %v2052_v55  ;;  %v2524_v61 = vmul.f32 %v2104_v51, %v2104_v51  ;;  %v2460_v5 = vadd.f32 %v2104_v51, %v2100_v47 }
 0x15d   : > { %v2109_v58 = vpop.f32.mrf.mxu1  ;;  %v2058_v63 = vpop.f32.mrf.mxu0 }
 0x15e   : > { %v3059_v62 = vpack.c.bf16 %v2106_v57, %v2104_v51  ;;  %v2110_v0 = vadd.f32 %v2109_v58, %v2056_v2  ;;  %v2469_v13 = vadd.f32 %v2106_v57, %v2102_v49  ;;  %v2525_v15 = vmul.f32 %v2106_v57, %v2106_v57 }
 0x15f   : > { %v2111_v4 = vpop.f32.mrf.mxu1  ;;  %v2060_v12 = vpop.f32.mrf.mxu0  ;;  %v2564_v42 = vadd.f32 %v2524_v61, %v2516_v9  ;;  %v2639_v51 = vunpack.c.0.s8 %v2638_v46 }
 0x160   : > { %2431 = vst [vmem:[%s4067_s14 + $0x28] sm:$0xff] %v3059_v62  ;;  %v2112_v11 = vadd.f32 %v2111_v4, %v2058_v63  ;;  %v2532_v40 = vmul.f32 %v2110_v0, %v2110_v0  ;;  %v2461_v16 = vadd.f32 %v2460_v5, %v2110_v0  ;;  %v2573_v28 = vadd.f32 %v2525_v15, %v2517_v19 }
 0x161   : > { %v2113_v6 = vpop.f32.mrf.mxu1  ;;  %v2062_v18 = vpop.f32.mrf.mxu0  ;;  %v4090_v61 = vsub.s32 %v2639_v51, %v3204_v43 }
 0x162   : > { %v3063_v17 = vpack.c.bf16 %v2112_v11, %v2110_v0  ;;  %v2114_v10 = vadd.f32 %v2113_v6, %v2060_v12  ;;  %v2470_v20 = vadd.f32 %v2469_v13, %v2112_v11  ;;  %v2533_v21 = vmul.f32 %v2112_v11, %v2112_v11 }
 0x163   : > { %v2115_v22 = vpop.f32.mrf.mxu1  ;;  %v2565_v23 = vadd.f32 %v2564_v42, %v2532_v40  ;;  %v2643_v4 = vrot.slane %v2635_v45, %v4090_v61 }
 0x164   : > { %2435 = vst [vmem:[%s4067_s14 + $0x48] sm:$0xff] %v3063_v17  ;;  %v2462_v24 = vadd.f32 %v2461_v16, %v2114_v10  ;;  %v2540_v26 = vmul.f32 %v2114_v10, %v2114_v10  ;;  %v2116_v27 = vadd.f32 %v2115_v22, %v2062_v18  ;;  %v2574_v59 = vadd.f32 %v2573_v28, %v2533_v21 }
 0x166   : > { %v2463_v29 = vrot.slane %v2462_v24, 4  ;;  %v2566_v30 = vadd.f32 %v2565_v23, %v2540_v26  ;;  %v3067_v31 = vpack.c.bf16 %v2116_v27, %v2114_v10  ;;  %v2471_v7 = vadd.f32 %v2470_v20, %v2116_v27 }
 0x167   : > { %v2541_v60 = vmul.f32 %v2116_v27, %v2116_v27 }
 0x168   : > { %v2464_v33 = vadd.f32 %v2463_v29, %v2462_v24  ;;  %v2567_v35 = vrot.slane %v2566_v30, 4  ;;  %2439 = vst [vmem:[%s4067_s14 + $0x68] sm:$0xff] %v3067_v31  ;;  %v2472_v14 = vrot.slane %v2471_v7, 4 }
 0x169   : > { %v2575_v25 = vadd.f32 %v2574_v59, %v2541_v60 }
 0x16a   : > { %v2465_v3 = vrot.slane %v2464_v33, 2  ;;  %v2568_v1 = vadd.f32 %v2567_v35, %v2566_v30  ;;  %v2473_v32 = vadd.f32 %v2472_v14, %v2471_v7 }
 0x16b   : > { %v2576_v36 = vrot.slane %v2575_v25, 4 }
 0x16c   : > { %v2569_v37 = vrot.slane %v2568_v1, 2  ;;  %v2474_v38 = vrot.slane %v2473_v32, 2  ;;  %v2466_v39 = vadd.f32 %v2465_v3, %v2464_v33 }
 0x16d   : > { %v2577_v41 = vadd.f32 %v2576_v36, %v2575_v25 }
 0x16e   : > { %v2570_v47 = vadd.f32 %v2569_v37, %v2568_v1  ;;  %v2475_v54 = vadd.f32 %v2474_v38, %v2473_v32  ;;  %v2467_v50 = vrot.slane %v2466_v39, 1 }
 0x16f   : > { %v2578_v48 = vrot.slane %v2577_v41, 2 }
 0x170   : > { %v2571_v49 = vrot.slane %v2570_v47, 1  ;;  %v2476_v8 = vrot.slane %v2475_v54, 1  ;;  %v2468_v57 = vadd.f32 %v2467_v50, %v2466_v39 }
 0x171   : > { %v2579_v53 = vadd.f32 %v2578_v48, %v2577_v41 }
 0x172   : > { %v2572_v55 = vadd.f32 %v2571_v49, %v2570_v47  ;;  %v2477_v2 = vadd.f32 %v2476_v8, %v2475_v54 }
 0x173   : > { %v2580_v56 = vrot.slane %v2579_v53, 1 }
 0x174   : > { %v2621_v62 = vsel %vm2618_vm0, %v2468_v57, %v2572_v55 }
 0x175   : > { %v2581_v58 = vadd.f32 %v2580_v56, %v2579_v53 }
 0x177   : > { %v2622_v63 = vsel %vm2618_vm0, %v2477_v2, %v2581_v58 }
 0x178   : > { %v2636_v0 = vcombine.low %v2621_v62, %v2622_v63 }
 0x17a   : > { %v2650_v9 = vrot.slane %v2636_v0, %v4090_v61 }
 0x17c   : > { %v2651_v43 = vcombine.low %v2643_v4, %v2650_v9 }
 0x17e   : > { %2671 = vst [vmem:[%s4102_s17] sm:$0xff] %v2651_v43 }
 0x193   : > { %v2152_v5 = vpop.f32.mrf.mxu0 }
 0x195   : > { %v2205_v11 = vpop.f32.mrf.mxu1  ;;  %v2154_v13 = vpop.f32.mrf.mxu0 }
 0x196   : > { %v2206_v12 = vadd.f32 %v2205_v11, %v2152_v5 }
 0x197   : > { %v2207_v15 = vpop.f32.mrf.mxu1  ;;  %v2156_v6 = vpop.f32.mrf.mxu0 }
 0x198   : > { %v2208_v40 = vadd.f32 %v2207_v15, %v2154_v13  ;;  %v2518_v17 = vmul.f32 %v2206_v12, %v2206_v12 }
 0x199   : > { %v2209_v34 = vpop.f32.mrf.mxu1  ;;  %v2158_v42 = vpop.f32.mrf.mxu0 }
 0x19a   : > { %v3056_v44 = vpack.c.bf16 %v2208_v40, %v2206_v12  ;;  %v2210_v45 = vadd.f32 %v2209_v34, %v2156_v6  ;;  %v2519_v21 = vmul.f32 %v2208_v40, %v2208_v40 }
 0x19b   : > { %v2211_v16 = vpop.f32.mrf.mxu1  ;;  %v2162_v20 = vpop.f32.mrf.mxu0 }
 0x19c   : > { %2428 = vst [vmem:[%s4067_s14 + $0x10] sm:$0xff] %v3056_v44  ;;  %v2478_v10 = vadd.f32 %v2210_v45, %v2206_v12  ;;  %v2526_v18 = vmul.f32 %v2210_v45, %v2210_v45  ;;  %v2212_v19 = vadd.f32 %v2211_v16, %v2158_v42 }
 0x19d   : > { %v2215_v22 = vpop.f32.mrf.mxu1  ;;  %v2164_v28 = vpop.f32.mrf.mxu0 }
 0x19e   : > { %v2582_v23 = vadd.f32 %v2526_v18, %v2518_v17  ;;  %v3060_v24 = vpack.c.bf16 %v2212_v19, %v2210_v45  ;;  %v2487_v26 = vadd.f32 %v2212_v19, %v2208_v40  ;;  %v2527_v27 = vmul.f32 %v2212_v19, %v2212_v19 }
 0x19f   : > { %v2216_v29 = vadd.f32 %v2215_v22, %v2162_v20  ;;  %v2217_v30 = vpop.f32.mrf.mxu1  ;;  %v2166_v59 = vpop.f32.mrf.mxu0 }
 0x1a0   : > { %2432 = vst [vmem:[%s4067_s14 + $0x30] sm:$0xff] %v3060_v24  ;;  %v2591_v31 = vadd.f32 %v2527_v27, %v2519_v21  ;;  %v2218_v7 = vadd.f32 %v2217_v30, %v2164_v28 }
 0x1a1   : > { %v2479_v60 = vadd.f32 %v2478_v10, %v2216_v29  ;;  %v2534_v33 = vmul.f32 %v2216_v29, %v2216_v29  ;;  %v2219_v35 = vpop.f32.mrf.mxu1  ;;  %v2168_v32 = vpop.f32.mrf.mxu0 }
 0x1a2   : > { %v3064_v14 = vpack.c.bf16 %v2218_v7, %v2216_v29  ;;  %v2488_v25 = vadd.f32 %v2487_v26, %v2218_v7  ;;  %v2535_v3 = vmul.f32 %v2218_v7, %v2218_v7  ;;  %v2220_v1 = vadd.f32 %v2219_v35, %v2166_v59 }
 0x1a3   : > { %v2583_v36 = vadd.f32 %v2582_v23, %v2534_v33  ;;  %v2221_v37 = vpop.f32.mrf.mxu1 }
 0x1a4   : > { %2436 = vst [vmem:[%s4067_s14 + $0x50] sm:$0xff] %v3064_v14  ;;  %v2592_v38 = vadd.f32 %v2591_v31, %v2535_v3  ;;  %v2480_v39 = vadd.f32 %v2479_v60, %v2220_v1  ;;  %v2542_v41 = vmul.f32 %v2220_v1, %v2220_v1  ;;  %v2222_v52 = vadd.f32 %v2221_v37, %v2168_v32 }
 0x1a6   : > { %v2481_v46 = vrot.slane %v2480_v39, 4  ;;  %v2584_v47 = vadd.f32 %v2583_v36, %v2542_v41  ;;  %v3068_v54 = vpack.c.bf16 %v2222_v52, %v2220_v1  ;;  %v2489_v48 = vadd.f32 %v2488_v25, %v2222_v52 }
 0x1a7   : > { %v2543_v49 = vmul.f32 %v2222_v52, %v2222_v52 }
 0x1a8   : > { %v2482_v50 = vadd.f32 %v2481_v46, %v2480_v39  ;;  %v2585_v8 = vrot.slane %v2584_v47, 4  ;;  %2440 = vst [vmem:[%s4067_s14 + $0x70] sm:$0xff] %v3068_v54  ;;  %v2490_v53 = vrot.slane %v2489_v48, 4 }
 0x1a9   : > { %v2593_v51 = vadd.f32 %v2592_v38, %v2543_v49 }
 0x1aa   : > { %v2483_v55 = vrot.slane %v2482_v50, 2  ;;  %v2586_v56 = vadd.f32 %v2585_v8, %v2584_v47  ;;  %v2491_v57 = vadd.f32 %v2490_v53, %v2489_v48 }
 0x1ab   : > { %v2594_v2 = vrot.slane %v2593_v51, 4 }
 0x1ac   : > { %v2484_v58 = vadd.f32 %v2483_v55, %v2482_v50  ;;  %v2587_v62 = vrot.slane %v2586_v56, 2  ;;  %v2492_v63 = vrot.slane %v2491_v57, 2 }
 0x1ad   : > { %v2595_v0 = vadd.f32 %v2594_v2, %v2593_v51 }
 0x1ae   : > { %v2485_v4 = vrot.slane %v2484_v58, 1  ;;  %v2588_v9 = vadd.f32 %v2587_v62, %v2586_v56  ;;  %v2493_v43 = vadd.f32 %v2492_v63, %v2491_v57 }
 0x1af   : > { %v2596_v5 = vrot.slane %v2595_v0, 2 }
 0x1b0   : > { %v2589_v11 = vrot.slane %v2588_v9, 1  ;;  %v2494_v12 = vrot.slane %v2493_v43, 1  ;;  %v2486_v15 = vadd.f32 %v2485_v4, %v2484_v58 }
 0x1b1   : > { %v2597_v13 = vadd.f32 %v2596_v5, %v2595_v0 }
 0x1b2   : > { %v2590_v40 = vadd.f32 %v2589_v11, %v2588_v9  ;;  %v2495_v44 = vadd.f32 %v2494_v12, %v2493_v43 }
 0x1b3   : > { %v2598_v6 = vrot.slane %v2597_v13, 1 }
 0x1b4   : > { %v4110_v34 = vsel %vm2618_vm0, %v2486_v15, %v2590_v40 }
 0x1b5   : > { %v2599_v45 = vadd.f32 %v2598_v6, %v2597_v13 }
 0x1b7   : > { %v4113_v42 = vsel %vm2618_vm0, %v2495_v44, %v2599_v45 }
 0x1b8   : > { %v2652_v16 = vcombine.low %v4110_v34, %v4113_v42 }
 0x1d3   : > { %v2258_v17 = vpop.f32.mrf.mxu0 }
 0x1d5   : > { %v2311_v10 = vpop.f32.mrf.mxu1  ;;  %v2260_v18 = vpop.f32.mrf.mxu0 }
 0x1d6   : > { %v2312_v20 = vadd.f32 %v2311_v10, %v2258_v17 }
 0x1d7   : > { %v2313_v19 = vpop.f32.mrf.mxu1  ;;  %v2262_v22 = vpop.f32.mrf.mxu0 }
 0x1d8   : > { %v2314_v21 = vadd.f32 %v2313_v19, %v2260_v18  ;;  %v2520_v14 = vmul.f32 %v2312_v20, %v2312_v20 }
 0x1d9   : > { %v2315_v23 = vpop.f32.mrf.mxu1  ;;  %v2264_v27 = vpop.f32.mrf.mxu0 }
 0x1da   : > { %v3057_v24 = vpack.c.bf16 %v2314_v21, %v2312_v20  ;;  %v2316_v26 = vadd.f32 %v2315_v23, %v2262_v22  ;;  %v2521_v54 = vmul.f32 %v2314_v21, %v2314_v21 }
 0x1db   : > { %v2317_v28 = vpop.f32.mrf.mxu1  ;;  %v2268_v30 = vpop.f32.mrf.mxu0 }
 0x1dc   : > { %2429 = vst [vmem:[%s4067_s14 + $0x18] sm:$0xff] %v3057_v24  ;;  %v2318_v29 = vadd.f32 %v2317_v28, %v2264_v27  ;;  %v2528_v7 = vmul.f32 %v2316_v26, %v2316_v26  ;;  %v2496_v25 = vadd.f32 %v2316_v26, %v2312_v20 }
 0x1dd   : > { %v2321_v31 = vpop.f32.mrf.mxu1  ;;  %v2270_v60 = vpop.f32.mrf.mxu0 }
 0x1de   : > { %v3061_v59 = vpack.c.bf16 %v2318_v29, %v2316_v26  ;;  %v2322_v33 = vadd.f32 %v2321_v31, %v2268_v30  ;;  %v2505_v32 = vadd.f32 %v2318_v29, %v2314_v21  ;;  %v2529_v36 = vmul.f32 %v2318_v29, %v2318_v29 }
 0x1df   : > { %v2323_v35 = vpop.f32.mrf.mxu1  ;;  %v2272_v1 = vpop.f32.mrf.mxu0  ;;  %v2600_v39 = vadd.f32 %v2528_v7, %v2520_v14  ;;  %v2660_v7 = vrot.slane %v2652_v16, %v4090_v61 }
 0x1e0   : > { %2433 = vst [vmem:[%s4067_s14 + $0x38] sm:$0xff] %v3061_v59  ;;  %v2324_v3 = vadd.f32 %v2323_v35, %v2270_v60  ;;  %v2536_v37 = vmul.f32 %v2322_v33, %v2322_v33  ;;  %v2497_v41 = vadd.f32 %v2496_v25, %v2322_v33  ;;  %v2609_v56 = vadd.f32 %v2529_v36, %v2521_v54 }
 0x1e1   : > { %v2325_v38 = vpop.f32.mrf.mxu1  ;;  %v2274_v47 = vpop.f32.mrf.mxu0 }
 0x1e2   : > { %v3065_v52 = vpack.c.bf16 %v2324_v3, %v2322_v33  ;;  %v2326_v46 = vadd.f32 %v2325_v38, %v2272_v1  ;;  %v2506_v48 = vadd.f32 %v2505_v32, %v2324_v3  ;;  %v2537_v49 = vmul.f32 %v2324_v3, %v2324_v3 }
 0x1e3   : > { %v2327_v50 = vpop.f32.mrf.mxu1  ;;  %v2601_v8 = vadd.f32 %v2600_v39, %v2536_v37 }
 0x1e4   : > { %2437 = vst [vmem:[%s4067_s14 + $0x58] sm:$0xff] %v3065_v52  ;;  %v2498_v53 = vadd.f32 %v2497_v41, %v2326_v46  ;;  %v2544_v51 = vmul.f32 %v2326_v46, %v2326_v46  ;;  %v2328_v55 = vadd.f32 %v2327_v50, %v2274_v47  ;;  %v2610_v63 = vadd.f32 %v2609_v56, %v2537_v49 }
 0x1e6   : > { %v2499_v57 = vrot.slane %v2498_v53, 4  ;;  %v2602_v2 = vadd.f32 %v2601_v8, %v2544_v51  ;;  %v3069_v58 = vpack.c.bf16 %v2328_v55, %v2326_v46  ;;  %v2507_v62 = vadd.f32 %v2506_v48, %v2328_v55 }
 0x1e7   : > { %v2545_v0 = vmul.f32 %v2328_v55, %v2328_v55 }
 0x1e8   : > { %v2500_v4 = vadd.f32 %v2499_v57, %v2498_v53  ;;  %v2603_v9 = vrot.slane %v2602_v2, 4  ;;  %2441 = vst [vmem:[%s4067_s14 + $0x78] sm:$0xff] %v3069_v58  ;;  %v2508_v43 = vrot.slane %v2507_v62, 4 }
 0x1e9   : > { %v2611_v5 = vadd.f32 %v2610_v63, %v2545_v0 }
 0x1ea   : > { %v2501_v11 = vrot.slane %v2500_v4, 2  ;;  %v2604_v12 = vadd.f32 %v2603_v9, %v2602_v2  ;;  %v2509_v13 = vadd.f32 %v2508_v43, %v2507_v62 }
 0x1eb   : > { %v2612_v15 = vrot.slane %v2611_v5, 4 }
 0x1ec   : > { %v2605_v40 = vrot.slane %v2604_v12, 2  ;;  %v2510_v6 = vrot.slane %v2509_v13, 2  ;;  %v2502_v44 = vadd.f32 %v2501_v11, %v2500_v4 }
 0x1ed   : > { %v2613_v45 = vadd.f32 %v2612_v15, %v2611_v5 }
 0x1ee   : > { %v2606_v17 = vadd.f32 %v2605_v40, %v2604_v12  ;;  %v2511_v10 = vadd.f32 %v2510_v6, %v2509_v13  ;;  %v2503_v20 = vrot.slane %v2502_v44, 1 }
 0x1ef   : > { %v2614_v18 = vrot.slane %v2613_v45, 2 }
 0x1f0   : > { %v2607_v19 = vrot.slane %v2606_v17, 1  ;;  %v2512_v21 = vrot.slane %v2511_v10, 1  ;;  %v2504_v26 = vadd.f32 %v2503_v20, %v2502_v44 }
 0x1f1   : > { %v2615_v22 = vadd.f32 %v2614_v18, %v2613_v45 }
 0x1f2   : > { %v2608_v23 = vadd.f32 %v2607_v19, %v2606_v17  ;;  %v2513_v27 = vadd.f32 %v2512_v21, %v2511_v10 }
 0x1f3   : > { %v2616_v24 = vrot.slane %v2615_v22, 1 }
 0x1f4   : > { %v2625_v29 = vsel %vm2618_vm0, %v2504_v26, %v2608_v23 }
 0x1f5   : > { %v2617_v28 = vadd.f32 %v2616_v24, %v2615_v22 }
 0x1f7   : > { %v2626_v30 = vsel %vm2618_vm0, %v2513_v27, %v2617_v28 }
 0x1f8   : > { %v2653_v31 = vcombine.low %v2625_v29, %v2626_v30 }
 0x1fa   : > { %v2667_v59 = vrot.slane %v2653_v31, %v4090_v61 }
 0x1fc   : > { %v2668_v60 = vcombine.low %v2660_v7, %v2667_v59 }
 0x1fe   : > { %2672 = vst [vmem:[%s4102_s17 + $0x8] sm:$0xff] %v2668_v60 }
 0x1ff PF: > { %s16_s18 = sadd.s32 1, %s3085_s18  }
 0x200   : > { %p13_p5 = scmp.ge.s32.totalorder %s16_s18, 4  }
 0x202   :  { %15 = sbr.rel (!%p13_p5) target bundleno = 1 (0x1), region = 78 }

// kernel: pointnet2_forward.7
= control target key start
LH: loop header
LB: loop body
LE: loop exit
PB: predicated region body
PF: predicated region fallthrough
CT: control target
= control target key end

     0   :  { %12 = vsyncpa [#allocation3], 0  ;;  %s1621_s0 = inlined_call_operand.vmem [shape: bf16[64,1024], index: 0, kind: input, shape index: {}]   ;;  %s1622_s1 = inlined_call_operand.vmem [shape: f32[1,1024], index: 1, kind: input, shape index: {}]   ;;  %s1623_s2 = inlined_call_operand.vmem [shape: f32[1,1024], index: 2, kind: input, shape index: {}]   ;;  %s1624_s3 = inlined_call_operand.vmem [shape: f32[1,1024], index: 3, kind: input, shape index: {}]   ;;  %s1625_s4 = inlined_call_operand.vmem [shape: f32[1,1024], index: 4, kind: input, shape index: {}]   ;;  %s1626_s5 = inlined_call_operand.hbm [shape: f32[2,1024], index: 5, kind: output, shape index: {0}]   ;;  %s1627_s6 = inlined_call_operand.hbm [shape: f32[2,1024], index: 6, kind: output, shape index: {1}]  }
   0x1   :  { %13 = vsyncpa [#allocation5], 0  ;;  %s1332_s21 = smov 0  }
   0x2 LB: > { %s1338_s22 = sadd.s32 4294967295, %s1290_s21   ;;  %p1169_p0 = scmp.ge.s32.totalorder %s1290_s21, 1  ;;  %s1290_s21 = sphi %s1332_s21, %s19_s21  }
   0x3   : > { %p209_p1 = scmp.lt.s32.totalorder %s1290_s21, 3 }
   0x5   : > { %p210_p2 = pnand %p1169_p0, %p209_p1 }
   0x7   : > { %213 = sbr.rel (%p210_p2) target bundleno = 213 (0xd5), region = 40 }
   0xc   : > { %s1170_s23 = sshll.u32 %s1338_s22, 2  ;;  %p1173_p4 = scmp.ne.s32.totalorder %s1338_s22, 0 }
   0xd   : > { %p236_p3 = scmp.lt.s32.totalorder %s1170_s23, 7 }
   0xe   : > { %245 = sbr.rel (%p1173_p4) target bundleno = 21 (0x15), region = 44 }
   0xf   : > { %s1655_s23 = smov (!%p236_p3, %s1170_s23), 7 }
  0x10   : > { %s1183_s24 = sshll.u32 %s1655_s23, 5 }
  0x11   : > { %s1346_s27 = scalar_lea.vmem %s1621_s0, %s1183_s24 }
  0x13   : > { %v1292_v0 = vmov 0.0  }
  0x14   : > { %246 = vst [vmem:[#allocation2] sm:$0xff] %v1292_v0  ;;  %247 = vst [vmem:[#allocation2 + $0x8] sm:$0xff] %v1292_v0 }
  0x15 PF: > { %v1350_v1 = vld [vmem:[%s1346_s27] sm:$0xff]  ;;  %v1353_v2 = vld [vmem:[%s1346_s27 + $0x8] sm:$0xff]  ;;  %v1356_v3 = vld [vmem:[%s1346_s27 + $0x10] sm:$0xff]  ;;  %v298_v10 = vlaneseq  ;;  %v1293_v52 = vmov 1966171168   ;;  %s606_s8 = sshra.s32 %s1338_s22, 1 }
  0x16   : > { %v1359_v4 = vld [vmem:[%s1346_s27 + $0x18] sm:$0xff]  ;;  %v1362_v5 = vld [vmem:[%s1346_s27 + $0x20] sm:$0xff]  ;;  %v1365_v6 = vld [vmem:[%s1346_s27 + $0x28] sm:$0xff]  ;;  %v264_v8 = vunpack.c.l.bf16 %v1350_v1  ;;  %v265_v9 = vunpack.c.h.bf16 %v1350_v1  ;;  %v266_v13 = vunpack.c.l.bf16 %v1353_v2  ;;  %v267_v14 = vunpack.c.h.bf16 %v1353_v2  ;;  %s609_s9 = sand.u32 1, %s1338_s22  ;;  %s1184_s10 = sshll.u32 %s606_s8, 4 }
  0x17   : > { %v1368_v7 = vld [vmem:[%s1346_s27 + $0x30] sm:$0xff]  ;;  %v1373_v11 = vld [vmem:[%s1346_s27 + $0x38] sm:$0xff]  ;;  %v1376_v12 = vld [vmem:[%s1346_s27 + $0x40] sm:$0xff]  ;;  %v268_v15 = vunpack.c.l.bf16 %v1356_v3  ;;  %v269_v16 = vunpack.c.h.bf16 %v1356_v3  ;;  %v270_v19 = vunpack.c.l.bf16 %v1359_v4  ;;  %v271_v20 = vunpack.c.h.bf16 %v1359_v4  ;;  %s612_s11 = sadd.s32 %s1184_s10, %s609_s9  ;;  %p1176_p5 = scmp.ne.s32.totalorder %s1338_s22, 1 }
  0x18   : > { %v1383_v17 = vld [vmem:[%s1346_s27 + $0x48] sm:$0xff]  ;;  %v1386_v18 = vld [vmem:[%s1346_s27 + $0x50] sm:$0xff]  ;;  %v272_v21 = vunpack.c.l.bf16 %v1362_v5  ;;  %v273_v22 = vunpack.c.h.bf16 %v1362_v5  ;;  %v1393_v23 = vld [vmem:[%s1346_s27 + $0x58] sm:$0xff]  ;;  %v274_v25 = vunpack.c.l.bf16 %v1365_v6  ;;  %v275_v26 = vunpack.c.h.bf16 %v1365_v6  ;;  %s613_s12 = scalar_lea.vmem [#allocation4], %s612_s11 }
  0x19   : > { %v1396_v24 = vld [vmem:[%s1346_s27 + $0x60] sm:$0xff]  ;;  %v276_v27 = vunpack.c.l.bf16 %v1368_v7  ;;  %v277_v28 = vunpack.c.h.bf16 %v1368_v7  ;;  %v1403_v29 = vld [vmem:[%s1346_s27 + $0x68] sm:$0xff]  ;;  %v1406_v30 = vld [vmem:[%s1346_s27 + $0x70] sm:$0xff]  ;;  %v278_v31 = vunpack.c.l.bf16 %v1373_v11  ;;  %v279_v32 = vunpack.c.h.bf16 %v1373_v11 }
  0x1a   : > { %v280_v33 = vunpack.c.l.bf16 %v1376_v12  ;;  %v281_v34 = vunpack.c.h.bf16 %v1376_v12  ;;  %v1413_v35 = vld [vmem:[%s1346_s27 + $0x78] sm:$0xff]  ;;  %v282_v36 = vunpack.c.l.bf16 %v1383_v17  ;;  %v283_v37 = vunpack.c.h.bf16 %v1383_v17  ;;  %v296_v51 = vld [vmem:[%s1622_s1] sm:$0xff] }
  0x1b   : > { %v284_v38 = vunpack.c.l.bf16 %v1386_v18  ;;  %v285_v39 = vunpack.c.h.bf16 %v1386_v18  ;;  %v286_v40 = vunpack.c.l.bf16 %v1393_v23  ;;  %v287_v41 = vunpack.c.h.bf16 %v1393_v23 }
  0x1c   : > { %v288_v42 = vunpack.c.l.bf16 %v1396_v24  ;;  %v289_v43 = vunpack.c.h.bf16 %v1396_v24  ;;  %v290_v44 = vunpack.c.l.bf16 %v1403_v29  ;;  %v291_v45 = vunpack.c.h.bf16 %v1403_v29 }
  0x1d   : > { %v292_v46 = vunpack.c.l.bf16 %v1406_v30  ;;  %v1426_v47 = vshrl.u32 %v298_v10, 7  ;;  %v293_v48 = vunpack.c.h.bf16 %v1406_v30  ;;  %v294_v49 = vunpack.c.l.bf16 %v1413_v35 }
  0x1e   : > { %v295_v50 = vunpack.c.h.bf16 %v1413_v35  ;;  %v1434_v53 = vunpack.c.l.s4 %v1293_v52 }
  0x1f   : > { %1637 = vst [vmem:[#allocation8_spill] sm:$0xff] %v1426_v47  ;;  %v1437_v54 = vsub.s32 0, %v1426_v47  ;;  %v1440_v55 = vsub.s32 1, %v1426_v47  ;;  %v1443_v56 = vsub.s32 2, %v1426_v47  ;;  %v1446_v57 = vsub.s32 3, %v1426_v47 }
  0x20   : > { %1638 = vst [vmem:[#allocation9_spill] sm:$0xff] %v1434_v53  ;;  %v1449_v58 = vsub.s32 4, %v1426_v47  ;;  %v1452_v59 = vsub.s32 5, %v1426_v47  ;;  %v1455_v60 = vsub.s32 6, %v1426_v47  ;;  %v1458_v61 = vsub.s32 7, %v1426_v47 }
  0x21   : > { %1639 = vst [vmem:[#allocation10_spill] sm:$0xff] %v1446_v57  ;;  %v301_v62 = vrot.slane %v296_v51, %v1437_v54  ;;  %v305_v63 = vrot.slane %v296_v51, %v1440_v55  ;;  %v309_v0 = vrot.slane %v296_v51, %v1443_v56  ;;  %v313_v1 = vrot.slane %v296_v51, %v1446_v57 }
  0x22   : > { %1640 = vst [vmem:[#allocation11_spill] sm:$0xff] %v1449_v58  ;;  %1641 = vst [vmem:[#allocation12_spill] sm:$0xff] %v1452_v59  ;;  %v317_v2 = vrot.slane %v296_v51, %v1449_v58  ;;  %v321_v3 = vrot.slane %v296_v51, %v1452_v59  ;;  %v325_v4 = vrot.slane %v296_v51, %v1455_v60 }
  0x23   : > { %1642 = vst [vmem:[#allocation13_spill] sm:$0xff] %v1455_v60  ;;  %v329_v5 = vrot.slane %v296_v51, %v1458_v61  ;;  %v338_v6 = vmul.f32 %v301_v62, %v264_v8  ;;  %v339_v7 = vmul.f32 %v305_v63, %v265_v9  ;;  %v340_v10 = vmul.f32 %v309_v0, %v266_v13 }
  0x24   : > { %v341_v11 = vmul.f32 %v313_v1, %v267_v14  ;;  %v342_v12 = vmul.f32 %v317_v2, %v268_v15  ;;  %v343_v17 = vmul.f32 %v321_v3, %v269_v16  ;;  %v344_v18 = vmul.f32 %v325_v4, %v270_v19  ;;  %v370_v15 = vld [vmem:[%s1623_s2] sm:$0xff] }
  0x25   : > { %v345_v23 = vmul.f32 %v329_v5, %v271_v20  ;;  %v346_v24 = vmul.f32 %v301_v62, %v272_v21  ;;  %v347_v29 = vmul.f32 %v305_v63, %v273_v22  ;;  %v348_v30 = vmul.f32 %v309_v0, %v274_v25 }
  0x26   : > { %v349_v35 = vmul.f32 %v313_v1, %v275_v26  ;;  %v350_v52 = vmul.f32 %v317_v2, %v276_v27  ;;  %v351_v47 = vmul.f32 %v321_v3, %v277_v28  ;;  %v352_v53 = vmul.f32 %v325_v4, %v278_v31 }
  0x27   : > { %v353_v59 = vmul.f32 %v329_v5, %v279_v32  ;;  %v354_v58 = vmul.f32 %v301_v62, %v280_v33  ;;  %v355_v60 = vmul.f32 %v305_v63, %v281_v34  ;;  %v356_v57 = vmul.f32 %v309_v0, %v282_v36 }
  0x28   : > { %v357_v51 = vmul.f32 %v313_v1, %v283_v37  ;;  %v358_v8 = vmul.f32 %v317_v2, %v284_v38  ;;  %v359_v9 = vmul.f32 %v321_v3, %v285_v39  ;;  %v360_v13 = vmul.f32 %v325_v4, %v286_v40  ;;  %v1643_v33 = vld [vmem:[#allocation10_spill] sm:$0xff] }
  0x29   : > { %v361_v14 = vmul.f32 %v329_v5, %v287_v41  ;;  %v362_v16 = vmul.f32 %v301_v62, %v288_v42  ;;  %v363_v19 = vmul.f32 %v305_v63, %v289_v43  ;;  %v364_v20 = vmul.f32 %v309_v0, %v290_v44  ;;  %v1644_v36 = vld [vmem:[#allocation11_spill] sm:$0xff]  ;;  %v1645_v38 = vld [vmem:[#allocation12_spill] sm:$0xff] }
  0x2a   : > { %v365_v21 = vmul.f32 %v313_v1, %v291_v45  ;;  %v366_v22 = vmul.f32 %v317_v2, %v292_v46  ;;  %v367_v25 = vmul.f32 %v321_v3, %v293_v48  ;;  %v368_v26 = vmul.f32 %v325_v4, %v294_v49  ;;  %v1646_v40 = vld [vmem:[#allocation13_spill] sm:$0xff] }
  0x2b   : > { %v369_v27 = vmul.f32 %v329_v5, %v295_v50  ;;  %v375_v28 = vrot.slane %v370_v15, %v1437_v54  ;;  %v379_v31 = vrot.slane %v370_v15, %v1440_v55  ;;  %v383_v32 = vrot.slane %v370_v15, %v1443_v56 }
  0x2c   : > { %v387_v34 = vrot.slane %v370_v15, %v1643_v33  ;;  %v391_v37 = vrot.slane %v370_v15, %v1644_v36  ;;  %v395_v39 = vrot.slane %v370_v15, %v1645_v38  ;;  %v399_v41 = vrot.slane %v370_v15, %v1646_v40 }
  0x2d   : > { %v403_v42 = vrot.slane %v370_v15, %v1458_v61  ;;  %v1479_v43 = vadd.f32 %v375_v28, %v338_v6  ;;  %v1481_v44 = vadd.f32 %v379_v31, %v339_v7  ;;  %v1483_v45 = vadd.f32 %v383_v32, %v340_v10 }
  0x2e   : > { %v1485_v46 = vadd.f32 %v387_v34, %v341_v11  ;;  %v1487_v48 = vadd.f32 %v391_v37, %v342_v12  ;;  %v1489_v49 = vadd.f32 %v395_v39, %v343_v17  ;;  %v1491_v50 = vadd.f32 %v399_v41, %v344_v18 }
  0x2f   : > { %v1493_v62 = vadd.f32 %v403_v42, %v345_v23  ;;  %v420_v63 = vadd.f32 %v375_v28, %v346_v24  ;;  %v421_v0 = vadd.f32 %v379_v31, %v347_v29  ;;  %v422_v1 = vadd.f32 %v383_v32, %v348_v30 }
  0x30   : > { %v423_v2 = vadd.f32 %v387_v34, %v349_v35  ;;  %v424_v3 = vadd.f32 %v391_v37, %v350_v52  ;;  %v425_v4 = vadd.f32 %v395_v39, %v351_v47  ;;  %v426_v5 = vadd.f32 %v399_v41, %v352_v53 }
  0x31   : > { %v427_v6 = vadd.f32 %v403_v42, %v353_v59  ;;  %v428_v7 = vadd.f32 %v375_v28, %v354_v58  ;;  %v429_v10 = vadd.f32 %v379_v31, %v355_v60  ;;  %v430_v11 = vadd.f32 %v383_v32, %v356_v57 }
  0x32   : > { %v431_v15 = vadd.f32 %v387_v34, %v357_v51  ;;  %v432_v12 = vadd.f32 %v391_v37, %v358_v8  ;;  %v433_v33 = vadd.f32 %v395_v39, %v359_v9  ;;  %v434_v17 = vadd.f32 %v399_v41, %v360_v13 }
  0x33   : > { %v435_v36 = vadd.f32 %v403_v42, %v361_v14  ;;  %v436_v18 = vadd.f32 %v375_v28, %v362_v16  ;;  %v437_v38 = vadd.f32 %v379_v31, %v363_v19  ;;  %v438_v23 = vadd.f32 %v383_v32, %v364_v20 }
  0x34   : > { %v439_v40 = vadd.f32 %v387_v34, %v365_v21  ;;  %v440_v24 = vadd.f32 %v391_v37, %v366_v22  ;;  %v441_v29 = vadd.f32 %v395_v39, %v367_v25  ;;  %v442_v30 = vadd.f32 %v399_v41, %v368_v26 }
  0x35   : > { %v443_v35 = vadd.f32 %v403_v42, %v369_v27  ;;  %v444_v47 = vmax.f32 %v1479_v43, 0.0  ;;  %v445_v53 = vmax.f32 %v1481_v44, 0.0  ;;  %v446_v58 = vmax.f32 %v1483_v45, 0.0 }
  0x36   : > { %v447_v57 = vmax.f32 %v1485_v46, 0.0  ;;  %v448_v59 = vmax.f32 %v1487_v48, 0.0  ;;  %v449_v60 = vmax.f32 %v1489_v49, 0.0  ;;  %v450_v52 = vmax.f32 %v1491_v50, 0.0 }
  0x37   : > { %v451_v51 = vmax.f32 %v1493_v62, 0.0  ;;  %v452_v8 = vmax.f32 %v420_v63, 0.0  ;;  %v453_v9 = vmax.f32 %v421_v0, 0.0  ;;  %v454_v13 = vmax.f32 %v422_v1, 0.0 }
  0x38   : > { %v455_v14 = vmax.f32 %v423_v2, 0.0  ;;  %v456_v16 = vmax.f32 %v424_v3, 0.0  ;;  %v457_v19 = vmax.f32 %v425_v4, 0.0  ;;  %v458_v20 = vmax.f32 %v426_v5, 0.0 }
  0x39   : > { %v459_v21 = vmax.f32 %v427_v6, 0.0  ;;  %v460_v22 = vmax.f32 %v428_v7, 0.0  ;;  %v461_v25 = vmax.f32 %v429_v10, 0.0  ;;  %v462_v26 = vmax.f32 %v430_v11, 0.0 }
  0x3a   : > { %v463_v27 = vmax.f32 %v431_v15, 0.0  ;;  %v464_v28 = vmax.f32 %v432_v12, 0.0  ;;  %v465_v31 = vmax.f32 %v433_v33, 0.0  ;;  %v466_v32 = vmax.f32 %v434_v17, 0.0 }
  0x3b   : > { %v467_v34 = vmax.f32 %v435_v36, 0.0  ;;  %v468_v37 = vmax.f32 %v436_v18, 0.0  ;;  %v469_v39 = vmax.f32 %v437_v38, 0.0  ;;  %v470_v41 = vmax.f32 %v438_v23, 0.0 }
  0x3c   : > { %v471_v42 = vmax.f32 %v439_v40, 0.0  ;;  %v472_v43 = vmax.f32 %v440_v24, 0.0  ;;  %v473_v44 = vmax.f32 %v441_v29, 0.0  ;;  %v474_v45 = vmax.f32 %v442_v30, 0.0 }
  0x3d   : > { %v475_v46 = vmax.f32 %v443_v35, 0.0  ;;  %v476_v48 = vmax.f32 %v444_v47, %v452_v8  ;;  %v485_v49 = vmax.f32 %v445_v53, %v453_v9  ;;  %v494_v50 = vmax.f32 %v446_v58, %v454_v13 }
  0x3e   : > { %v503_v62 = vmax.f32 %v447_v57, %v455_v14  ;;  %v512_v63 = vmax.f32 %v448_v59, %v456_v16  ;;  %v521_v0 = vmax.f32 %v449_v60, %v457_v19  ;;  %v530_v1 = vmax.f32 %v450_v52, %v458_v20 }
  0x3f   : > { %v539_v2 = vmax.f32 %v451_v51, %v459_v21  ;;  %v477_v3 = vmax.f32 %v476_v48, %v460_v22  ;;  %v486_v4 = vmax.f32 %v485_v49, %v461_v25  ;;  %v495_v5 = vmax.f32 %v494_v50, %v462_v26 }
  0x40   : > { %v504_v6 = vmax.f32 %v503_v62, %v463_v27  ;;  %v513_v7 = vmax.f32 %v512_v63, %v464_v28  ;;  %v522_v10 = vmax.f32 %v521_v0, %v465_v31  ;;  %v531_v11 = vmax.f32 %v530_v1, %v466_v32 }
  0x41   : > { %v540_v15 = vmax.f32 %v539_v2, %v467_v34  ;;  %v478_v12 = vmax.f32 %v477_v3, %v468_v37  ;;  %v487_v33 = vmax.f32 %v486_v4, %v469_v39  ;;  %v496_v17 = vmax.f32 %v495_v5, %v470_v41 }
  0x42   : > { %v505_v36 = vmax.f32 %v504_v6, %v471_v42  ;;  %v514_v18 = vmax.f32 %v513_v7, %v472_v43  ;;  %v523_v38 = vmax.f32 %v522_v10, %v473_v44  ;;  %v532_v23 = vmax.f32 %v531_v11, %v474_v45  ;;  %v1647_v11 = vld [vmem:[#allocation9_spill] sm:$0xff] }
  0x43   : > { %v541_v40 = vmax.f32 %v540_v15, %v475_v46  ;;  %v479_v24 = vrot.slane %v478_v12, 4  ;;  %v488_v29 = vrot.slane %v487_v33, 4  ;;  %v497_v30 = vrot.slane %v496_v17, 4 }
  0x44   : > { %v506_v35 = vrot.slane %v505_v36, 4  ;;  %v515_v47 = vrot.slane %v514_v18, 4  ;;  %v524_v53 = vrot.slane %v523_v38, 4  ;;  %v533_v58 = vrot.slane %v532_v23, 4 }
  0x45   : > { %v542_v57 = vrot.slane %v541_v40, 4  ;;  %v480_v59 = vmax.f32 %v478_v12, %v479_v24  ;;  %v489_v60 = vmax.f32 %v487_v33, %v488_v29  ;;  %v498_v52 = vmax.f32 %v496_v17, %v497_v30  ;;  %v1648_v17 = vld [vmem:[#allocation8_spill] sm:$0xff] }
  0x46   : > { %v507_v51 = vmax.f32 %v505_v36, %v506_v35  ;;  %v516_v8 = vmax.f32 %v514_v18, %v515_v47  ;;  %v525_v9 = vmax.f32 %v523_v38, %v524_v53  ;;  %v534_v13 = vmax.f32 %v532_v23, %v533_v58 }
  0x47   : > { %v543_v14 = vmax.f32 %v541_v40, %v542_v57  ;;  %v481_v16 = vrot.slane %v480_v59, 2  ;;  %v490_v19 = vrot.slane %v489_v60, 2  ;;  %v499_v20 = vrot.slane %v498_v52, 2 }
  0x48   : > { %v508_v21 = vrot.slane %v507_v51, 2  ;;  %v517_v22 = vrot.slane %v516_v8, 2  ;;  %v526_v25 = vrot.slane %v525_v9, 2  ;;  %v535_v26 = vrot.slane %v534_v13, 2 }
  0x49   : > { %v544_v27 = vrot.slane %v543_v14, 2  ;;  %v482_v28 = vmax.f32 %v480_v59, %v481_v16  ;;  %v491_v31 = vmax.f32 %v489_v60, %v490_v19  ;;  %v500_v32 = vmax.f32 %v498_v52, %v499_v20 }
  0x4a   : > { %v509_v34 = vmax.f32 %v507_v51, %v508_v21  ;;  %v518_v37 = vmax.f32 %v516_v8, %v517_v22  ;;  %v527_v39 = vmax.f32 %v525_v9, %v526_v25  ;;  %v536_v41 = vmax.f32 %v534_v13, %v535_v26 }
  0x4b   : > { %v545_v42 = vmax.f32 %v543_v14, %v544_v27  ;;  %v483_v43 = vrot.slane %v482_v28, 1  ;;  %v492_v44 = vrot.slane %v491_v31, 1  ;;  %v501_v45 = vrot.slane %v500_v32, 1 }
  0x4c   : > { %v510_v46 = vrot.slane %v509_v34, 1  ;;  %v519_v48 = vrot.slane %v518_v37, 1  ;;  %v528_v49 = vrot.slane %v527_v39, 1  ;;  %v537_v50 = vrot.slane %v536_v41, 1 }
  0x4d   : > { %v546_v62 = vrot.slane %v545_v42, 1  ;;  %v484_v63 = vmax.f32 %v482_v28, %v483_v43  ;;  %v493_v0 = vmax.f32 %v491_v31, %v492_v44  ;;  %v502_v1 = vmax.f32 %v500_v32, %v501_v45 }
  0x4e   : > { %v511_v2 = vmax.f32 %v509_v34, %v510_v46  ;;  %v520_v3 = vmax.f32 %v518_v37, %v519_v48  ;;  %v529_v4 = vmax.f32 %v527_v39, %v528_v49  ;;  %v538_v5 = vmax.f32 %v536_v41, %v537_v50 }
  0x4f   : > { %v547_v6 = vmax.f32 %v545_v42, %v546_v62  ;;  %v556_v7 = vcombine.low %v484_v63, %v493_v0  ;;  %v562_v15 = vunpack.c.0.s8 %v1647_v11 }
  0x50   : > { %v557_v10 = vcombine.low %v502_v1, %v511_v2  ;;  %v558_v12 = vcombine.low %v520_v3, %v529_v4 }
  0x51   : > { %v559_v33 = vcombine.low %v538_v5, %v547_v6  ;;  %v565_v36 = vsub.s32 %v562_v15, %v1648_v17 }
  0x53   : > { %v566_v18 = vrot.slane %v556_v7, %v565_v36  ;;  %v573_v38 = vrot.slane %v557_v10, %v565_v36  ;;  %v580_v23 = vrot.slane %v558_v12, %v565_v36  ;;  %v587_v40 = vrot.slane %v559_v33, %v565_v36 }
  0x55   : > { %v588_v24 = vcombine.low %v566_v18, %v573_v38  ;;  %v589_v29 = vcombine.low %v580_v23, %v587_v40 }
  0x57   : > { %v596_v30 = vrot.slane %v588_v24, %v565_v36  ;;  %v603_v35 = vrot.slane %v589_v29, %v565_v36  ;;  %618 = sbr.rel (%p1176_p5) target bundleno = 185 (0xb9), region = 48 }
  0x59   : > { %v604_v47 = vcombine.low %v596_v30, %v603_v35 }
  0x5b   : > { %614 = vst [vmem:[%s613_s12] ss:$2 sm:$0xff] %v604_v47 }
  0x5c   : > { %v1294_v57 = vmov 1983009808   ;;  %v1649_v8 = vld [vmem:[#allocation8_spill] sm:$0xff]  ;;  %vm665_vm0 = vcmask 1041408  }
  0x5d   : > { %v625_v59 = vunpack.c.l.s4 %v1294_v57 }
  0x5f   : > { %v626_v52 = vunpack.c.0.s8 %v625_v59 }
  0x61   : > { %v1517_v9 = vsub.s32 %v626_v52, %v1649_v8 }
  0x62   : > { %v1508_v53 = vld [vmem:[#allocation4] sm:$0xff]  ;;  %v1510_v58 = vld [vmem:[#allocation4 + $0x8] sm:$0xff] }
  0x63   : > { %v623_v60 = vcombine.high %v1508_v53, %v1508_v53  ;;  %v640_v51 = vcombine.high %v1510_v58, %v1510_v58  ;;  %v630_v13 = vrot.slane %v1508_v53, %v1517_v9  ;;  %v647_v16 = vrot.slane %v1510_v58, %v1517_v9 }
  0x65   : > { %v637_v14 = vrot.slane %v623_v60, %v1517_v9  ;;  %v654_v19 = vrot.slane %v640_v51, %v1517_v9  ;;  %v638_v20 = vcombine.high %v630_v13, %v630_v13  ;;  %v655_v22 = vcombine.high %v647_v16, %v647_v16 }
  0x66   : > { %v666_v26 = vsel %vm665_vm0, %v630_v13, 0.0  ;;  %v694_v28 = vsel %vm665_vm0, %v647_v16, 0.0 }
  0x67   : > { %v639_v21 = vcombine.high %v637_v14, %v637_v14  ;;  %v656_v25 = vcombine.high %v654_v19, %v654_v19  ;;  %v680_v27 = vsel %vm665_vm0, %v637_v14, 0.0  ;;  %v708_v31 = vsel %vm665_vm0, %v654_v19, 0.0 }
  0x68   : > { %v667_v32 = vrot.slane %v666_v26, 4  ;;  %v673_v34 = vsel %vm665_vm0, %v638_v20, 0.0  ;;  %v681_v37 = vrot.slane %v680_v27, 4  ;;  %v695_v43 = vrot.slane %v694_v28, 4 }
  0x69   : > { %v687_v39 = vsel %vm665_vm0, %v639_v21, 0.0  ;;  %v674_v41 = vrot.slane %v673_v34, 4  ;;  %v701_v44 = vsel %vm665_vm0, %v655_v22, 0.0  ;;  %v709_v49 = vrot.slane %v708_v31, 4 }
  0x6a   : > { %v688_v42 = vrot.slane %v687_v39, 4  ;;  %v668_v45 = vadd.f32 %v667_v32, %v666_v26  ;;  %v682_v46 = vadd.f32 %v681_v37, %v680_v27  ;;  %v702_v48 = vrot.slane %v701_v44, 4 }
  0x6b   : > { %v675_v50 = vadd.f32 %v674_v41, %v673_v34  ;;  %v696_v63 = vadd.f32 %v695_v43, %v694_v28  ;;  %v715_v0 = vsel %vm665_vm0, %v656_v25, 0.0  ;;  %v710_v4 = vadd.f32 %v709_v49, %v708_v31 }
  0x6c   : > { %v689_v62 = vadd.f32 %v688_v42, %v687_v39  ;;  %v669_v1 = vrot.slane %v668_v45, 2  ;;  %v683_v2 = vrot.slane %v682_v46, 2  ;;  %v703_v3 = vadd.f32 %v702_v48, %v701_v44 }
  0x6d   : > { %v676_v5 = vrot.slane %v675_v50, 2  ;;  %v697_v7 = vrot.slane %v696_v63, 2  ;;  %v716_v10 = vrot.slane %v715_v0, 4  ;;  %v711_v33 = vrot.slane %v710_v4, 2 }
  0x6e   : > { %v690_v6 = vrot.slane %v689_v62, 2  ;;  %v670_v11 = vadd.f32 %v669_v1, %v668_v45  ;;  %v684_v15 = vadd.f32 %v683_v2, %v682_v46  ;;  %v704_v12 = vrot.slane %v703_v3, 2 }
  0x6f   : > { %v677_v17 = vadd.f32 %v676_v5, %v675_v50  ;;  %v698_v18 = vadd.f32 %v697_v7, %v696_v63  ;;  %v717_v38 = vadd.f32 %v716_v10, %v715_v0  ;;  %v712_v29 = vadd.f32 %v711_v33, %v710_v4 }
  0x70   : > { %v691_v36 = vadd.f32 %v690_v6, %v689_v62  ;;  %v671_v23 = vrot.slane %v670_v11, 1  ;;  %v685_v40 = vrot.slane %v684_v15, 1  ;;  %v705_v24 = vadd.f32 %v704_v12, %v703_v3 }
  0x71   : > { %v678_v30 = vrot.slane %v677_v17, 1  ;;  %v699_v47 = vrot.slane %v698_v18, 1  ;;  %v718_v57 = vrot.slane %v717_v38, 2  ;;  %v713_v51 = vrot.slane %v712_v29, 1 }
  0x72   : > { %v692_v35 = vrot.slane %v691_v36, 1  ;;  %v672_v59 = vadd.f32 %v671_v23, %v670_v11  ;;  %v686_v60 = vadd.f32 %v685_v40, %v684_v15  ;;  %v706_v52 = vrot.slane %v705_v24, 1 }
  0x73   : > { %v679_v8 = vadd.f32 %v678_v30, %v677_v17  ;;  %v700_v14 = vadd.f32 %v699_v47, %v698_v18  ;;  %v719_v16 = vadd.f32 %v718_v57, %v717_v38  ;;  %v714_v20 = vadd.f32 %v713_v51, %v712_v29 }
  0x74   : > { %v693_v13 = vadd.f32 %v692_v35, %v691_v36  ;;  %v707_v19 = vadd.f32 %v706_v52, %v705_v24  ;;  %v723_v21 = vmul.f32 0.5, %v672_v59  ;;  %v725_v22 = vmul.f32 0.5, %v686_v60 }
  0x75   : > { %v720_v25 = vrot.slane %v719_v16, 1  ;;  %v724_v26 = vmul.f32 0.5, %v679_v8  ;;  %v727_v28 = vmul.f32 0.5, %v700_v14  ;;  %v729_v34 = vmul.f32 0.5, %v714_v20 }
  0x76   : > { %v726_v27 = vmul.f32 0.5, %v693_v13  ;;  %v728_v31 = vmul.f32 0.5, %v707_v19 }
  0x77   : > { %v721_v32 = vadd.f32 %v720_v25, %v719_v16  ;;  %v739_v37 = vcombine.low %v723_v21, %v724_v26 }
  0x78   : > { %v740_v39 = vcombine.low %v725_v22, %v726_v27  ;;  %v756_v41 = vcombine.low %v727_v28, %v728_v31 }
  0x79   : > { %v730_v42 = vmul.f32 0.5, %v721_v32  ;;  %v747_v43 = vrot.slane %v739_v37, %v1517_v9 }
  0x7a   : > { %v754_v44 = vrot.slane %v740_v39, %v1517_v9  ;;  %v764_v48 = vrot.slane %v756_v41, %v1517_v9 }
  0x7b   : > { %v757_v46 = vcombine.low %v729_v34, %v730_v42 }
  0x7c   : > { %v755_v45 = vcombine.low %v747_v43, %v754_v44 }
  0x7d   : > { %v771_v49 = vrot.slane %v757_v46, %v1517_v9 }
  0x7e   : > { %v1538_v50 = vsub.f32 %v1508_v53, %v755_v45 }
  0x7f   : > { %v772_v62 = vcombine.low %v764_v48, %v771_v49 }
  0x80   : > { %v777_v63 = vmul.f32 %v1538_v50, %v1538_v50 }
  0x81   : > { %v1543_v0 = vsub.f32 %v1510_v58, %v772_v62 }
  0x82   : > { %v781_v1 = vcombine.high %v777_v63, %v777_v63  ;;  %v788_v2 = vrot.slane %v777_v63, %v1517_v9 }
  0x83   : > { %v778_v3 = vmul.f32 %v1543_v0, %v1543_v0 }
  0x84   : > { %v795_v4 = vrot.slane %v781_v1, %v1517_v9  ;;  %v796_v5 = vcombine.high %v788_v2, %v788_v2  ;;  %v823_v6 = vsel %vm665_vm0, %v788_v2, 0.0 }
  0x85   : > { %v824_v53 = vrot.slane %v823_v6, 4  ;;  %v798_v10 = vcombine.high %v778_v3, %v778_v3  ;;  %v805_v11 = vrot.slane %v778_v3, %v1517_v9 }
  0x86   : > { %v797_v7 = vcombine.high %v795_v4, %v795_v4  ;;  %v830_v15 = vsel %vm665_vm0, %v796_v5, 0.0  ;;  %v837_v33 = vsel %vm665_vm0, %v795_v4, 0.0 }
  0x87   : > { %v825_v58 = vadd.f32 %v824_v53, %v823_v6  ;;  %v831_v12 = vrot.slane %v830_v15, 4  ;;  %v812_v17 = vrot.slane %v798_v10, %v1517_v9  ;;  %v813_v36 = vcombine.high %v805_v11, %v805_v11 }
  0x88   : > { %v838_v18 = vrot.slane %v837_v33, 4  ;;  %v844_v38 = vsel %vm665_vm0, %v797_v7, 0.0  ;;  %v851_v29 = vsel %vm665_vm0, %v805_v11, 0.0 }
  0x89   : > { %v826_v23 = vrot.slane %v825_v58, 2  ;;  %v832_v40 = vadd.f32 %v831_v12, %v830_v15  ;;  %v845_v24 = vrot.slane %v844_v38, 4  ;;  %v814_v30 = vcombine.high %v812_v17, %v812_v17 }
  0x8a   : > { %v839_v35 = vadd.f32 %v838_v18, %v837_v33  ;;  %v852_v47 = vrot.slane %v851_v29, 4  ;;  %v858_v57 = vsel %vm665_vm0, %v813_v36, 0.0  ;;  %v865_v14 = vsel %vm665_vm0, %v812_v17, 0.0 }
  0x8b   : > { %v827_v59 = vadd.f32 %v826_v23, %v825_v58  ;;  %v833_v60 = vrot.slane %v832_v40, 2  ;;  %v846_v52 = vadd.f32 %v845_v24, %v844_v38  ;;  %v859_v51 = vrot.slane %v858_v57, 4 }
  0x8c   : > { %v840_v8 = vrot.slane %v839_v35, 2  ;;  %v853_v13 = vadd.f32 %v852_v47, %v851_v29  ;;  %v872_v16 = vsel %vm665_vm0, %v814_v30, 0.0  ;;  %v866_v27 = vrot.slane %v865_v14, 4  ;;  %v949_v47 = vld [vmem:[%s1624_s3] sm:$0xff] }
  0x8d   : > { %v828_v19 = vrot.slane %v827_v59, 1  ;;  %v834_v20 = vadd.f32 %v833_v60, %v832_v40  ;;  %v847_v21 = vrot.slane %v846_v52, 2  ;;  %v860_v22 = vadd.f32 %v859_v51, %v858_v57  ;;  %v1021_v51 = vld [vmem:[%s1625_s4] sm:$0xff] }
  0x8e   : > { %v841_v25 = vadd.f32 %v840_v8, %v839_v35  ;;  %v854_v26 = vrot.slane %v853_v13, 2  ;;  %v873_v28 = vrot.slane %v872_v16, 4  ;;  %v867_v42 = vadd.f32 %v866_v27, %v865_v14 }
  0x8f   : > { %v829_v31 = vadd.f32 %v828_v19, %v827_v59  ;;  %v835_v32 = vrot.slane %v834_v20, 1  ;;  %v848_v34 = vadd.f32 %v847_v21, %v846_v52  ;;  %v861_v37 = vrot.slane %v860_v22, 2 }
  0x90   : > { %v842_v39 = vrot.slane %v841_v25, 1  ;;  %v855_v41 = vadd.f32 %v854_v26, %v853_v13  ;;  %v874_v43 = vadd.f32 %v873_v28, %v872_v16  ;;  %v868_v63 = vrot.slane %v867_v42, 2  ;;  %v1650_v13 = vld [vmem:[#allocation10_spill] sm:$0xff]  ;;  %v1651_v28 = vld [vmem:[#allocation11_spill] sm:$0xff] }
  0x91   : > { %v836_v44 = vadd.f32 %v835_v32, %v834_v20  ;;  %v849_v45 = vrot.slane %v848_v34, 1  ;;  %v862_v46 = vadd.f32 %v861_v37, %v860_v22  ;;  %v879_v48 = vmul.f32 0.5, %v829_v31  ;;  %v1652_v32 = vld [vmem:[#allocation12_spill] sm:$0xff]  ;;  %v1653_v37 = vld [vmem:[#allocation13_spill] sm:$0xff] }
  0x92   : > { %v843_v49 = vadd.f32 %v842_v39, %v841_v25  ;;  %v856_v62 = vrot.slane %v855_v41, 1  ;;  %v875_v1 = vrot.slane %v874_v43, 2  ;;  %v869_v53 = vadd.f32 %v868_v63, %v867_v42 }
  0x93   : > { %v850_v2 = vadd.f32 %v849_v45, %v848_v34  ;;  %v863_v3 = vrot.slane %v862_v46, 1  ;;  %v880_v4 = vmul.f32 0.5, %v836_v44  ;;  %v887_v5 = vadd.f32 1e-05, %v879_v48 }
  0x94   : > { %v857_v6 = vadd.f32 %v856_v62, %v855_v41  ;;  %v876_v7 = vadd.f32 %v875_v1, %v874_v43  ;;  %v881_v10 = vmul.f32 0.5, %v843_v49  ;;  %v870_v12 = vrot.slane %v869_v53, 1 }
  0x95   : > { %v864_v11 = vadd.f32 %v863_v3, %v862_v46  ;;  %v882_v15 = vmul.f32 0.5, %v850_v2  ;;  %v888_v58 = vadd.f32 1e-05, %v880_v4  ;;  %1212 = vrsqrt.f32 %v887_v5 }
  0x96   : > { %v877_v33 = vrot.slane %v876_v7, 1  ;;  %v883_v17 = vmul.f32 0.5, %v857_v6  ;;  %v889_v36 = vadd.f32 1e-05, %v881_v10  ;;  %v871_v23 = vadd.f32 %v870_v12, %v869_v53 }
  0x97   : > { %v884_v18 = vmul.f32 0.5, %v864_v11  ;;  %v890_v38 = vadd.f32 1e-05, %v882_v15  ;;  %1214 = vrsqrt.f32 %v888_v58  ;;  %v954_v60 = vrot.slane %v949_v47, %v1437_v54 }
  0x98   : > { %v878_v40 = vadd.f32 %v877_v33, %v876_v7  ;;  %v891_v24 = vadd.f32 1e-05, %v883_v17  ;;  %1216 = vrsqrt.f32 %v889_v36  ;;  %v885_v30 = vmul.f32 0.5, %v871_v23 }
  0x99   : > { %v892_v29 = vadd.f32 1e-05, %v884_v18  ;;  %1218 = vrsqrt.f32 %v890_v38  ;;  %v958_v52 = vrot.slane %v949_v47, %v1440_v55  ;;  %v962_v8 = vrot.slane %v949_v47, %v1443_v56 }
  0x9a   : > { %v886_v35 = vmul.f32 0.5, %v878_v40  ;;  %1220 = vrsqrt.f32 %v891_v24  ;;  %v893_v57 = vadd.f32 1e-05, %v885_v30  ;;  %v966_v14 = vrot.slane %v949_v47, %v1650_v13 }
  0x9b   : > { %1222 = vrsqrt.f32 %v892_v29  ;;  %v1026_v16 = vrot.slane %v1021_v51, %v1437_v54  ;;  %v1030_v19 = vrot.slane %v1021_v51, %v1440_v55  ;;  %v1034_v20 = vrot.slane %v1021_v51, %v1443_v56 }
  0x9c   : > { %v894_v59 = vadd.f32 1e-05, %v886_v35  ;;  %1224 = vrsqrt.f32 %v893_v57  ;;  %v1038_v21 = vrot.slane %v1021_v51, %v1650_v13  ;;  %v983_v25 = vcombine.low %v954_v60, %v958_v52 }
  0x9d   : > { %v984_v26 = vcombine.low %v962_v8, %v966_v14  ;;  %v970_v31 = vrot.slane %v949_v47, %v1651_v28  ;;  %v974_v34 = vrot.slane %v949_v47, %v1652_v32  ;;  %v978_v39 = vrot.slane %v949_v47, %v1653_v37 }
  0x9e   : > { %1226 = vrsqrt.f32 %v894_v59  ;;  %v982_v41 = vrot.slane %v949_v47, %v1458_v61  ;;  %v1055_v43 = vcombine.low %v1026_v16, %v1030_v19  ;;  %v1056_v55 = vcombine.low %v1034_v20, %v1038_v21 }
  0x9f   : > { %v991_v56 = vrot.slane %v983_v25, %v1517_v9  ;;  %v1042_v45 = vrot.slane %v1021_v51, %v1651_v28  ;;  %v1046_v46 = vrot.slane %v1021_v51, %v1652_v32  ;;  %v1050_v48 = vrot.slane %v1021_v51, %v1653_v37 }
  0xa0   : > { %v998_v1 = vrot.slane %v984_v26, %v1517_v9  ;;  %v1054_v2 = vrot.slane %v1021_v51, %v1458_v61  ;;  %v1000_v4 = vcombine.low %v970_v31, %v974_v34  ;;  %v1001_v5 = vcombine.low %v978_v39, %v982_v41 }
  0xa1   : > { %v1063_v7 = vrot.slane %v1055_v43, %v1517_v9  ;;  %v1070_v10 = vrot.slane %v1056_v55, %v1517_v9  ;;  %v1072_v12 = vcombine.low %v1042_v45, %v1046_v46 }
  0xa2   : > { %v1213_v22 = vpop.eup %1212  ;;  %v999_v58 = vcombine.low %v991_v56, %v998_v1  ;;  %v1073_v33 = vcombine.low %v1050_v48, %v1054_v2  ;;  %v1008_v36 = vrot.slane %v1000_v4, %v1517_v9  ;;  %v1015_v61 = vrot.slane %v1001_v5, %v1517_v9 }
  0xa3   : > { %v1071_v40 = vcombine.low %v1063_v7, %v1070_v10  ;;  %v1080_v30 = vrot.slane %v1072_v12, %v1517_v9 }
  0xa4   : > { %v1215_v27 = vpop.eup %1214  ;;  %v1087_v35 = vrot.slane %v1073_v33, %v1517_v9  ;;  %v1016_v57 = vcombine.low %v1008_v36, %v1015_v61 }
  0xa5   : > { %v1217_v42 = vpop.eup %1216  ;;  %v911_v54 = vcombine.low %v1213_v22, %v1215_v27 }
  0xa6   : > { %v1219_v44 = vpop.eup %1218  ;;  %v1088_v52 = vcombine.low %v1080_v30, %v1087_v35 }
  0xa7   : > { %v1221_v49 = vpop.eup %1220  ;;  %v912_v62 = vcombine.low %v1217_v42, %v1219_v44  ;;  %v919_v63 = vrot.slane %v911_v54, %v1517_v9 }
  0xa8   : > { %v1223_v3 = vpop.eup %1222 }
  0xa9   : > { %v926_v6 = vrot.slane %v912_v62, %v1517_v9  ;;  %v928_v53 = vcombine.low %v1221_v49, %v1223_v3  ;;  %v1225_v11 = vpop.eup %1224 }
  0xab   : > { %v927_v15 = vcombine.low %v919_v63, %v926_v6  ;;  %v1227_v17 = vpop.eup %1226  ;;  %v936_v38 = vrot.slane %v928_v53, %v1517_v9 }
  0xac   : > { %v929_v18 = vcombine.low %v1225_v11, %v1227_v17 }
  0xad   : > { %v947_v23 = vmul.f32 %v927_v15, %v1538_v50 }
  0xae   : > { %v943_v24 = vrot.slane %v929_v18, %v1517_v9 }
  0xaf   : > { %v1019_v29 = vmul.f32 %v999_v58, %v947_v23 }
  0xb0   : > { %v944_v47 = vcombine.low %v936_v38, %v943_v24 }
  0xb1   : > { %v1091_v59 = vadd.f32 %v1071_v40, %v1019_v29 }
  0xb2   : > { %v948_v60 = vmul.f32 %v944_v47, %v1543_v0 }
  0xb3   : > { %1093 = vst [vmem:[#allocation2] sm:$0xff] %v1091_v59 }
  0xb4   : > { %v1020_v51 = vmul.f32 %v1016_v57, %v948_v60 }
  0xb6   : > { %v1092_v8 = vadd.f32 %v1088_v52, %v1020_v51 }
  0xb8   : > { %1094 = vst [vmem:[#allocation2 + $0x8] sm:$0xff] %v1092_v8 }
  0xb9 PF: > { %p1193_p6 = scmp.eq.s32.totalorder %s1338_s22, 1  ;;  %s1295_s17 = smov [#allocation2]  }
  0xba   : > { %s1102_s18 = sshll.u32 %s1295_s17, 4  ;;  %s1296_s19 = smov [#allocation4]   ;;  %s1103_s18 = int_to_ptr.vmem [resolvable:$true] %s1102_s18 }
  0xbb   : > { %s1113_s20 = sshll.u32 %s1296_s19, 4  ;;  %s1228_s23 = scalar_lea.vmem %s1103_s18, 256  ;;  %s1114_s20 = int_to_ptr.vmem [resolvable:$true] %s1113_s20 }
  0xbc   : > { %p1229_p7 = scmp.ne.s32.totalorder %s1103_s18, %s1228_s23  ;;  %p1235_p10 = scmp.lt.s32.totalorder %s1103_s18, %s1103_s18 }
  0xbd   : > { %p1236_p11 = scmp.lt.s32.totalorder %s1228_s23, %s1228_s23 }
  0xbe   : > { %p1230_p8 = pnand %p1229_p7, %p1193_p6 }
  0xbf   : > { %p1237_p12 = por %p1236_p11, %p1235_p10 }
  0xc0   : > { %p1231_p9 = pneg %p1230_p8 }
  0xc2   : > { %p1238_p13 = pnand %p1237_p12, %p1231_p9 }
  0xc4   : > { %1241 = shalt.err (!%p1238_p13)
}
  0xc5   : > { %1186 = dma.vmem_to_hbm [thread:$0]  (%p1193_p6), %s1103_s18, 256, %s1626_s5, [#allocation3]  }
  0xc6   : > { %s1252_s26 = scalar_lea.vmem %s1114_s20, 256  ;;  %p1259_p3 = scmp.lt.s32.totalorder %s1114_s20, %s1114_s20 }
  0xc7   : > { %p1253_p0 = scmp.ne.s32.totalorder %s1114_s20, %s1252_s26  ;;  %p1260_p4 = scmp.lt.s32.totalorder %s1252_s26, %s1252_s26 }
  0xc9   : > { %p1254_p1 = pnand %p1253_p0, %p1193_p6  ;;  %p1261_p5 = por %p1260_p4, %p1259_p3 }
  0xcb   : > { %p1255_p2 = pneg %p1254_p1 }
  0xcd   : > { %p1262_p7 = pnand %p1261_p5, %p1255_p2 }
  0xcf   : > { %1265 = shalt.err (!%p1262_p7)
}
  0xd0   : > { %1188 = dma.vmem_to_hbm [thread:$0]  (%p1193_p6), %s1114_s20, 256, %s1627_s6, [#allocation5]  }
  0xd1   : > { %1281 = dma.done.wait (%p1193_p6), [#allocation3], 256  }
  0xd2   : > { %1283 = vsyncadd (%p1193_p6), [#allocation3], 4294967040 }
  0xd3   : > { %1285 = dma.done.wait (%p1193_p6), [#allocation5], 256  }
  0xd4   : > { %1287 = vsyncadd (%p1193_p6), [#allocation5], 4294967040 }
  0xd5 PF: > { %s19_s21 = sadd.s32 1, %s1290_s21  }
  0xd6   : > { %p16_p8 = scmp.ge.s32.totalorder %s19_s21, 4  }
  0xd8   :  { %18 = sbr.rel (!%p16_p8) target bundleno = 2 (0x2), region = 84 }
  0xdd   :  { %1130 = vsyncpa [#allocation3], 1 }
  0xde   :  { %1132 = vsyncpa [#allocation3 + $0x1], 1 }
  0xdf   :  { %1133 = vsyncpa [#allocation5], 1 }

</bundles_post_ra>
